<compile_context>
chip_gen: v6e
topology: v6e:2x2x1
jax: 0.10.0
libtpu: 0.0.40
codegen_flags: <defaults>
</compile_context>

<pallas_src>
import functools

import jax
import jax.numpy as jnp
from jax.experimental import pallas as pl
from jax.experimental.pallas import tpu as pltpu

EPS = 1e-5


# --------------------------------------------------------------------------
# helpers
# --------------------------------------------------------------------------
def _pick_row_tile(h):
    """Largest row-tile <=32 that divides H and leaves >=2 tiles (else full H)."""
    for th in (32, 16, 8, 4, 2, 1):
        if h % th == 0 and h // th >= 2:
            return th
    return h


def _pick_block_rows(total, lane_width):
    """Row-block for the elementwise BN pass: multiple of 8, modest VMEM."""
    budget = max((4 * 1024 * 1024) // (lane_width * 4), 8)
    for cand in (512, 256, 128, 64, 32, 16, 8):
        if cand <= budget and total % cand == 0 and total // cand >= 2:
            return cand
    return total


def _conv3x3_im2col(slab, w_ref, th, wo):
    """slab: (TH+2, W+2, C) values; w_ref: (9*C, Cout). One K=9*C MXU matmul."""
    cin = slab.shape[-1]
    taps = [slab[dy:dy + th, dx:dx + wo, :]
            for dy in range(3) for dx in range(3)]          # im2col once per tile
    patches = jnp.concatenate(taps, axis=-1).reshape(th * wo, 9 * cin)
    return jnp.dot(patches.astype(w_ref.dtype), w_ref[...],
                   preferred_element_type=jnp.float32)       # f32 accumulation


def _bn_fold(stats, gamma, beta, count):
    """Reduce per-tile [sum, sumsq] partials -> folded per-channel scale/shift."""
    tot = jnp.sum(stats, axis=(0, 1), dtype=jnp.float32)     # (2, C)
    mean = tot[0] / count
    var = tot[1] / count - mean * mean                       # biased var (training BN)
    scale = gamma * jax.lax.rsqrt(var + EPS)
    shift = beta - mean * scale
    return scale, shift


# --------------------------------------------------------------------------
# kernels
# --------------------------------------------------------------------------
def _conv1_kernel(x_ref, w_ref, y_ref, stats_ref):
    # x_ref:     (1, H+2, W+2, Cin)  full zero-padded image (resident per image)
    # w_ref:     (9*Cin, Cout)       packed conv1 weights
    # y_ref:     (1, TH, W, Cout)    pre-BN conv1 output tile
    # stats_ref: (1, 1, 2, Cout)     per-tile [sum, sum_of_squares] (f32)
    r = pl.program_id(1)
    th, wo, cout = y_ref.shape[1], y_ref.shape[2], y_ref.shape[3]

    row0 = pl.multiple_of(r * th, th)
    slab = x_ref[0, pl.ds(row0, th + 2), :, :]               # (TH+2, W+2, Cin)

    # NOTE: conv bias is dropped on purpose — it cancels exactly under the
    # batch-norm mean subtraction that follows.
    acc = _conv3x3_im2col(slab, w_ref, th, wo)               # (TH*W, Cout) f32

    s = jnp.sum(acc, axis=0, keepdims=True)
    ss = jnp.sum(acc * acc, axis=0, keepdims=True)
    stats_ref[...] = jnp.concatenate([s, ss], axis=0).reshape(1, 1, 2, cout)

    y_ref[...] = acc.reshape(1, th, wo, cout).astype(y_ref.dtype)


def _bn1_relu_conv2_kernel(y1_ref, w_ref, scale_ref, shift_ref, y_ref, stats_ref):
    # y1_ref:    (1, H+2, W+2, C)  zero-padded pre-BN conv1 output (full image)
    # w_ref:     (9*C, C)          packed conv2 weights
    # scale/shift: (1, 1, C)       folded BN1 affine (f32)
    # y_ref:     (1, TH, W, C)     pre-BN conv2 output tile
    # stats_ref: (1, 1, 2, C)
    r = pl.program_id(1)
    th, wo, c = y_ref.shape[1], y_ref.shape[2], y_ref.shape[3]
    hp, wp = y1_ref.shape[1], y1_ref.shape[2]

    row0 = pl.multiple_of(r * th, th)
    slab = y1_ref[0, pl.ds(row0, th + 2), :, :].astype(jnp.float32)

    # Folded BN1 (scale*x + shift) + ReLU, in one FMA pass; keep the global
    # zero-padding positions at zero so conv2 sees correct padding.
    act = jnp.maximum(slab * scale_ref[...] + shift_ref[...], 0.0)
    rows = row0 + jax.lax.broadcasted_iota(jnp.int32, (th + 2, wp, 1), 0)
    cols = jax.lax.broadcasted_iota(jnp.int32, (th + 2, wp, 1), 1)
    valid = (rows >= 1) & (rows <= hp - 2) & (cols >= 1) & (cols <= wp - 2)
    act = jnp.where(valid, act, 0.0).astype(w_ref.dtype)

    acc = _conv3x3_im2col(act, w_ref, th, wo)                # (TH*W, C) f32

    s = jnp.sum(acc, axis=0, keepdims=True)
    ss = jnp.sum(acc * acc, axis=0, keepdims=True)
    stats_ref[...] = jnp.concatenate([s, ss], axis=0).reshape(1, 1, 2, c)

    y_ref[...] = acc.reshape(1, th, wo, c).astype(y_ref.dtype)


def _bn2_relu_kernel(y_ref, scale_ref, shift_ref, o_ref):
    # Lane-dense elementwise pass over (N*H, W*Cout) row blocks.
    y = y_ref[...].astype(jnp.float32)
    o_ref[...] = jnp.maximum(y * scale_ref[...] + shift_ref[...], 0.0
                             ).astype(o_ref.dtype)


# --------------------------------------------------------------------------
# public wrapper
# --------------------------------------------------------------------------
@functools.partial(jax.jit, static_argnames=("compute_dtype",))
def double_conv(x_nchw, params, compute_dtype=jnp.bfloat16):
    """x_nchw: (N, Cin, H, W) f32 -> (N, Cout, H, W) f32 (training-mode BN)."""
    w1, b1, g1, be1, w2, b2, g2, be2 = params   # b1/b2 unused: cancelled by BN mean
    del b1, b2
    n, cin, h, w = x_nchw.shape
    cout = w1.shape[0]
    cdt = compute_dtype
    itemsize = jnp.dtype(cdt).itemsize

    th = _pick_row_tile(h)
    nh = h // th
    m = n * h * w

    # NCHW -> NHWC, zero pad, cast to MXU dtype.
    x_pad = jnp.pad(jnp.transpose(x_nchw, (0, 2, 3, 1)),
                    ((0, 0), (1, 1), (1, 1), (0, 0))).astype(cdt)

    # (Cout, Cin, 3, 3) -> (3, 3, Cin, Cout) -> (9*Cin, Cout): matches the
    # in-kernel (dy, dx, cin) im2col packing.
    w1_p = jnp.transpose(w1, (2, 3, 1, 0)).reshape(9 * cin, cout).astype(cdt)
    w2_p = jnp.transpose(w2, (2, 3, 1, 0)).reshape(9 * cout, cout).astype(cdt)

    def img_spec(ch):
        return pl.BlockSpec((1, h + 2, w + 2, ch), lambda i, r: (i, 0, 0, 0))

    def w_spec(k):
        return pl.BlockSpec((k, cout), lambda i, r: (0, 0))

    tile_spec = pl.BlockSpec((1, th, w, cout), lambda i, r: (i, r, 0, 0))
    stats_spec = pl.BlockSpec((1, 1, 2, cout), lambda i, r: (i, r, 0, 0))
    vec_spec = pl.BlockSpec((1, 1, cout), lambda i, r: (0, 0, 0))

    grid = (n, nh)
    cparams = pltpu.CompilerParams(
        dimension_semantics=("parallel", "parallel"),
        vmem_limit_bytes=48 * 1024 * 1024)

    # ---- call 1: conv1 + per-tile BN1 statistics --------------------------
    y1, st1 = pl.pallas_call(
        _conv1_kernel,
        grid=grid,
        in_specs=[img_spec(cin), w_spec(9 * cin)],
        out_specs=(tile_spec, stats_spec),
        out_shape=(jax.ShapeDtypeStruct((n, h, w, cout), cdt),
                   jax.ShapeDtypeStruct((n, nh, 2, cout), jnp.float32)),
        compiler_params=cparams,
        cost_estimate=pl.CostEstimate(
            flops=2 * m * 9 * cin * cout,
            transcendentals=0,
            bytes_accessed=(n * (h + 2) * (w + 2) * cin + m * cout) * itemsize),
    )(x_pad, w1_p)

    scale1, shift1 = _bn_fold(st1, g1, be1, m)

    # ---- call 2: BN1 affine + ReLU + conv2 + per-tile BN2 statistics ------
    y1_pad = jnp.pad(y1, ((0, 0), (1, 1), (1, 1), (0, 0)))
    y2, st2 = pl.pallas_call(
        _bn1_relu_conv2_kernel,
        grid=grid,
        in_specs=[img_spec(cout), w_spec(9 * cout), vec_spec, vec_spec],
        out_specs=(tile_spec, stats_spec),
        out_shape=(jax.ShapeDtypeStruct((n, h, w, cout), cdt),
                   jax.ShapeDtypeStruct((n, nh, 2, cout), jnp.float32)),
        compiler_params=cparams,
        cost_estimate=pl.CostEstimate(
            flops=2 * m * 9 * cout * cout,
            transcendentals=0,
            bytes_accessed=(n * (h + 2) * (w + 2) * cout + m * cout) * itemsize),
    )(y1_pad, w2_p,
      scale1.reshape(1, 1, cout).astype(jnp.float32),
      shift1.reshape(1, 1, cout).astype(jnp.float32))

    scale2, shift2 = _bn_fold(st2, g2, be2, m)

    # ---- call 3: BN2 affine + ReLU, lane-dense (N*H, W*Cout) layout -------
    wc = w * cout
    rows_total = n * h
    tb = _pick_block_rows(rows_total, wc)
    y2_2d = y2.reshape(rows_total, wc)
    scale2_t = jnp.tile(scale2.astype(jnp.float32), w).reshape(1, wc)
    shift2_t = jnp.tile(shift2.astype(jnp.float32), w).reshape(1, wc)

    out2d = pl.pallas_call(
        _bn2_relu_kernel,
        grid=(rows_total // tb,),
        in_specs=[pl.BlockSpec((tb, wc), lambda i: (i, 0)),
                  pl.BlockSpec((1, wc), lambda i: (0, 0)),
                  pl.BlockSpec((1, wc), lambda i: (0, 0))],
        out_specs=pl.BlockSpec((tb, wc), lambda i: (i, 0)),
        out_shape=jax.ShapeDtypeStruct((rows_total, wc), jnp.float32),
        compiler_params=pltpu.CompilerParams(dimension_semantics=("parallel",)),
    )(y2_2d, scale2_t, shift2_t)

    out = out2d.reshape(n, h, w, cout)
    return jnp.transpose(out, (0, 3, 1, 2))


# --------------------------------------------------------------------------
# pure-JAX reference (PyTorch training-mode forward) and test
# --------------------------------------------------------------------------
def ref_double_conv(x, params):
    w1, b1, g1, be1, w2, b2, g2, be2 = params

    def block(x, w, b, g, be):
        y = jax.lax.conv_general_dilated(
            x, w, window_strides=(1, 1), padding="SAME",
            dimension_numbers=("NCHW", "OIHW", "NCHW")) + b[None, :, None, None]
        mean = jnp.mean(y, axis=(0, 2, 3), keepdims=True)
        var = jnp.mean((y - mean) ** 2, axis=(0, 2, 3), keepdims=True)
        y = (y - mean) / jnp.sqrt(var + EPS) * g[None, :, None, None] \
            + be[None, :, None, None]
        return jnp.maximum(y, 0.0)

    return block(block(x, w1, b1, g1, be1), w2, b2, g2, be2)


def init_params(key, in_channels, out_channels):
    ks = jax.random.split(key, 6)
    w1 = jax.random.normal(ks[0], (out_channels, in_channels, 3, 3), jnp.float32) * 0.1
    b1 = jax.random.normal(ks[1], (out_channels,), jnp.float32) * 0.1
    w2 = jax.random.normal(ks[2], (out_channels, out_channels, 3, 3), jnp.float32) * 0.1
    b2 = jax.random.normal(ks[3], (out_channels,), jnp.float32) * 0.1
    g1 = 1.0 + 0.1 * jax.random.normal(ks[4], (out_channels,), jnp.float32)
    be1 = 0.1 * jax.random.normal(ks[5], (out_channels,), jnp.float32)
    g2 = jnp.ones((out_channels,), jnp.float32)
    be2 = jnp.zeros((out_channels,), jnp.float32)
    return (w1, b1, g1, be1, w2, b2, g2, be2)


if __name__ == "__main__":
    key = jax.random.PRNGKey(0)
    kx, kp = jax.random.split(key)

    N, Cin, Cout, H, W = 2, 4, 8, 16, 16
    x = jax.random.normal(kx, (N, Cin, H, W), jnp.float32)
    params = init_params(kp, Cin, Cout)

    ref = ref_double_conv(x, params)

    # f32 compute path: tight correctness check against the reference.
    out_f32 = jax.block_until_ready(double_conv(x, params, compute_dtype=jnp.float32))
    assert out_f32.shape == (N, Cout, H, W)
    assert jnp.allclose(out_f32, ref, atol=2e-3, rtol=2e-3), (
        "f32 mismatch, max abs err = %e" % float(jnp.max(jnp.abs(out_f32 - ref))))

    # bf16 compute path (default, MXU-friendly): looser bf16-level tolerance.
    out_bf16 = jax.block_until_ready(double_conv(x, params))
    assert out_bf16.shape == (N, Cout, H, W)
    assert float(jnp.max(jnp.abs(out_bf16 - ref))) < 1e-1, "bf16 mismatch"

    print("KERNEL_OK")
</pallas_src>

<mosaic_0001>
module attributes {stable_mosaic.version = 11 : i64} {
  func.func @_conv1_kernel(%arg0: i32, %arg1: i32, %arg2: memref<1x18x18x4xf32, #tpu.memory_space<vmem>>, %arg3: memref<36x8xf32, #tpu.memory_space<vmem>>, %arg4: memref<1x8x16x8xf32, #tpu.memory_space<vmem>>, %arg5: memref<1x1x2x8xf32, #tpu.memory_space<vmem>>) attributes {dimension_semantics = [#tpu.dimension_semantics<parallel>, #tpu.dimension_semantics<parallel>], iteration_bounds = array<i64: 2, 2>, scalar_prefetch = 0 : i64, scratch_operands = 0 : i64, tpu.core_type = #tpu.core_type<tc>, window_params = [{transform_indices = @transform_0, window_bounds = array<i64: 1, 18, 18, 4>}, {pipeline_mode = #tpu.pipeline_mode<synchronous>, transform_indices = @transform_1, window_bounds = array<i64: 36, 8>}, {transform_indices = @transform_2, window_bounds = array<i64: 1, 8, 16, 8>}, {transform_indices = @transform_3, window_bounds = array<i64: 1, 1, 2, 8>}]} {
    %c8_i32 = arith.constant 8 : i32
    %0 = arith.muli %arg1, %c8_i32 : i32
    %1 = tpu.assume_multiple %0, 8 : i32
    %c0 = arith.constant 0 : index
    %2 = arith.index_cast %1 : i32 to index
    %c0_0 = arith.constant 0 : index
    %c0_1 = arith.constant 0 : index
    %3 = vector.load %arg2[%c0, %2, %c0_0, %c0_1] : memref<1x18x18x4xf32, #tpu.memory_space<vmem>>, vector<1x10x18x4xf32>
    %4 = vector.shape_cast %3 : vector<1x10x18x4xf32> to vector<10x18x4xf32>
    %5 = vector.extract_strided_slice %4 {offsets = [0, 0, 0], sizes = [8, 16, 4], strides = [1, 1, 1]} : vector<10x18x4xf32> to vector<8x16x4xf32>
    %6 = vector.extract_strided_slice %4 {offsets = [0, 1, 0], sizes = [8, 16, 4], strides = [1, 1, 1]} : vector<10x18x4xf32> to vector<8x16x4xf32>
    %7 = vector.extract_strided_slice %4 {offsets = [0, 2, 0], sizes = [8, 16, 4], strides = [1, 1, 1]} : vector<10x18x4xf32> to vector<8x16x4xf32>
    %8 = vector.extract_strided_slice %4 {offsets = [1, 0, 0], sizes = [8, 16, 4], strides = [1, 1, 1]} : vector<10x18x4xf32> to vector<8x16x4xf32>
    %9 = vector.extract_strided_slice %4 {offsets = [1, 1, 0], sizes = [8, 16, 4], strides = [1, 1, 1]} : vector<10x18x4xf32> to vector<8x16x4xf32>
    %10 = vector.extract_strided_slice %4 {offsets = [1, 2, 0], sizes = [8, 16, 4], strides = [1, 1, 1]} : vector<10x18x4xf32> to vector<8x16x4xf32>
    %11 = vector.extract_strided_slice %4 {offsets = [2, 0, 0], sizes = [8, 16, 4], strides = [1, 1, 1]} : vector<10x18x4xf32> to vector<8x16x4xf32>
    %12 = vector.extract_strided_slice %4 {offsets = [2, 1, 0], sizes = [8, 16, 4], strides = [1, 1, 1]} : vector<10x18x4xf32> to vector<8x16x4xf32>
    %13 = vector.extract_strided_slice %4 {offsets = [2, 2, 0], sizes = [8, 16, 4], strides = [1, 1, 1]} : vector<10x18x4xf32> to vector<8x16x4xf32>
    %14 = tpu.concatenate %5, %6, %7, %8, %9, %10, %11, %12, %13 in 2 : vector<8x16x4xf32>, vector<8x16x4xf32>, vector<8x16x4xf32>, vector<8x16x4xf32>, vector<8x16x4xf32>, vector<8x16x4xf32>, vector<8x16x4xf32>, vector<8x16x4xf32>, vector<8x16x4xf32> -> vector<8x16x36xf32>
    %15 = vector.shape_cast %14 : vector<8x16x36xf32> to vector<128x36xf32>
    %c0_2 = arith.constant 0 : index
    %c0_3 = arith.constant 0 : index
    %16 = vector.load %arg3[%c0_2, %c0_3] : memref<36x8xf32, #tpu.memory_space<vmem>>, vector<36x8xf32>
    %cst = arith.constant dense<0.000000e+00> : vector<128x8xf32>
    %17 = tpu.matmul %15, %16, %cst {dimension_numbers = #tpu.dot_dimension_numbers<[1], [0], [0], [1], [0, 0, 1, 1], [], []>} : vector<128x36xf32>, vector<36x8xf32>, vector<128x8xf32> -> vector<128x8xf32>
    %cst_4 = arith.constant dense<0.000000e+00> : vector<8xf32>
    %18 = vector.multi_reduction <add>, %17, %cst_4 [0] : vector<128x8xf32> to vector<8xf32>
    %19 = vector.shape_cast %18 : vector<8xf32> to vector<1x8xf32>
    %20 = arith.mulf %17, %17 : vector<128x8xf32>
    %cst_5 = arith.constant dense<0.000000e+00> : vector<8xf32>
    %21 = vector.multi_reduction <add>, %20, %cst_5 [0] : vector<128x8xf32> to vector<8xf32>
    %22 = vector.shape_cast %21 : vector<8xf32> to vector<1x8xf32>
    %23 = tpu.concatenate %19, %22 in 0 : vector<1x8xf32>, vector<1x8xf32> -> vector<2x8xf32>
    %24 = vector.shape_cast %23 : vector<2x8xf32> to vector<1x1x2x8xf32>
    %c0_6 = arith.constant 0 : index
    %c0_7 = arith.constant 0 : index
    %c0_8 = arith.constant 0 : index
    %c0_9 = arith.constant 0 : index
    %25 = vector.load %arg5[%c0_6, %c0_7, %c0_8, %c0_9] : memref<1x1x2x8xf32, #tpu.memory_space<vmem>>, vector<1x1x2x8xf32>
    tpu.vector_store %arg5[%c0_6, %c0_7, %c0_8, %c0_9], %24 {strides = array<i32>} : memref<1x1x2x8xf32, #tpu.memory_space<vmem>>, vector<1x1x2x8xf32>,
    %26 = vector.shape_cast %17 : vector<128x8xf32> to vector<1x8x16x8xf32>
    %c0_10 = arith.constant 0 : index
    %c0_11 = arith.constant 0 : index
    %c0_12 = arith.constant 0 : index
    %c0_13 = arith.constant 0 : index
    %27 = vector.load %arg4[%c0_10, %c0_11, %c0_12, %c0_13] : memref<1x8x16x8xf32, #tpu.memory_space<vmem>>, vector<1x8x16x8xf32>
    tpu.vector_store %arg4[%c0_10, %c0_11, %c0_12, %c0_13], %26 {strides = array<i32>} : memref<1x8x16x8xf32, #tpu.memory_space<vmem>>, vector<1x8x16x8xf32>,
    return
  }
  func.func @transform_0(%arg0: i32, %arg1: i32) -> (i32, i32, i32, i32) {
    %c0_i32 = arith.constant 0 : i32
    %c0_i32_0 = arith.constant 0 : i32
    %c0_i32_1 = arith.constant 0 : i32
    %c0_i32_2 = arith.constant 0 : i32
    return %arg0, %c0_i32, %c0_i32_0, %c0_i32_1 : i32, i32, i32, i32
  }
  func.func @transform_1(%arg0: i32, %arg1: i32) -> (i32, i32) {
    %c0_i32 = arith.constant 0 : i32
    %c0_i32_0 = arith.constant 0 : i32
    %c0_i32_1 = arith.constant 0 : i32
    return %c0_i32, %c0_i32_0 : i32, i32
  }
  func.func @transform_2(%arg0: i32, %arg1: i32) -> (i32, i32, i32, i32) {
    %c0_i32 = arith.constant 0 : i32
    %c0_i32_0 = arith.constant 0 : i32
    %c0_i32_1 = arith.constant 0 : i32
    return %arg0, %arg1, %c0_i32, %c0_i32_0 : i32, i32, i32, i32
  }
  func.func @transform_3(%arg0: i32, %arg1: i32) -> (i32, i32, i32, i32) {
    %c0_i32 = arith.constant 0 : i32
    %c0_i32_0 = arith.constant 0 : i32
    %c0_i32_1 = arith.constant 0 : i32
    return %arg0, %arg1, %c0_i32, %c0_i32_0 : i32, i32, i32, i32
  }
}

module attributes {stable_mosaic.version = 11 : i64} {
  func.func @_bn1_relu_conv2_kernel(%arg0: i32, %arg1: i32, %arg2: memref<1x18x18x8xf32, #tpu.memory_space<vmem>>, %arg3: memref<72x8xf32, #tpu.memory_space<vmem>>, %arg4: memref<1x1x8xf32, #tpu.memory_space<vmem>>, %arg5: memref<1x1x8xf32, #tpu.memory_space<vmem>>, %arg6: memref<1x8x16x8xf32, #tpu.memory_space<vmem>>, %arg7: memref<1x1x2x8xf32, #tpu.memory_space<vmem>>) attributes {dimension_semantics = [#tpu.dimension_semantics<parallel>, #tpu.dimension_semantics<parallel>], iteration_bounds = array<i64: 2, 2>, scalar_prefetch = 0 : i64, scratch_operands = 0 : i64, tpu.core_type = #tpu.core_type<tc>, window_params = [{transform_indices = @transform_0, window_bounds = array<i64: 1, 18, 18, 8>}, {pipeline_mode = #tpu.pipeline_mode<synchronous>, transform_indices = @transform_1, window_bounds = array<i64: 72, 8>}, {pipeline_mode = #tpu.pipeline_mode<synchronous>, transform_indices = @transform_2, window_bounds = array<i64: 1, 1, 8>}, {pipeline_mode = #tpu.pipeline_mode<synchronous>, transform_indices = @transform_3, window_bounds = array<i64: 1, 1, 8>}, {transform_indices = @transform_4, window_bounds = array<i64: 1, 8, 16, 8>}, {transform_indices = @transform_5, window_bounds = array<i64: 1, 1, 2, 8>}]} {
    %c8_i32 = arith.constant 8 : i32
    %0 = arith.muli %arg1, %c8_i32 : i32
    %1 = tpu.assume_multiple %0, 8 : i32
    %c0 = arith.constant 0 : index
    %2 = arith.index_cast %1 : i32 to index
    %c0_0 = arith.constant 0 : index
    %c0_1 = arith.constant 0 : index
    %3 = vector.load %arg2[%c0, %2, %c0_0, %c0_1] : memref<1x18x18x8xf32, #tpu.memory_space<vmem>>, vector<1x10x18x8xf32>
    %4 = vector.shape_cast %3 : vector<1x10x18x8xf32> to vector<10x18x8xf32>
    %c0_2 = arith.constant 0 : index
    %c0_3 = arith.constant 0 : index
    %c0_4 = arith.constant 0 : index
    %5 = vector.load %arg4[%c0_2, %c0_3, %c0_4] : memref<1x1x8xf32, #tpu.memory_space<vmem>>, vector<1x1x8xf32>
    %6 = vector.broadcast %5 : vector<1x1x8xf32> to vector<10x18x8xf32>
    %7 = arith.mulf %4, %6 : vector<10x18x8xf32>
    %c0_5 = arith.constant 0 : index
    %c0_6 = arith.constant 0 : index
    %c0_7 = arith.constant 0 : index
    %8 = vector.load %arg5[%c0_5, %c0_6, %c0_7] : memref<1x1x8xf32, #tpu.memory_space<vmem>>, vector<1x1x8xf32>
    %9 = vector.broadcast %8 : vector<1x1x8xf32> to vector<10x18x8xf32>
    %10 = arith.addf %7, %9 : vector<10x18x8xf32>
    %cst = arith.constant 0.000000e+00 : f32
    %11 = vector.broadcast %cst : f32 to vector<10x18x8xf32>
    %12 = arith.maximumf %10, %11 : vector<10x18x8xf32>
    %13 = tpu.iota {dimensions = array<i32: 0>} : vector<10x18x1xi32>
    %14 = vector.broadcast %1 : i32 to vector<10x18x1xi32>
    %15 = arith.addi %14, %13 : vector<10x18x1xi32>
    %16 = tpu.iota {dimensions = array<i32: 1>} : vector<10x18x1xi32>
    %c1_i32 = arith.constant 1 : i32
    %17 = vector.broadcast %c1_i32 : i32 to vector<10x18x1xi32>
    %18 = arith.cmpi sge, %15, %17 : vector<10x18x1xi32>
    %c16_i32 = arith.constant 16 : i32
    %19 = vector.broadcast %c16_i32 : i32 to vector<10x18x1xi32>
    %20 = arith.cmpi sle, %15, %19 : vector<10x18x1xi32>
    %21 = arith.andi %18, %20 : vector<10x18x1xi1>
    %c1_i32_8 = arith.constant 1 : i32
    %22 = vector.broadcast %c1_i32_8 : i32 to vector<10x18x1xi32>
    %23 = arith.cmpi sge, %16, %22 : vector<10x18x1xi32>
    %24 = arith.andi %21, %23 : vector<10x18x1xi1>
    %c16_i32_9 = arith.constant 16 : i32
    %25 = vector.broadcast %c16_i32_9 : i32 to vector<10x18x1xi32>
    %26 = arith.cmpi sle, %16, %25 : vector<10x18x1xi32>
    %27 = arith.andi %24, %26 : vector<10x18x1xi1>
    %cst_10 = arith.constant 0.000000e+00 : f32
    %28 = vector.shape_cast %27 : vector<10x18x1xi1> to vector<10x18x1xi1>
    %29 = vector.broadcast %28 : vector<10x18x1xi1> to vector<10x18x8xi1>
    %30 = vector.broadcast %cst_10 : f32 to vector<10x18x8xf32>
    %31 = arith.select %29, %12, %30 : vector<10x18x8xi1>, vector<10x18x8xf32>
    %32 = vector.extract_strided_slice %31 {offsets = [0, 0, 0], sizes = [8, 16, 8], strides = [1, 1, 1]} : vector<10x18x8xf32> to vector<8x16x8xf32>
    %33 = vector.extract_strided_slice %31 {offsets = [0, 1, 0], sizes = [8, 16, 8], strides = [1, 1, 1]} : vector<10x18x8xf32> to vector<8x16x8xf32>
    %34 = vector.extract_strided_slice %31 {offsets = [0, 2, 0], sizes = [8, 16, 8], strides = [1, 1, 1]} : vector<10x18x8xf32> to vector<8x16x8xf32>
    %35 = vector.extract_strided_slice %31 {offsets = [1, 0, 0], sizes = [8, 16, 8], strides = [1, 1, 1]} : vector<10x18x8xf32> to vector<8x16x8xf32>
    %36 = vector.extract_strided_slice %31 {offsets = [1, 1, 0], sizes = [8, 16, 8], strides = [1, 1, 1]} : vector<10x18x8xf32> to vector<8x16x8xf32>
    %37 = vector.extract_strided_slice %31 {offsets = [1, 2, 0], sizes = [8, 16, 8], strides = [1, 1, 1]} : vector<10x18x8xf32> to vector<8x16x8xf32>
    %38 = vector.extract_strided_slice %31 {offsets = [2, 0, 0], sizes = [8, 16, 8], strides = [1, 1, 1]} : vector<10x18x8xf32> to vector<8x16x8xf32>
    %39 = vector.extract_strided_slice %31 {offsets = [2, 1, 0], sizes = [8, 16, 8], strides = [1, 1, 1]} : vector<10x18x8xf32> to vector<8x16x8xf32>
    %40 = vector.extract_strided_slice %31 {offsets = [2, 2, 0], sizes = [8, 16, 8], strides = [1, 1, 1]} : vector<10x18x8xf32> to vector<8x16x8xf32>
    %41 = tpu.concatenate %32, %33, %34, %35, %36, %37, %38, %39, %40 in 2 : vector<8x16x8xf32>, vector<8x16x8xf32>, vector<8x16x8xf32>, vector<8x16x8xf32>, vector<8x16x8xf32>, vector<8x16x8xf32>, vector<8x16x8xf32>, vector<8x16x8xf32>, vector<8x16x8xf32> -> vector<8x16x72xf32>
    %42 = vector.shape_cast %41 : vector<8x16x72xf32> to vector<128x72xf32>
    %c0_11 = arith.constant 0 : index
    %c0_12 = arith.constant 0 : index
    %43 = vector.load %arg3[%c0_11, %c0_12] : memref<72x8xf32, #tpu.memory_space<vmem>>, vector<72x8xf32>
    %cst_13 = arith.constant dense<0.000000e+00> : vector<128x8xf32>
    %44 = tpu.matmul %42, %43, %cst_13 {dimension_numbers = #tpu.dot_dimension_numbers<[1], [0], [0], [1], [0, 0, 1, 1], [], []>} : vector<128x72xf32>, vector<72x8xf32>, vector<128x8xf32> -> vector<128x8xf32>
    %cst_14 = arith.constant dense<0.000000e+00> : vector<8xf32>
    %45 = vector.multi_reduction <add>, %44, %cst_14 [0] : vector<128x8xf32> to vector<8xf32>
    %46 = vector.shape_cast %45 : vector<8xf32> to vector<1x8xf32>
    %47 = arith.mulf %44, %44 : vector<128x8xf32>
    %cst_15 = arith.constant dense<0.000000e+00> : vector<8xf32>
    %48 = vector.multi_reduction <add>, %47, %cst_15 [0] : vector<128x8xf32> to vector<8xf32>
    %49 = vector.shape_cast %48 : vector<8xf32> to vector<1x8xf32>
    %50 = tpu.concatenate %46, %49 in 0 : vector<1x8xf32>, vector<1x8xf32> -> vector<2x8xf32>
    %51 = vector.shape_cast %50 : vector<2x8xf32> to vector<1x1x2x8xf32>
    %c0_16 = arith.constant 0 : index
    %c0_17 = arith.constant 0 : index
    %c0_18 = arith.constant 0 : index
    %c0_19 = arith.constant 0 : index
    %52 = vector.load %arg7[%c0_16, %c0_17, %c0_18, %c0_19] : memref<1x1x2x8xf32, #tpu.memory_space<vmem>>, vector<1x1x2x8xf32>
    tpu.vector_store %arg7[%c0_16, %c0_17, %c0_18, %c0_19], %51 {strides = array<i32>} : memref<1x1x2x8xf32, #tpu.memory_space<vmem>>, vector<1x1x2x8xf32>,
    %53 = vector.shape_cast %44 : vector<128x8xf32> to vector<1x8x16x8xf32>
    %c0_20 = arith.constant 0 : index
    %c0_21 = arith.constant 0 : index
    %c0_22 = arith.constant 0 : index
    %c0_23 = arith.constant 0 : index
    %54 = vector.load %arg6[%c0_20, %c0_21, %c0_22, %c0_23] : memref<1x8x16x8xf32, #tpu.memory_space<vmem>>, vector<1x8x16x8xf32>
    tpu.vector_store %arg6[%c0_20, %c0_21, %c0_22, %c0_23], %53 {strides = array<i32>} : memref<1x8x16x8xf32, #tpu.memory_space<vmem>>, vector<1x8x16x8xf32>,
    return
  }
  func.func @transform_0(%arg0: i32, %arg1: i32) -> (i32, i32, i32, i32) {
    %c0_i32 = arith.constant 0 : i32
    %c0_i32_0 = arith.constant 0 : i32
    %c0_i32_1 = arith.constant 0 : i32
    %c0_i32_2 = arith.constant 0 : i32
    return %arg0, %c0_i32, %c0_i32_0, %c0_i32_1 : i32, i32, i32, i32
  }
  func.func @transform_1(%arg0: i32, %arg1: i32) -> (i32, i32) {
    %c0_i32 = arith.constant 0 : i32
    %c0_i32_0 = arith.constant 0 : i32
    %c0_i32_1 = arith.constant 0 : i32
    return %c0_i32, %c0_i32_0 : i32, i32
  }
  func.func @transform_2(%arg0: i32, %arg1: i32) -> (i32, i32, i32) {
    %c0_i32 = arith.constant 0 : i32
    %c0_i32_0 = arith.constant 0 : i32
    %c0_i32_1 = arith.constant 0 : i32
    %c0_i32_2 = arith.constant 0 : i32
    return %c0_i32, %c0_i32_0, %c0_i32_1 : i32, i32, i32
  }
  func.func @transform_3(%arg0: i32, %arg1: i32) -> (i32, i32, i32) {
    %c0_i32 = arith.constant 0 : i32
    %c0_i32_0 = arith.constant 0 : i32
    %c0_i32_1 = arith.constant 0 : i32
    %c0_i32_2 = arith.constant 0 : i32
    return %c0_i32, %c0_i32_0, %c0_i32_1 : i32, i32, i32
  }
  func.func @transform_4(%arg0: i32, %arg1: i32) -> (i32, i32, i32, i32) {
    %c0_i32 = arith.constant 0 : i32
    %c0_i32_0 = arith.constant 0 : i32
    %c0_i32_1 = arith.constant 0 : i32
    return %arg0, %arg1, %c0_i32, %c0_i32_0 : i32, i32, i32, i32
  }
  func.func @transform_5(%arg0: i32, %arg1: i32) -> (i32, i32, i32, i32) {
    %c0_i32 = arith.constant 0 : i32
    %c0_i32_0 = arith.constant 0 : i32
    %c0_i32_1 = arith.constant 0 : i32
    return %arg0, %arg1, %c0_i32, %c0_i32_0 : i32, i32, i32, i32
  }
}

module attributes {stable_mosaic.version = 11 : i64} {
  func.func @_bn2_relu_kernel(%arg0: i32, %arg1: memref<16x128xf32, #tpu.memory_space<vmem>>, %arg2: memref<1x128xf32, #tpu.memory_space<vmem>>, %arg3: memref<1x128xf32, #tpu.memory_space<vmem>>, %arg4: memref<16x128xf32, #tpu.memory_space<vmem>>) attributes {dimension_semantics = [#tpu.dimension_semantics<parallel>], iteration_bounds = array<i64: 2>, scalar_prefetch = 0 : i64, scratch_operands = 0 : i64, tpu.core_type = #tpu.core_type<tc>, window_params = [{transform_indices = @transform_0, window_bounds = array<i64: 16, 128>}, {pipeline_mode = #tpu.pipeline_mode<synchronous>, transform_indices = @transform_1, window_bounds = array<i64: 1, 128>}, {pipeline_mode = #tpu.pipeline_mode<synchronous>, transform_indices = @transform_2, window_bounds = array<i64: 1, 128>}, {transform_indices = @transform_3, window_bounds = array<i64: 16, 128>}]} {
    %c0 = arith.constant 0 : index
    %c0_0 = arith.constant 0 : index
    %0 = vector.load %arg1[%c0, %c0_0] : memref<16x128xf32, #tpu.memory_space<vmem>>, vector<16x128xf32>
    %c0_1 = arith.constant 0 : index
    %c0_2 = arith.constant 0 : index
    %1 = vector.load %arg2[%c0_1, %c0_2] : memref<1x128xf32, #tpu.memory_space<vmem>>, vector<1x128xf32>
    %2 = vector.broadcast %1 : vector<1x128xf32> to vector<16x128xf32>
    %3 = arith.mulf %0, %2 : vector<16x128xf32>
    %c0_3 = arith.constant 0 : index
    %c0_4 = arith.constant 0 : index
    %4 = vector.load %arg3[%c0_3, %c0_4] : memref<1x128xf32, #tpu.memory_space<vmem>>, vector<1x128xf32>
    %5 = vector.broadcast %4 : vector<1x128xf32> to vector<16x128xf32>
    %6 = arith.addf %3, %5 : vector<16x128xf32>
    %cst = arith.constant 0.000000e+00 : f32
    %7 = vector.broadcast %cst : f32 to vector<16x128xf32>
    %8 = arith.maximumf %6, %7 : vector<16x128xf32>
    %c0_5 = arith.constant 0 : index
    %c0_6 = arith.constant 0 : index
    %9 = vector.load %arg4[%c0_5, %c0_6] : memref<16x128xf32, #tpu.memory_space<vmem>>, vector<16x128xf32>
    tpu.vector_store %arg4[%c0_5, %c0_6], %8 {strides = array<i32>} : memref<16x128xf32, #tpu.memory_space<vmem>>, vector<16x128xf32>,
    return
  }
  func.func @transform_0(%arg0: i32) -> (i32, i32) {
    %c0_i32 = arith.constant 0 : i32
    %c0_i32_0 = arith.constant 0 : i32
    return %arg0, %c0_i32 : i32, i32
  }
  func.func @transform_1(%arg0: i32) -> (i32, i32) {
    %c0_i32 = arith.constant 0 : i32
    %c0_i32_0 = arith.constant 0 : i32
    %c0_i32_1 = arith.constant 0 : i32
    return %c0_i32, %c0_i32_0 : i32, i32
  }
  func.func @transform_2(%arg0: i32) -> (i32, i32) {
    %c0_i32 = arith.constant 0 : i32
    %c0_i32_0 = arith.constant 0 : i32
    %c0_i32_1 = arith.constant 0 : i32
    return %c0_i32, %c0_i32_0 : i32, i32
  }
  func.func @transform_3(%arg0: i32) -> (i32, i32) {
    %c0_i32 = arith.constant 0 : i32
    %c0_i32_0 = arith.constant 0 : i32
    return %arg0, %c0_i32 : i32, i32
  }
}

</mosaic_0001>

<bundles_post_ra>
// kernel: tile.13
= control target key start
LH: loop header
LB: loop body
LE: loop exit
PB: predicated region body
PF: predicated region fallthrough
CT: control target
= control target key end

     0   :  { %s28_s0 = inlined_call_operand.vmem [shape: f32[8], index: 0, kind: input, shape index: {}]   ;;  %s29_s1 = inlined_call_operand.vmem [shape: f32[16,8], index: 1, kind: output, shape index: {}]  }
   0x1   :  { %v4_v0 = vld [vmem:[%s28_s0] ss:$0 sm:$0xff] }
   0x2   :  { %5 = vst [vmem:[%s29_s1] sm:$0xff] %v4_v0  ;;  %8 = vst [vmem:[%s29_s1 + $0x8] sm:$0xff] %v4_v0 }

// kernel: tile.14
= control target key start
LH: loop header
LB: loop body
LE: loop exit
PB: predicated region body
PF: predicated region fallthrough
CT: control target
= control target key end

     0   :  { %s133_s10 = smov 120   ;;  %s134_s11 = smov 104   ;;  %vm3_vm0 = vcmask 64512   ;;  %vm9_vm1 = vcmask 1048512   ;;  %vm15_vm2 = vcmask 982912   ;;  %vm21_vm3 = vcmask 917312   ;;  %s209_s0 = inlined_call_operand.vmem [shape: f32[16,8], index: 0, kind: input, shape index: {}]   ;;  %s210_s1 = inlined_call_operand.vmem [shape: f32[1,128], index: 1, kind: output, shape index: {}]  }
   0x1   :  { %v103_v0 = vld [vmem:[%s209_s0 + $0xf] sm:$0x1]   ;;  %v105_v1 = vld [vmem:[%s209_s0 + $0xd] sm:$0x1]   ;;  %v104_v2 = vld [vmem:[%s209_s0 + $0xe] sm:$0x1]  }
   0x2   :  { %7 = vrot.lane.b32.xlu0 %v103_v0, %s133_s10  ;;  %19 = vrot.lane.b32.xlu1 %v105_v1, %s134_s11  ;;  %v106_v3 = vld [vmem:[%s209_s0 + $0xc] sm:$0x1]   ;;  %s135_s16 = smov 112   ;;  %s136_s17 = smov 96   ;;  %v107_v4 = vld [vmem:[%s209_s0 + $0xb] sm:$0x1]  }
   0x3   :  { %v108_v5 = vld [vmem:[%s209_s0 + $0xa] sm:$0x1]   ;;  %v2_v6 = vld [vmem:[%s209_s0] sm:$0x1]   ;;  %s137_s24 = smov 88   ;;  %s138_s25 = smov 80  }
   0x4   :  { %4 = vst.msk [vmem:[#allocation0] sm:$0x1] %vm3_vm0, %v2_v6   ;;  %v109_v7 = vld [vmem:[%s209_s0 + $0x9] sm:$0x1]   ;;  %v110_v8 = vld [vmem:[%s209_s0 + $0x8] sm:$0x1]  }
   0x5   :  { %s139_s30 = smov 72   ;;  %s140_s2 = smov 64   ;;  %v111_v9 = vld [vmem:[%s209_s0 + $0x7] sm:$0x1]   ;;  %v112_v10 = vld [vmem:[%s209_s0 + $0x6] sm:$0x1]  }
   0x6   :  { %13 = vrot.lane.b32.xlu0 %v104_v2, %s135_s16  ;;  %25 = vrot.lane.b32.xlu1 %v106_v3, %s136_s17  ;;  %s141_s7 = smov 56   ;;  %s142_s8 = smov 48   ;;  %v113_v11 = vld [vmem:[%s209_s0 + $0x5] sm:$0x1]   ;;  %v114_v12 = vld [vmem:[%s209_s0 + $0x4] sm:$0x1]  }
   0x7   :  { %s143_s13 = smov 40   ;;  %s144_s14 = smov 32   ;;  %v115_v13 = vld [vmem:[%s209_s0 + $0x3] sm:$0x1]   ;;  %v116_v14 = vld [vmem:[%s209_s0 + $0x2] sm:$0x1]  }
   0x8   :  { %s145_s19 = smov 24   ;;  %s146_s20 = smov 16   ;;  %v117_v15 = vld [vmem:[%s209_s0 + $0x1] sm:$0x1]   ;;  %vm27_vm4 = vcmask 851712   ;;  %vm33_vm5 = vcmask 786112  }
   0x9   :  { %s147_s0 = smov 8   ;;  %vm39_vm6 = vcmask 720512   ;;  %vm45_vm7 = vcmask 654912   ;;  %vm51_vm8 = vcmask 589312   ;;  %vm57_vm9 = vcmask 523712  }
   0xa   :  { %31 = vrot.lane.b32.xlu0 %v107_v4, %s137_s24  ;;  %37 = vrot.lane.b32.xlu1 %v108_v5, %s138_s25  ;;  %vm63_vm10 = vcmask 458112   ;;  %vm69_vm11 = vcmask 392512   ;;  %vm75_vm12 = vcmask 326912   ;;  %vm81_vm13 = vcmask 261312  }
   0xb   :  { %vm87_vm14 = vcmask 195712   ;;  %vm93_vm15 = vcmask 130112  }
   0xe   :  { %43 = vrot.lane.b32.xlu0 %v109_v7, %s139_s30  ;;  %49 = vrot.lane.b32.xlu1 %v110_v8, %s140_s2 }
  0x12   :  { %55 = vrot.lane.b32.xlu0 %v111_v9, %s141_s7  ;;  %61 = vrot.lane.b32.xlu1 %v112_v10, %s142_s8 }
  0x16   :  { %67 = vrot.lane.b32.xlu0 %v113_v11, %s143_s13  ;;  %73 = vrot.lane.b32.xlu1 %v114_v12, %s144_s14 }
  0x1a   :  { %79 = vrot.lane.b32.xlu0 %v115_v13, %s145_s19  ;;  %85 = vrot.lane.b32.xlu1 %v116_v14, %s146_s20 }
  0x1e   :  { %91 = vrot.lane.b32.xlu0 %v117_v15, %s147_s0 }
  0x74   :  { %v8_v16 = vpop.permute.xlu0 %7   ;;  %v20_v17 = vpop.permute.xlu1 %19  }
  0x75   :  { %10 = vst.msk [vmem:[#allocation0] sm:$0x1] %vm9_vm1, %v8_v16  }
  0x78   :  { %v14_v18 = vpop.permute.xlu0 %13   ;;  %v26_v19 = vpop.permute.xlu1 %25  }
  0x79   :  { %16 = vst.msk [vmem:[#allocation0] sm:$0x1] %vm15_vm2, %v14_v18  }
  0x7a   :  { %22 = vst.msk [vmem:[#allocation0] sm:$0x1] %vm21_vm3, %v20_v17  }
  0x7b   :  { %28 = vst.msk [vmem:[#allocation0] sm:$0x1] %vm27_vm4, %v26_v19  }
  0x7c   :  { %v32_v20 = vpop.permute.xlu0 %31   ;;  %v38_v21 = vpop.permute.xlu1 %37  }
  0x7d   :  { %34 = vst.msk [vmem:[#allocation0] sm:$0x1] %vm33_vm5, %v32_v20  }
  0x7e   :  { %40 = vst.msk [vmem:[#allocation0] sm:$0x1] %vm39_vm6, %v38_v21  }
  0x80   :  { %v44_v22 = vpop.permute.xlu0 %43   ;;  %v50_v23 = vpop.permute.xlu1 %49  }
  0x81   :  { %46 = vst.msk [vmem:[#allocation0] sm:$0x1] %vm45_vm7, %v44_v22  }
  0x82   :  { %52 = vst.msk [vmem:[#allocation0] sm:$0x1] %vm51_vm8, %v50_v23  }
  0x84   :  { %v56_v24 = vpop.permute.xlu0 %55   ;;  %v62_v25 = vpop.permute.xlu1 %61  }
  0x85   :  { %58 = vst.msk [vmem:[#allocation0] sm:$0x1] %vm57_vm9, %v56_v24  }
  0x86   :  { %64 = vst.msk [vmem:[#allocation0] sm:$0x1] %vm63_vm10, %v62_v25  }
  0x88   :  { %v68_v26 = vpop.permute.xlu0 %67   ;;  %v74_v27 = vpop.permute.xlu1 %73  }
  0x89   :  { %70 = vst.msk [vmem:[#allocation0] sm:$0x1] %vm69_vm11, %v68_v26  }
  0x8a   :  { %76 = vst.msk [vmem:[#allocation0] sm:$0x1] %vm75_vm12, %v74_v27  }
  0x8c   :  { %v80_v28 = vpop.permute.xlu0 %79   ;;  %v86_v29 = vpop.permute.xlu1 %85  }
  0x8d   :  { %82 = vst.msk [vmem:[#allocation0] sm:$0x1] %vm81_vm13, %v80_v28  }
  0x8e   :  { %88 = vst.msk [vmem:[#allocation0] sm:$0x1] %vm87_vm14, %v86_v29  }
  0x90   :  { %v92_v30 = vpop.permute.xlu0 %91  }
  0x91   :  { %94 = vst.msk [vmem:[#allocation0] sm:$0x1] %vm93_vm15, %v92_v30  }
  0x98   :  { %v99_v31 = vld [vmem:[#allocation0] sm:$0x1] }
  0x99   :  { %102 = vst [vmem:[%s210_s1] sm:$0x1] %v99_v31 }

// kernel: double_conv.3
= control target key start
LH: loop header
LB: loop body
LE: loop exit
PB: predicated region body
PF: predicated region fallthrough
CT: control target
= control target key end

     0   :  { %s1569_s12 = smov 0   ;;  %s1571_s13 = smov 0   ;;  %s2255_s0 = inlined_call_operand.vmem [shape: f32[2,18,18,4], index: 0, kind: input, shape index: {}]   ;;  %s2256_s1 = inlined_call_operand.vmem [shape: f32[36,8], index: 1, kind: input, shape index: {}]   ;;  %s2257_s2 = inlined_call_operand.vmem [shape: f32[2,16,16,8], index: 2, kind: output, shape index: {0}]   ;;  %s2258_s3 = inlined_call_operand.vmem [shape: f32[2,2,2,8], index: 3, kind: output, shape index: {1}]  }
   0x1   :  { %s1573_s14 = smov 0   ;;  %s1575_s15 = smov 0  }
   0x2   :  { %s1577_s16 = smov 0  }
   0x3 LB: > { %s23_s17 = sadd.s32 1, %s1531_s14  ;;  %s26_s18 = sadd.s32 1, %s1535_s15  ;;  %s1539_s16 = sphi %s1577_s16, %s14_s16   ;;  %s1535_s15 = sphi %s1575_s15, %s2262_s15   ;;  %s1531_s14 = sphi %s1573_s14, %s2261_s14   ;;  %s1527_s13 = sphi %s1571_s13, %s2260_s13   ;;  %s1523_s12 = sphi %s1569_s12, %s2259_s12  }
   0x4   : > { %p24_p0 = scmp.ge.s32.totalorder %s23_s17, 2  ;;  %p1358_p1 = scmp.ge.s32.totalorder %s1539_s16, 1 }
   0x5   : > { %p156_p2 = scmp.lt.s32.totalorder %s1539_s16, 5 }
   0x6   : > { %s2264_s17 = smov (%p24_p0, %s23_s17), 0  ;;  %s2266_s18 = smov (!%p24_p0, %s26_s18), %s1535_s15 }
   0x7   : > { %p157_p3 = pnand %p1358_p1, %p156_p2  ;;  %p28_p4 = scmp.ge.s32.totalorder %s2266_s18, 2 }
   0x8   : > { %p193_p5 = scmp.lt.s32.totalorder (!%p157_p3), %s1527_s13, 1  ;;  %s1367_s19 = smul.u32 (!%p157_p3), 192, %s1523_s12 }
   0x9   : > { %s2268_s18 = smov (%p28_p4, %s2266_s18), 0  ;;  %160 = sbr.rel (%p157_p3) target bundleno = 605 (0x25d), region = 28 }
   0xa   : > { %s1541_s25 = smov (!%p157_p3), 12   ;;  %s1542_s26 = smov (!%p157_p3), 8  }
   0xb   : > { %s1543_s27 = smov (!%p157_p3), 4   ;;  %s1544_s28 = smov (!%p157_p3), 16  }
   0xc   : > { %s1545_s29 = smov (!%p157_p3), 20   ;;  %s1546_s30 = smov (!%p157_p3), 24  }
   0xd   : > { %s1548_s22 = smov (!%p157_p3), 32   ;;  %p211_p7 = scmp.lt.s32.totalorder (!%p157_p3), %s1523_s12, 1 }
   0xe   : > { %s2270_s13 = smov (!%p193_p5, %s1527_s13), 1  ;;  %vm363_vm0 = vcmask 1045504   ;;  %vm274_vm1 = vcmask 1046528   ;;  %v906_v28 = vld [vmem:[%s2256_s1 + $0x20] sm:$0xf]  ;;  %vm956_vm2 = vcmask 1043456  }
   0xf   : > { %s1452_s20 = smul.u32 432, %s2270_s13  ;;  %1408 = vmatprep.subr.msk.mxu0 %vm956_vm2, %v906_v28  ;;  %1442 = vmatprep.subr.msk.mxu1 %vm956_vm2, %v906_v28  ;;  %v905_v31 = vld [vmem:[%s2256_s1 + $0x18] sm:$0xff]  ;;  %v904_v33 = vld [vmem:[%s2256_s1 + $0x10] sm:$0xff]  ;;  %v903_v35 = vld [vmem:[%s2256_s1 + $0x8] sm:$0xff]  ;;  %vm766_vm3 = vcmask 31744   ;;  %vm783_vm4 = vcmask 64512  }
  0x10   : > { %1409 = vmatpush3.msk.msra.mxu0 %vm956_vm2, %v906_v28  ;;  %1447 = vmatpush3.msk.msra.mxu1 %vm956_vm2, %v906_v28  ;;  %v902_v39 = vld [vmem:[%s2256_s1] sm:$0xff]  ;;  %vm800_vm5 = vcmask 97280   ;;  %vm817_vm6 = vcmask 130048   ;;  %vm834_vm7 = vcmask 162816   ;;  %vm851_vm8 = vcmask 195584   ;;  %s1364_s4 = sshll.u32 %s2270_s13, 1 }
  0x11   : > { %s197_s23 = scalar_lea.vmem %s2255_s0, %s1452_s20  ;;  %1410 = vmatprep.subr.mxu0 %v905_v31  ;;  %1443 = vmatprep.subr.mxu1 %v905_v31  ;;  %vm868_vm9 = vcmask 228352   ;;  %vm885_vm10 = vcmask 261120   ;;  %vm907_vm11 = vcmask 293888   ;;  %vm1195_vm12 = vcmask 1040384  }
  0x12   : > { %s1608_s24 = scalar_lea.vmem %s197_s23, %s1367_s19  ;;  %1411 = vmatpush3.msra.mxu0 %v905_v31  ;;  %1448 = vmatpush3.msra.mxu1 %v905_v31  ;;  %s1547_s19 = smov 28   ;;  %vm1197_vm13 = vcmask 58368  }
  0x13   : > { %v1611_v0 = vld [vmem:[%s1608_s24 + $0x20] sm:$0xff]  ;;  %v1614_v1 = vld [vmem:[%s1608_s24 + $0x18] sm:$0xff]  ;;  %v1624_v3 = vld [vmem:[%s1608_s24 + $0x8] sm:$0xff]  ;;  %1412 = vmatprep.subr.mxu0 %v904_v33  ;;  %1444 = vmatprep.subr.mxu1 %v904_v33  ;;  %s1360_s23 = sshll.u32 %s1523_s12, 3  ;;  %s2274_s12 = smov (!%p211_p7, %s1523_s12), 1 }
  0x14   : > { %v1617_v2 = vld [vmem:[%s1608_s24] sm:$0xff]  ;;  %456 = vrot.lane.b32.xlu1 %v1611_v0, %s1541_s25  ;;  %454 = vrot.lane.b32.xlu0 %v1614_v1, %s1541_s25  ;;  %v222_v6 = vld [vmem:[%s1608_s24 + $0x10] sm:$0x3]  ;;  %v365_v7 = vrot.slane %v1624_v3, 2  ;;  %v276_v8 = vrot.slane %v1624_v3, 1  ;;  %v280_v15 = vrot.slane %v1614_v1, 1  ;;  %s214_s5 = sadd.s32 %s1364_s4, %s2274_s12 }
  0x15   : > { %v364_v4 = vrot.slane %v1617_v2, 2  ;;  %v275_v5 = vrot.slane %v1617_v2, 1  ;;  %v367_v9 = vrot.slane %v222_v6, 2  ;;  %v278_v10 = vrot.slane %v222_v6, 1  ;;  %v225_v17 = vld [vmem:[%s1608_s24 + $0x28] sm:$0x3]  ;;  %1413 = vmatpush3.msra.mxu0 %v904_v33  ;;  %1449 = vmatpush3.msra.mxu1 %v904_v33 }
  0x16   : > { %v281_v16 = vrot.slane %v1611_v0, 1  ;;  %v369_v19 = vrot.slane %v1614_v1, 2  ;;  %v370_v20 = vrot.slane %v1611_v0, 2  ;;  %v283_v21 = vrot.slane %v225_v17, 1  ;;  %v1654_v25 = vld [vmem:[%s1608_s24 + $0x30] sm:$0xff]  ;;  %v1658_v27 = vld [vmem:[%s1608_s24 + $0x38] sm:$0xff]  ;;  %1414 = vmatprep.subr.mxu0 %v903_v35  ;;  %1445 = vmatprep.subr.mxu1 %v903_v35 }
  0x17   : > { %v366_v11 = vsel %vm363_vm0, %v364_v4, %v365_v7  ;;  %v277_v12 = vsel %vm274_vm1, %v275_v5, %v276_v8  ;;  %v368_v13 = vsel %vm363_vm0, %v365_v7, %v367_v9  ;;  %v279_v14 = vsel %vm274_vm1, %v276_v8, %v278_v10  ;;  %v228_v34 = vld [vmem:[%s1608_s24 + $0x40] sm:$0x3]  ;;  %1415 = vmatpush3.msra.mxu0 %v903_v35  ;;  %v1705_v44 = vld [vmem:[%s1608_s24 + $0x48] sm:$0xff]  ;;  %v1708_v45 = vld [vmem:[%s1608_s24 + $0x50] sm:$0xff]  ;;  %p201_p6 = scmp.lt.s32.totalorder %s1360_s23, 15  ;;  %s1365_s6 = sshll.u32 %s214_s5, 1 }
  0x18   : > { %404 = vrot.lane.b32.xlu1 %v366_v11, %s1542_s26  ;;  %315 = vrot.lane.b32.xlu0 %v277_v12, %s1543_s27  ;;  %v282_v18 = vsel %vm274_vm1, %v280_v15, %v281_v16  ;;  %v371_v22 = vsel %vm363_vm0, %v369_v19, %v370_v20  ;;  %v284_v23 = vsel %vm274_vm1, %v281_v16, %v283_v21  ;;  %v372_v24 = vrot.slane %v225_v17, 2  ;;  %v231_v49 = vld [vmem:[%s1608_s24 + $0x58] sm:$0x3]  ;;  %v1740_v57 = vld [vmem:[%s1608_s24 + $0x60] sm:$0xff]  ;;  %s216_s9 = scalar_lea.vmem %s2258_s3, %s1365_s6 }
  0x19   : > { %v285_v29 = vrot.slane %v1654_v25, 1  ;;  %v286_v30 = vrot.slane %v1658_v27, 1  ;;  %v374_v36 = vrot.slane %v1654_v25, 2  ;;  %v375_v37 = vrot.slane %v1658_v27, 2  ;;  %1450 = vmatpush3.msra.mxu1 %v903_v35  ;;  %1416 = vmatprep.subr.mxu0 %v902_v39  ;;  %v1743_v58 = vld [vmem:[%s1608_s24 + $0x68] sm:$0xff]  ;;  %v1777_v12 = vld [vmem:[%s1608_s24 + $0x78] sm:$0xff] }
  0x1a   : > { %v373_v26 = vsel %vm363_vm0, %v370_v20, %v372_v24  ;;  %v288_v38 = vrot.slane %v228_v34, 1  ;;  %1446 = vmatprep.subr.mxu1 %v902_v39  ;;  %1417 = vmatpush3.msra.mxu0 %v902_v39  ;;  %v377_v42 = vrot.slane %v228_v34, 2  ;;  %v290_v46 = vrot.slane %v1705_v44, 1  ;;  %v234_v62 = vld [vmem:[%s1608_s24 + $0x70] sm:$0x3]  ;;  %v1780_v15 = vld [vmem:[%s1608_s24 + $0x80] sm:$0xff] }
  0x1b   : > { %v287_v32 = vsel %vm274_vm1, %v285_v29, %v286_v30  ;;  %v376_v40 = vsel %vm363_vm0, %v374_v36, %v375_v37  ;;  %1451 = vmatpush3.msra.mxu1 %v902_v39  ;;  %v291_v47 = vrot.slane %v1708_v45, 1  ;;  %v379_v50 = vrot.slane %v1705_v44, 2  ;;  %s2272_s23 = smov (!%p201_p6, %s1360_s23), 15 }
  0x1c   : > { %406 = vrot.lane.b32.xlu1 %v368_v13, %s1542_s26  ;;  %317 = vrot.lane.b32.xlu0 %v279_v14, %s1543_s27  ;;  %v289_v41 = vsel %vm274_vm1, %v286_v30, %v288_v38  ;;  %v378_v43 = vsel %vm363_vm0, %v375_v37, %v377_v42  ;;  %v380_v51 = vrot.slane %v1708_v45, 2  ;;  %v293_v52 = vrot.slane %v231_v49, 1 }
  0x1d   : > { %v292_v48 = vsel %vm274_vm1, %v290_v46, %v291_v47  ;;  %v382_v55 = vrot.slane %v231_v49, 2  ;;  %v295_v59 = vrot.slane %v1740_v57, 1  ;;  %v296_v60 = vrot.slane %v1743_v58, 1 }
  0x1e   : > { %v381_v53 = vsel %vm363_vm0, %v379_v50, %v380_v51  ;;  %v294_v54 = vsel %vm274_vm1, %v291_v47, %v293_v52  ;;  %v384_v63 = vrot.slane %v1740_v57, 2  ;;  %v385_v4 = vrot.slane %v1743_v58, 2  ;;  %v1827_v47 = vld [vmem:[%s1608_s24 + $0x90] sm:$0xff]  ;;  %v1835_v50 = vld [vmem:[%s1608_s24 + $0x98] sm:$0xff] }
  0x1f   : > { %v383_v56 = vsel %vm363_vm0, %v380_v51, %v382_v55  ;;  %v297_v61 = vsel %vm274_vm1, %v295_v59, %v296_v60  ;;  %v298_v5 = vrot.slane %v234_v62, 1  ;;  %v387_v8 = vrot.slane %v234_v62, 2 }
  0x20   : > { %319 = vrot.lane.b32.xlu1 %v282_v18, %s1543_s27  ;;  %508 = vrot.lane.b32.xlu0 %v282_v18, %s1544_s28  ;;  %v386_v6 = vsel %vm363_vm0, %v384_v63, %v385_v4  ;;  %v300_v16 = vrot.slane %v1777_v12, 1  ;;  %v301_v17 = vrot.slane %v1780_v15, 1  ;;  %v389_v24 = vrot.slane %v1777_v12, 2 }
  0x21   : > { %v299_v7 = vsel %vm274_vm1, %v296_v60, %v298_v5  ;;  %v388_v9 = vsel %vm363_vm0, %v385_v4, %v387_v8  ;;  %v305_v55 = vrot.slane %v1827_v47, 1 }
  0x22   : > { %v302_v20 = vsel %vm274_vm1, %v300_v16, %v301_v17 }
  0x24   : > { %561 = vrot.lane.b32.xlu1 %v371_v22, %s1545_s29  ;;  %510 = vrot.lane.b32.xlu0 %v284_v23, %s1544_s28 }
  0x28   : > { %408 = vrot.lane.b32.xlu1 %v371_v22, %s1542_s26  ;;  %321 = vrot.lane.b32.xlu0 %v284_v23, %s1543_s27  ;;  %v237_v23 = vld [vmem:[%s1608_s24 + $0x88] sm:$0x3] }
  0x29   : > { %v303_v28 = vrot.slane %v237_v23, 1  ;;  %v392_v35 = vrot.slane %v237_v23, 2 }
  0x2c   : > { %611 = vrot.lane.b32.xlu1 %v1654_v25, %s1546_s30  ;;  %563 = vrot.lane.b32.xlu0 %v373_v26, %s1545_s29 }
  0x30   : > { %458 = vrot.lane.b32.xlu1 %v1654_v25, %s1541_s25  ;;  %410 = vrot.lane.b32.xlu0 %v373_v26, %s1542_s26  ;;  %v390_v26 = vrot.slane %v1780_v15, 2 }
  0x32   : > { %v391_v31 = vsel %vm363_vm0, %v389_v24, %v390_v26  ;;  %v393_v38 = vsel %vm363_vm0, %v390_v26, %v392_v35 }
  0x34   : > { %665 = vrot.lane.b32.xlu1 %v287_v32, %s1547_s19  ;;  %613 = vrot.lane.b32.xlu0 %v1658_v27, %s1546_s30 }
  0x38   : > { %512 = vrot.lane.b32.xlu1 %v287_v32, %s1544_s28  ;;  %460 = vrot.lane.b32.xlu0 %v1658_v27, %s1541_s25 }
  0x3c   : > { %718 = vrot.lane.b32.xlu1 %v376_v40, %s1548_s22  ;;  %667 = vrot.lane.b32.xlu0 %v289_v41, %s1547_s19 }
  0x40   : > { %514 = vrot.lane.b32.xlu1 %v289_v41, %s1544_s28  ;;  %323 = vrot.lane.b32.xlu0 %v287_v32, %s1543_s27  ;;  %v304_v32 = vsel %vm274_vm1, %v301_v17, %v303_v28 }
  0x44   : > { %720 = vrot.lane.b32.xlu1 %v378_v43, %s1548_s22  ;;  %565 = vrot.lane.b32.xlu0 %v376_v40, %s1545_s29 }
  0x48   : > { %412 = vrot.lane.b32.xlu1 %v376_v40, %s1542_s26  ;;  %325 = vrot.lane.b32.xlu0 %v289_v41, %s1543_s27 }
  0x4c   : > { %615 = vrot.lane.b32.xlu1 %v1705_v44, %s1546_s30  ;;  %567 = vrot.lane.b32.xlu0 %v378_v43, %s1545_s29 }
  0x50   : > { %462 = vrot.lane.b32.xlu1 %v1705_v44, %s1541_s25  ;;  %414 = vrot.lane.b32.xlu0 %v378_v43, %s1542_s26 }
  0x54   : > { %669 = vrot.lane.b32.xlu1 %v292_v48, %s1547_s19  ;;  %617 = vrot.lane.b32.xlu0 %v1708_v45, %s1546_s30 }
  0x58   : > { %516 = vrot.lane.b32.xlu1 %v292_v48, %s1544_s28  ;;  %464 = vrot.lane.b32.xlu0 %v1708_v45, %s1541_s25 }
  0x5c   : > { %722 = vrot.lane.b32.xlu1 %v381_v53, %s1548_s22  ;;  %671 = vrot.lane.b32.xlu0 %v294_v54, %s1547_s19 }
  0x60   : > { %518 = vrot.lane.b32.xlu1 %v294_v54, %s1544_s28  ;;  %327 = vrot.lane.b32.xlu0 %v292_v48, %s1543_s27 }
  0x64   : > { %724 = vrot.lane.b32.xlu1 %v383_v56, %s1548_s22  ;;  %569 = vrot.lane.b32.xlu0 %v381_v53, %s1545_s29 }
  0x68   : > { %416 = vrot.lane.b32.xlu1 %v381_v53, %s1542_s26  ;;  %329 = vrot.lane.b32.xlu0 %v294_v54, %s1543_s27 }
  0x6c   : > { %619 = vrot.lane.b32.xlu1 %v1740_v57, %s1546_s30  ;;  %571 = vrot.lane.b32.xlu0 %v383_v56, %s1545_s29 }
  0x70   : > { %466 = vrot.lane.b32.xlu1 %v1740_v57, %s1541_s25  ;;  %418 = vrot.lane.b32.xlu0 %v383_v56, %s1542_s26  ;;  %v306_v56 = vrot.slane %v1835_v50, 1 }
  0x72   : > { %v307_v63 = vsel %vm274_vm1, %v305_v55, %v306_v56 }
  0x74   : > { %673 = vrot.lane.b32.xlu1 %v297_v61, %s1547_s19  ;;  %621 = vrot.lane.b32.xlu0 %v1743_v58, %s1546_s30 }
  0x78   : > { %520 = vrot.lane.b32.xlu1 %v297_v61, %s1544_s28  ;;  %468 = vrot.lane.b32.xlu0 %v1743_v58, %s1541_s25 }
  0x7c   : > { %726 = vrot.lane.b32.xlu1 %v386_v6, %s1548_s22  ;;  %675 = vrot.lane.b32.xlu0 %v299_v7, %s1547_s19 }
  0x80   : > { %522 = vrot.lane.b32.xlu1 %v299_v7, %s1544_s28  ;;  %331 = vrot.lane.b32.xlu0 %v297_v61, %s1543_s27 }
  0x84   : > { %728 = vrot.lane.b32.xlu1 %v388_v9, %s1548_s22  ;;  %573 = vrot.lane.b32.xlu0 %v386_v6, %s1545_s29 }
  0x86   : > { %v1772_v10 = vpop.permute.xlu1 %456  ;;  %v455_v11 = vpop.permute.xlu0 %454 }
  0x88   : > { %420 = vrot.lane.b32.xlu1 %v386_v6, %s1542_s26  ;;  %333 = vrot.lane.b32.xlu0 %v299_v7, %s1543_s27  ;;  %v240_v7 = vld [vmem:[%s1608_s24 + $0xa0] sm:$0x3] }
  0x89   : > { %v397_v26 = vrot.slane %v240_v7, 2 }
  0x8a   : > { %v405_v13 = vpop.permute.xlu1 %404  ;;  %v316_v14 = vpop.permute.xlu0 %315 }
  0x8b   : > { %v767_v41 = vsel %vm766_vm3, %v1617_v2, %v316_v14  ;;  %v308_v14 = vrot.slane %v240_v7, 1 }
  0x8c   : > { %623 = vrot.lane.b32.xlu1 %v1777_v12, %s1546_s30  ;;  %575 = vrot.lane.b32.xlu0 %v388_v9, %s1545_s29  ;;  %v784_v46 = vsel %vm783_vm4, %v767_v41, %v405_v13  ;;  %v394_v13 = vrot.slane %v1827_v47, 2  ;;  %v1902_v41 = vld [vmem:[%s1608_s24 + $0xa8] sm:$0xff] }
  0x8d   : > { %v801_v2 = vsel %vm800_vm5, %v784_v46, %v455_v11 }
  0x8e   : > { %v1787_v18 = vpop.permute.xlu1 %406  ;;  %v318_v19 = vpop.permute.xlu0 %317 }
  0x8f   : > { %v768_v52 = vsel %vm766_vm3, %v1624_v3, %v318_v19 }
  0x90   : > { %470 = vrot.lane.b32.xlu1 %v1777_v12, %s1541_s25  ;;  %422 = vrot.lane.b32.xlu0 %v388_v9, %s1542_s26  ;;  %v785_v3 = vsel %vm783_vm4, %v768_v52, %v1787_v18 }
  0x91   : > { %v802_v4 = vsel %vm800_vm5, %v785_v3, %v1772_v10  ;;  %v395_v10 = vrot.slane %v1835_v50, 2 }
  0x92   : > { %v1793_v21 = vpop.permute.xlu1 %319  ;;  %v509_v22 = vpop.permute.xlu0 %508 }
  0x93   : > { %v818_v51 = vsel %vm817_vm6, %v801_v2, %v509_v22  ;;  %v309_v22 = vsel %vm274_vm1, %v306_v56, %v308_v14  ;;  %v1911_v2 = vld [vmem:[%s1608_s24 + $0xb0] sm:$0xff] }
  0x94   : > { %677 = vrot.lane.b32.xlu1 %v302_v20, %s1547_s19  ;;  %625 = vrot.lane.b32.xlu0 %v1780_v15, %s1546_s30 }
  0x96   : > { %v562_v29 = vpop.permute.xlu1 %561  ;;  %v511_v30 = vpop.permute.xlu0 %510 }
  0x97   : > { %v835_v53 = vsel %vm834_vm7, %v818_v51, %v562_v29  ;;  %v819_v8 = vsel %vm817_vm6, %v802_v4, %v511_v30  ;;  %v398_v30 = vsel %vm363_vm0, %v395_v10, %v397_v26  ;;  %v311_v51 = vrot.slane %v1911_v2, 1 }
  0x98   : > { %524 = vrot.lane.b32.xlu1 %v302_v20, %s1544_s28  ;;  %472 = vrot.lane.b32.xlu0 %v1780_v15, %s1541_s25 }
  0x9a   : > { %v1806_v33 = vpop.permute.xlu1 %408  ;;  %v1808_v34 = vpop.permute.xlu0 %321 }
  0x9b   : > { %v770_v55 = vsel %vm766_vm3, %v1611_v0, %v1808_v34  ;;  %v243_v0 = vld [vmem:[%s1608_s24 + $0xb8] sm:$0x3] }
  0x9c   : > { %730 = vrot.lane.b32.xlu1 %v391_v31, %s1548_s22  ;;  %679 = vrot.lane.b32.xlu0 %v304_v32, %s1547_s19  ;;  %v313_v4 = vrot.slane %v243_v0, 1 }
  0x9e   : > { %v612_v36 = vpop.permute.xlu1 %611  ;;  %v564_v37 = vpop.permute.xlu0 %563 }
  0x9f   : > { %v852_v54 = vsel %vm851_vm8, %v835_v53, %v612_v36  ;;  %v836_v9 = vsel %vm834_vm7, %v819_v8, %v564_v37  ;;  %v769_v37 = vsel %vm766_vm3, %v1614_v1, %v1793_v21 }
  0xa0   : > { %526 = vrot.lane.b32.xlu1 %v304_v32, %s1544_s28  ;;  %335 = vrot.lane.b32.xlu0 %v302_v20, %s1543_s27  ;;  %v396_v20 = vsel %vm363_vm0, %v394_v13, %v395_v10  ;;  %v314_v13 = vsel %vm274_vm1, %v311_v51, %v313_v4 }
  0xa2   : > { %v1815_v39 = vpop.permute.xlu1 %458  ;;  %v1817_v40 = vpop.permute.xlu0 %410 }
  0xa3   : > { %v787_v56 = vsel %vm783_vm4, %v770_v55, %v1817_v40 }
  0xa4   : > { %732 = vrot.lane.b32.xlu1 %v393_v38, %s1548_s22  ;;  %577 = vrot.lane.b32.xlu0 %v391_v31, %s1545_s29 }
  0xa6   : > { %v666_v42 = vpop.permute.xlu1 %665  ;;  %v614_v43 = vpop.permute.xlu0 %613 }
  0xa7   : > { %v869_v59 = vsel %vm868_vm9, %v852_v54, %v666_v42  ;;  %v853_v11 = vsel %vm851_vm8, %v836_v9, %v614_v43 }
  0xa8   : > { %424 = vrot.lane.b32.xlu1 %v391_v31, %s1542_s26  ;;  %337 = vrot.lane.b32.xlu0 %v304_v32, %s1543_s27 }
  0xaa   : > { %v1830_v48 = vpop.permute.xlu1 %512  ;;  %v1832_v49 = vpop.permute.xlu0 %460 }
  0xac   : > { %627 = vrot.lane.b32.xlu1 %v1827_v47, %s1546_s30  ;;  %579 = vrot.lane.b32.xlu0 %v393_v38, %s1545_s29 }
  0xae   : > { %v719_v60 = vpop.permute.xlu1 %718  ;;  %v668_v61 = vpop.permute.xlu0 %667 }
  0xaf   : > { %v886_v62 = vsel %vm885_vm10, %v869_v59, %v719_v60  ;;  %v870_v16 = vsel %vm868_vm9, %v853_v11, %v668_v61  ;;  %v804_v60 = vsel %vm800_vm5, %v787_v56, %v1832_v49  ;;  %v400_v49 = vrot.slane %v1911_v2, 2  ;;  %v246_v56 = vld [vmem:[%s1608_s24 + $0xd0] sm:$0x3] }
  0xb0   : > { %474 = vrot.lane.b32.xlu1 %v1827_v47, %s1541_s25  ;;  %426 = vrot.lane.b32.xlu0 %v393_v38, %s1542_s26  ;;  %v786_v38 = vsel %vm783_vm4, %v769_v37, %v1806_v33 }
  0xb1   : > { %1418 = vmatprep.mubr.msk.f32.mxu0 %vm907_vm11, %v886_v62  ;;  %v803_v42 = vsel %vm800_vm5, %v786_v38, %v1815_v39  ;;  %v310_v39 = vrot.slane %v1902_v41, 1 }
  0xb2   : > { %v1858_v5 = vpop.permute.xlu1 %514  ;;  %v1860_v6 = vpop.permute.xlu0 %323  ;;  %v820_v1 = vsel %vm817_vm6, %v803_v42, %v1830_v48  ;;  %v245_v42 = vld [vmem:[%s1608_s24 + $0xc8] sm:$0xff] }
  0xb3   : > { %v312_v59 = vsel %vm274_vm1, %v310_v39, %v311_v51  ;;  %v821_v34 = vsel %vm817_vm6, %v804_v60, %v1858_v5  ;;  %v557_v60 = vrot.slane %v245_v42, 2 }
  0xb4   : > { %681 = vrot.lane.b32.xlu1 %v307_v63, %s1547_s19  ;;  %629 = vrot.lane.b32.xlu0 %v1835_v50, %s1546_s30 }
  0xb6   : > { %v721_v17 = vpop.permute.xlu1 %720  ;;  %v566_v18 = vpop.permute.xlu0 %565 }
  0xb7   : > { %v887_v19 = vsel %vm885_vm10, %v870_v16, %v721_v17  ;;  %v837_v21 = vsel %vm834_vm7, %v820_v1, %v566_v18  ;;  %v402_v16 = vrot.slane %v243_v0, 2  ;;  %v506_v0 = vrot.slane %v246_v56, 1 }
  0xb8   : > { %528 = vrot.lane.b32.xlu1 %v307_v63, %s1544_s28  ;;  %476 = vrot.lane.b32.xlu0 %v1835_v50, %s1541_s25 }
  0xb9   : > { %1419 = vmatmul.mubr.msk.f32.vlgmr.msra.gmra.mxu0 %vm907_vm11, %v887_v19  ;;  %v403_v19 = vsel %vm363_vm0, %v400_v49, %v402_v16  ;;  %v248_v16 = vld [vmem:[%s1608_s24 + $0xe0] sm:$0xff] }
  0xba   : > { %v1879_v23 = vpop.permute.xlu1 %412  ;;  %v1881_v24 = vpop.permute.xlu0 %325 }
  0xbc   : > { %734 = vrot.lane.b32.xlu1 %v396_v20, %s1548_s22  ;;  %683 = vrot.lane.b32.xlu0 %v309_v22, %s1547_s19 }
  0xbe   : > { %v616_v28 = vpop.permute.xlu1 %615  ;;  %v568_v29 = vpop.permute.xlu0 %567 }
  0xbf   : > { %v854_v33 = vsel %vm851_vm8, %v837_v21, %v616_v28  ;;  %v838_v62 = vsel %vm834_vm7, %v821_v34, %v568_v29  ;;  %v771_v29 = vsel %vm766_vm3, %v1654_v25, %v1860_v6  ;;  %v504_v21 = vrot.slane %v245_v42, 1 }
  0xc0   : > { %530 = vrot.lane.b32.xlu1 %v309_v22, %s1544_s28  ;;  %339 = vrot.lane.b32.xlu0 %v307_v63, %s1543_s27  ;;  %v399_v63 = vrot.slane %v1902_v41, 2 }
  0xc2   : > { %v1888_v31 = vpop.permute.xlu1 %462  ;;  %v1890_v32 = vpop.permute.xlu0 %414  ;;  %v401_v11 = vsel %vm363_vm0, %v399_v63, %v400_v49  ;;  %v507_v63 = vsel %vm274_vm1, %v504_v21, %v506_v0 }
  0xc4   : > { %736 = vrot.lane.b32.xlu1 %v398_v30, %s1548_s22  ;;  %581 = vrot.lane.b32.xlu0 %v396_v20, %s1545_s29 }
  0xc6   : > { %v670_v35 = vpop.permute.xlu1 %669  ;;  %v618_v36 = vpop.permute.xlu0 %617 }
  0xc7   : > { %v871_v52 = vsel %vm868_vm9, %v854_v33, %v670_v35  ;;  %v855_v40 = vsel %vm851_vm8, %v838_v62, %v618_v36  ;;  %v244_v35 = vld [vmem:[%s1608_s24 + $0xc0] sm:$0xff] }
  0xc8   : > { %428 = vrot.lane.b32.xlu1 %v396_v20, %s1542_s26  ;;  %341 = vrot.lane.b32.xlu0 %v309_v22, %s1543_s27 }
  0xca   : > { %v1906_v43 = vpop.permute.xlu1 %516  ;;  %v1908_v46 = vpop.permute.xlu0 %464 }
  0xcc   : > { %631 = vrot.lane.b32.xlu1 %v1902_v41, %s1546_s30  ;;  %583 = vrot.lane.b32.xlu0 %v398_v30, %s1545_s29 }
  0xce   : > { %v723_v53 = vpop.permute.xlu1 %722  ;;  %v672_v54 = vpop.permute.xlu0 %671 }
  0xcf   : > { %v888_v48 = vsel %vm885_vm10, %v871_v52, %v723_v53  ;;  %v872_v7 = vsel %vm868_vm9, %v855_v40, %v672_v54 }
  0xd0   : > { %478 = vrot.lane.b32.xlu1 %v1902_v41, %s1541_s25  ;;  %430 = vrot.lane.b32.xlu0 %v398_v30, %s1542_s26  ;;  %v788_v30 = vsel %vm783_vm4, %v771_v29, %v1879_v23  ;;  %v503_v23 = vrot.slane %v244_v35, 1 }
  0xd1   : > { %1421 = vmatprep.mubr.msk.f32.mxu0 %vm907_vm11, %v888_v48  ;;  %v805_v36 = vsel %vm800_vm5, %v788_v30, %v1888_v31 }
  0xd2   : > { %v1936_v61 = vpop.permute.xlu1 %518  ;;  %v1938_v3 = vpop.permute.xlu0 %327  ;;  %v822_v1 = vsel %vm817_vm6, %v805_v36, %v1906_v43  ;;  %v772_v43 = vsel %vm766_vm3, %v1658_v27, %v1881_v24  ;;  %v505_v53 = vsel %vm274_vm1, %v503_v23, %v504_v21  ;;  %v714_v36 = vrot.slane %v248_v16, 2 }
  0xd3   : > { %v789_v52 = vsel %vm783_vm4, %v772_v43, %v1890_v32 }
  0xd4   : > { %685 = vrot.lane.b32.xlu1 %v312_v59, %s1547_s19  ;;  %633 = vrot.lane.b32.xlu0 %v1911_v2, %s1546_s30  ;;  %v806_v54 = vsel %vm800_vm5, %v789_v52, %v1908_v46 }
  0xd5   : > { %v823_v27 = vsel %vm817_vm6, %v806_v54, %v1936_v61 }
  0xd6   : > { %v725_v8 = vpop.permute.xlu1 %724  ;;  %v570_v9 = vpop.permute.xlu0 %569 }
  0xd7   : > { %v889_v5 = vsel %vm885_vm10, %v872_v7, %v725_v8  ;;  %v839_v25 = vsel %vm834_vm7, %v822_v1, %v570_v9  ;;  %v559_v7 = vrot.slane %v246_v56, 2 }
  0xd8   : > { %532 = vrot.lane.b32.xlu1 %v312_v59, %s1544_s28  ;;  %480 = vrot.lane.b32.xlu0 %v1911_v2, %s1541_s25 }
  0xd9   : > { %1422 = vmatmul.mubr.msk.f32.gmra.mxu0 %vm907_vm11, %v889_v5  ;;  %v560_v5 = vsel %vm363_vm0, %v557_v60, %v559_v7 }
  0xda   : > { %v1958_v10 = vpop.permute.xlu1 %416  ;;  %v1960_v14 = vpop.permute.xlu0 %329 }
  0xdc   : > { %738 = vrot.lane.b32.xlu1 %v401_v11, %s1548_s22  ;;  %687 = vrot.lane.b32.xlu0 %v314_v13, %s1547_s19 }
  0xde   : > { %v620_v17 = vpop.permute.xlu1 %619  ;;  %v572_v18 = vpop.permute.xlu0 %571 }
  0xdf   : > { %v856_v6 = vsel %vm851_vm8, %v839_v25, %v620_v17  ;;  %v840_v24 = vsel %vm834_vm7, %v823_v27, %v572_v18  ;;  %v247_v17 = vld [vmem:[%s1608_s24 + $0xd8] sm:$0xff]  ;;  %v249_v18 = vld [vmem:[%s1608_s24 + $0xe8] sm:$0x3]  ;;  %s1361_s24 = sshll.u32 %s2272_s23, 1 }
  0xe0   : > { %534 = vrot.lane.b32.xlu1 %v314_v13, %s1544_s28  ;;  %343 = vrot.lane.b32.xlu0 %v312_v59, %s1543_s27  ;;  %v556_v59 = vrot.slane %v244_v35, 2  ;;  %v716_v23 = vrot.slane %v249_v18, 2 }
  0xe2   : > { %v1967_v20 = vpop.permute.xlu1 %466  ;;  %v1969_v22 = vpop.permute.xlu0 %418  ;;  %v558_v61 = vsel %vm363_vm0, %v556_v59, %v557_v60 }
  0xe4   : > { %740 = vrot.lane.b32.xlu1 %v403_v19, %s1548_s22  ;;  %585 = vrot.lane.b32.xlu0 %v401_v11, %s1545_s29 }
  0xe6   : > { %v674_v26 = vpop.permute.xlu1 %673  ;;  %v622_v28 = vpop.permute.xlu0 %621 }
  0xe7   : > { %v873_v31 = vsel %vm868_vm9, %v856_v6, %v674_v26  ;;  %v857_v32 = vsel %vm851_vm8, %v840_v24, %v622_v28  ;;  %v660_v26 = vrot.slane %v247_v17, 1  ;;  %v663_v28 = vrot.slane %v249_v18, 1 }
  0xe8   : > { %432 = vrot.lane.b32.xlu1 %v401_v11, %s1542_s26  ;;  %345 = vrot.lane.b32.xlu0 %v314_v13, %s1543_s27 }
  0xea   : > { %v1983_v37 = vpop.permute.xlu1 %520  ;;  %v1985_v38 = vpop.permute.xlu0 %468 }
  0xec   : > { %635 = vrot.lane.b32.xlu1 %v244_v35, %s1546_s30  ;;  %587 = vrot.lane.b32.xlu0 %v403_v19, %s1545_s29 }
  0xee   : > { %v727_v33 = vpop.permute.xlu1 %726  ;;  %v676_v39 = vpop.permute.xlu0 %675 }
  0xef   : > { %v890_v51 = vsel %vm885_vm10, %v873_v31, %v727_v33  ;;  %v874_v46 = vsel %vm868_vm9, %v857_v32, %v676_v39  ;;  %v717_v39 = vsel %vm363_vm0, %v714_v36, %v716_v23 }
  0xf0   : > { %482 = vrot.lane.b32.xlu1 %v244_v35, %s1541_s25  ;;  %434 = vrot.lane.b32.xlu0 %v403_v19, %s1542_s26  ;;  %v661_v19 = vrot.slane %v248_v16, 1  ;;  %v773_v35 = vsel %vm766_vm3, %v1705_v44, %v1938_v3 }
  0xf1   : > { %1424 = vmatprep.mubr.msk.f32.mxu0 %vm907_vm11, %v890_v51  ;;  %v790_v1 = vsel %vm783_vm4, %v773_v35, %v1958_v10 }
  0xf2   : > { %v2007_v48 = vpop.permute.xlu1 %522  ;;  %v2009_v55 = vpop.permute.xlu0 %331  ;;  %v664_v25 = vsel %vm274_vm1, %v661_v19, %v663_v28  ;;  %v662_v6 = vsel %vm274_vm1, %v660_v26, %v661_v19  ;;  %v807_v21 = vsel %vm800_vm5, %v790_v1, %v1967_v20 }
  0xf3   : > { %v824_v44 = vsel %vm817_vm6, %v807_v21, %v1983_v37  ;;  %v774_v37 = vsel %vm766_vm3, %v1708_v45, %v1960_v14  ;;  %v775_v7 = vsel %vm766_vm3, %v1740_v57, %v2009_v55 }
  0xf4   : > { %689 = vrot.lane.b32.xlu1 %v505_v53, %s1547_s19  ;;  %637 = vrot.lane.b32.xlu0 %v245_v42, %s1546_s30  ;;  %v791_v54 = vsel %vm783_vm4, %v774_v37, %v1969_v22 }
  0xf5   : > { %v808_v56 = vsel %vm800_vm5, %v791_v54, %v1985_v38 }
  0xf6   : > { %v729_v34 = vpop.permute.xlu1 %728  ;;  %v574_v62 = vpop.permute.xlu0 %573  ;;  %v825_v32 = vsel %vm817_vm6, %v808_v56, %v2007_v48 }
  0xf7   : > { %v891_v40 = vsel %vm885_vm10, %v874_v46, %v729_v34  ;;  %v841_v3 = vsel %vm834_vm7, %v824_v44, %v574_v62 }
  0xf8   : > { %536 = vrot.lane.b32.xlu1 %v505_v53, %s1544_s28  ;;  %484 = vrot.lane.b32.xlu0 %v245_v42, %s1541_s25  ;;  %v713_v42 = vrot.slane %v247_v17, 2  ;;  %s1362_s25 = sshll.u32 %s2270_s13, 5 }
  0xf9   : > { %1425 = vmatmul.mubr.msk.f32.gmra.mxu0 %vm907_vm11, %v891_v40  ;;  %s205_s26 = sadd.s32 %s1362_s25, %s1361_s24 }
  0xfa   : > { %v2025_v49 = vpop.permute.xlu1 %420  ;;  %v2027_v4 = vpop.permute.xlu0 %333  ;;  %v715_v51 = vsel %vm363_vm0, %v713_v42, %v714_v36  ;;  %s1363_s27 = sshll.u32 %s205_s26, 3 }
  0xfb   : > { %v776_v57 = vsel %vm766_vm3, %v1743_v58, %v2027_v4 }
  0xfc   : > { %742 = vrot.lane.b32.xlu1 %v558_v61, %s1548_s22  ;;  %691 = vrot.lane.b32.xlu0 %v507_v63, %s1547_s19 }
  0xfe   : > { %v624_v8 = vpop.permute.xlu1 %623  ;;  %v576_v9 = vpop.permute.xlu0 %575 }
  0xff   : > { %v858_v10 = vsel %vm851_vm8, %v841_v3, %v624_v8  ;;  %v842_v59 = vsel %vm834_vm7, %v825_v32, %v576_v9  ;;  %v792_v8 = vsel %vm783_vm4, %v775_v7, %v2025_v49 }
 0x100   : > { %589 = vrot.lane.b32.xlu1 %v558_v61, %s1545_s29  ;;  %538 = vrot.lane.b32.xlu0 %v507_v63, %s1544_s28 }
 0x102   : > { %v471_v11 = vpop.permute.xlu1 %470  ;;  %v2034_v13 = vpop.permute.xlu0 %422 }
 0x103   : > { %v809_v9 = vsel %vm800_vm5, %v792_v8, %v471_v11  ;;  %v793_v55 = vsel %vm783_vm4, %v776_v57, %v2034_v13 }
 0x104   : > { %591 = vrot.lane.b32.xlu1 %v560_v5, %s1545_s29  ;;  %744 = vrot.lane.b32.xlu0 %v560_v5, %s1548_s22 }
 0x106   : > { %v678_v29 = vpop.permute.xlu1 %677  ;;  %v626_v30 = vpop.permute.xlu0 %625 }
 0x107   : > { %v875_v43 = vsel %vm868_vm9, %v858_v10, %v678_v29  ;;  %v859_v45 = vsel %vm851_vm8, %v842_v59, %v626_v30 }
 0x108   : > { %641 = vrot.lane.b32.xlu1 %v248_v16, %s1546_s30  ;;  %639 = vrot.lane.b32.xlu0 %v247_v17, %s1546_s30  ;;  %s2147_s30 = scalar_lea.vmem %s2257_s2, %s1363_s27 }
 0x10a   : > { %v525_v31 = vpop.permute.xlu1 %524  ;;  %v473_v33 = vpop.permute.xlu0 %472 }
 0x10b   : > { %v826_v17 = vsel %vm817_vm6, %v809_v9, %v525_v31  ;;  %v810_v49 = vsel %vm800_vm5, %v793_v55, %v473_v33 }
 0x10c   : > { %695 = vrot.lane.b32.xlu1 %v664_v25, %s1547_s19  ;;  %693 = vrot.lane.b32.xlu0 %v662_v6, %s1547_s19 }
 0x10e   : > { %v731_v20 = vpop.permute.xlu1 %730  ;;  %v680_v52 = vpop.permute.xlu0 %679 }
 0x10f   : > { %v892_v53 = vsel %vm885_vm10, %v875_v43, %v731_v20  ;;  %v876_v14 = vsel %vm868_vm9, %v859_v45, %v680_v52 }
 0x110   : > { %748 = vrot.lane.b32.xlu1 %v717_v39, %s1548_s22  ;;  %746 = vrot.lane.b32.xlu0 %v715_v51, %s1548_s22 }
 0x111   : > { %1427 = vmatprep.mubr.msk.f32.mxu0 %vm907_vm11, %v892_v53 }
 0x112   : > { %v527_v27 = vpop.permute.xlu1 %526  ;;  %v336_v24 = vpop.permute.xlu0 %335 }
 0x113   : > { %v827_v36 = vsel %vm817_vm6, %v810_v49, %v527_v27  ;;  %v777_v39 = vsel %vm766_vm3, %v1777_v12, %v336_v24 }
 0x116   : > { %v733_v60 = vpop.permute.xlu1 %732  ;;  %v578_v0 = vpop.permute.xlu0 %577 }
 0x117   : > { %v893_v22 = vsel %vm885_vm10, %v876_v14, %v733_v60  ;;  %v843_v18 = vsel %vm834_vm7, %v826_v17, %v578_v0 }
 0x118   : > { %1428 = vmatmul.mubr.msk.f32.gmra.mxu0 %vm907_vm11, %v893_v22 }
 0x11a   : > { %v425_v46 = vpop.permute.xlu1 %424  ;;  %v338_v34 = vpop.permute.xlu0 %337 }
 0x11b   : > { %v794_v51 = vsel %vm783_vm4, %v777_v39, %v425_v46  ;;  %v778_v12 = vsel %vm766_vm3, %v1780_v15, %v338_v34 }
 0x11e   : > { %v628_v38 = vpop.permute.xlu1 %627  ;;  %v580_v62 = vpop.permute.xlu0 %579 }
 0x11f   : > { %v860_v19 = vsel %vm851_vm8, %v843_v18, %v628_v38  ;;  %v844_v42 = vsel %vm834_vm7, %v827_v36, %v580_v62 }
 0x122   : > { %v475_v40 = vpop.permute.xlu1 %474  ;;  %v427_v61 = vpop.permute.xlu0 %426 }
 0x123   : > { %v811_v43 = vsel %vm800_vm5, %v794_v51, %v475_v40  ;;  %v795_v24 = vsel %vm783_vm4, %v778_v12, %v427_v61 }
 0x126   : > { %v682_v63 = vpop.permute.xlu1 %681  ;;  %v630_v48 = vpop.permute.xlu0 %629 }
 0x127   : > { %v877_v26 = vsel %vm868_vm9, %v860_v19, %v682_v63  ;;  %v861_v1 = vsel %vm851_vm8, %v844_v42, %v630_v48 }
 0x12a   : > { %v529_v5 = vpop.permute.xlu1 %528  ;;  %v477_v16 = vpop.permute.xlu0 %476 }
 0x12b   : > { %v828_v53 = vsel %vm817_vm6, %v811_v43, %v529_v5  ;;  %v812_v45 = vsel %vm800_vm5, %v795_v24, %v477_v16 }
 0x12e   : > { %v735_v28 = vpop.permute.xlu1 %734  ;;  %v684_v29 = vpop.permute.xlu0 %683 }
 0x12f   : > { %v894_v30 = vsel %vm885_vm10, %v877_v26, %v735_v28  ;;  %v878_v25 = vsel %vm868_vm9, %v861_v1, %v684_v29 }
 0x130   : > { %1430 = vmatprep.mubr.msk.f32.mxu1 %vm907_vm11, %v894_v30 }
 0x132   : > { %v531_v11 = vpop.permute.xlu1 %530  ;;  %v340_v35 = vpop.permute.xlu0 %339 }
 0x133   : > { %v829_v0 = vsel %vm817_vm6, %v812_v45, %v531_v11  ;;  %v779_v16 = vsel %vm766_vm3, %v1827_v47, %v340_v35 }
 0x136   : > { %v737_v6 = vpop.permute.xlu1 %736  ;;  %v582_v23 = vpop.permute.xlu0 %581 }
 0x137   : > { %v895_v58 = vsel %vm885_vm10, %v878_v25, %v737_v6  ;;  %v845_v37 = vsel %vm834_vm7, %v828_v53, %v582_v23 }
 0x138   : > { %1431 = vmatmul.mubr.msk.f32.vlgmr.msra.gmra.mxu1 %vm907_vm11, %v895_v58 }
 0x13a   : > { %v429_v4 = vpop.permute.xlu1 %428  ;;  %v342_v13 = vpop.permute.xlu0 %341 }
 0x13b   : > { %v796_v17 = vsel %vm783_vm4, %v779_v16, %v429_v4  ;;  %v780_v11 = vsel %vm766_vm3, %v1835_v50, %v342_v13 }
 0x13e   : > { %v632_v21 = vpop.permute.xlu1 %631  ;;  %v584_v31 = vpop.permute.xlu0 %583 }
 0x13f   : > { %v862_v54 = vsel %vm851_vm8, %v845_v37, %v632_v21  ;;  %v846_v22 = vsel %vm834_vm7, %v829_v0, %v584_v31 }
 0x142   : > { %v479_v33 = vpop.permute.xlu1 %478  ;;  %v431_v44 = vpop.permute.xlu0 %430 }
 0x143   : > { %v813_v18 = vsel %vm800_vm5, %v796_v17, %v479_v33  ;;  %v797_v35 = vsel %vm783_vm4, %v780_v11, %v431_v44 }
 0x146   : > { %v686_v3 = vpop.permute.xlu1 %685  ;;  %v634_v10 = vpop.permute.xlu0 %633 }
 0x147   : > { %v879_v56 = vsel %vm868_vm9, %v862_v54, %v686_v3  ;;  %v863_v46 = vsel %vm851_vm8, %v846_v22, %v634_v10 }
 0x14a   : > { %v533_v20 = vpop.permute.xlu1 %532  ;;  %v481_v52 = vpop.permute.xlu0 %480 }
 0x14b   : > { %v830_v28 = vsel %vm817_vm6, %v813_v18, %v533_v20  ;;  %v814_v36 = vsel %vm800_vm5, %v797_v35, %v481_v52 }
 0x14e   : > { %v739_v27 = vpop.permute.xlu1 %738  ;;  %v688_v32 = vpop.permute.xlu0 %687 }
 0x14f   : > { %v896_v59 = vsel %vm885_vm10, %v879_v56, %v739_v27  ;;  %v880_v38 = vsel %vm868_vm9, %v863_v46, %v688_v32 }
 0x150   : > { %1433 = vmatprep.mubr.msk.f32.mxu1 %vm907_vm11, %v896_v59 }
 0x152   : > { %v535_v14 = vpop.permute.xlu1 %534  ;;  %v344_v60 = vpop.permute.xlu0 %343 }
 0x153   : > { %v831_v25 = vsel %vm817_vm6, %v814_v36, %v535_v14  ;;  %v781_v3 = vsel %vm766_vm3, %v1902_v41, %v344_v60 }
 0x156   : > { %v741_v62 = vpop.permute.xlu1 %740  ;;  %v586_v40 = vpop.permute.xlu0 %585 }
 0x157   : > { %v897_v15 = vsel %vm885_vm10, %v880_v38, %v741_v62  ;;  %v847_v29 = vsel %vm834_vm7, %v830_v28, %v586_v40 }
 0x158   : > { %1434 = vmatmul.mubr.msk.f32.gmra.mxu1 %vm907_vm11, %v897_v15 }
 0x15a   : > { %v433_v34 = vpop.permute.xlu1 %432  ;;  %v346_v61 = vpop.permute.xlu0 %345 }
 0x15b   : > { %v782_v39 = vsel %vm766_vm3, %v1911_v2, %v346_v61  ;;  %v798_v52 = vsel %vm783_vm4, %v781_v3, %v433_v34 }
 0x15e   : > { %v636_v63 = vpop.permute.xlu1 %635  ;;  %v588_v48 = vpop.permute.xlu0 %587 }
 0x15f   : > { %v864_v30 = vsel %vm851_vm8, %v847_v29, %v636_v63  ;;  %v848_v6 = vsel %vm834_vm7, %v831_v25, %v588_v48 }
 0x162   : > { %v483_v7 = vpop.permute.xlu1 %482  ;;  %v435_v8 = vpop.permute.xlu0 %434 }
 0x163   : > { %v799_v53 = vsel %vm783_vm4, %v782_v39, %v435_v8  ;;  %v815_v54 = vsel %vm800_vm5, %v798_v52, %v483_v7 }
 0x166   : > { %v690_v9 = vpop.permute.xlu1 %689  ;;  %v638_v5 = vpop.permute.xlu0 %637 }
 0x167   : > { %v881_v57 = vsel %vm868_vm9, %v864_v30, %v690_v9  ;;  %v865_v23 = vsel %vm851_vm8, %v848_v6, %v638_v5 }
 0x16a   : > { %v537_v19 = vpop.permute.xlu1 %536  ;;  %v485_v26 = vpop.permute.xlu0 %484 }
 0x16b   : > { %v816_v41 = vsel %vm800_vm5, %v799_v53, %v485_v26  ;;  %v832_v59 = vsel %vm817_vm6, %v815_v54, %v537_v19 }
 0x16e   : > { %v743_v55 = vpop.permute.xlu1 %742  ;;  %v692_v49 = vpop.permute.xlu0 %691 }
 0x16f   : > { %v898_v47 = vsel %vm885_vm10, %v881_v57, %v743_v55  ;;  %v882_v58 = vsel %vm868_vm9, %v865_v23, %v692_v49 }
 0x170   : > { %1436 = vmatprep.mubr.msk.f32.mxu1 %vm907_vm11, %v898_v47 }
 0x172   : > { %v590_v42 = vpop.permute.xlu1 %589  ;;  %v539_v1 = vpop.permute.xlu0 %538 }
 0x173   : > { %v833_v12 = vsel %vm817_vm6, %v816_v41, %v539_v1  ;;  %v849_v45 = vsel %vm834_vm7, %v832_v59, %v590_v42 }
 0x176   : > { %v592_v4 = vpop.permute.xlu1 %591  ;;  %v745_v50 = vpop.permute.xlu0 %744 }
 0x177   : > { %v899_v13 = vsel %vm885_vm10, %v882_v58, %v745_v50  ;;  %v850_v14 = vsel %vm834_vm7, %v833_v12, %v592_v4 }
 0x178   : > { %1437 = vmatmul.mubr.msk.f32.gmra.mxu1 %vm907_vm11, %v899_v13 }
 0x179   : > { %v1420_v21 = vpop.f32.mrf.mxu0 }
 0x17a   : > { %v1143_v31 = vmul.f32 %v1420_v21, %v1420_v21  ;;  %1200 = vst.msk [vmem:[%s2147_s30 + $0x8] sm:$0xff] %vm783_vm4, %v1420_v21  ;;  %v642_v33 = vpop.permute.xlu1 %641  ;;  %v640_v44 = vpop.permute.xlu0 %639  ;;  %v1106_v51 = vsel %vm783_vm4, %v1420_v21, 0.0 }
 0x17b   : > { %v1026_v10 = vpop.f32.mrf.mxu0  ;;  %v867_v60 = vsel %vm851_vm8, %v850_v14, %v642_v33  ;;  %v866_v0 = vsel %vm851_vm8, %v849_v45, %v640_v44 }
 0x17c   : > { %v1105_v43 = vsel %vm783_vm4, %v1026_v10, 0.0  ;;  %v1142_v20 = vmul.f32 %v1026_v10, %v1026_v10  ;;  %1199 = vst.msk [vmem:[%s2147_s30] sm:$0xff] %vm783_vm4, %v1026_v10  ;;  %v1159_v56 = vsel %vm783_vm4, %v1143_v31, 0.0 }
 0x17d   : > { %v1107_v37 = vadd.f32 %v1106_v51, %v1105_v43 }
 0x17e   : > { %v1158_v2 = vsel %vm783_vm4, %v1142_v20, 0.0  ;;  %v696_v27 = vpop.permute.xlu1 %695  ;;  %v694_v32 = vpop.permute.xlu0 %693 }
 0x17f   : > { %v1160_v24 = vadd.f32 %v1159_v56, %v1158_v2  ;;  %v884_v22 = vsel %vm868_vm9, %v867_v60, %v696_v27  ;;  %v883_v46 = vsel %vm868_vm9, %v866_v0, %v694_v32 }
 0x182   : > { %v749_v38 = vpop.permute.xlu1 %748  ;;  %v747_v62 = vpop.permute.xlu0 %746 }
 0x183   : > { %v901_v40 = vsel %vm885_vm10, %v884_v22, %v749_v38  ;;  %v900_v15 = vsel %vm885_vm10, %v883_v46, %v747_v62 }
 0x184   : > { %1439 = vmatprep.mubr.msk.f32.mxu1 %vm907_vm11, %v900_v15 }
 0x185   : > { %1440 = vmatmul.mubr.msk.f32.gmra.mxu1 %vm907_vm11, %v901_v40 }
 0x199   : > { %v1423_v34 = vpop.f32.mrf.mxu0 }
 0x19a   : > { %1202 = vst.msk [vmem:[%s2147_s30 + $0x18] sm:$0xff] %vm783_vm4, %v1423_v34  ;;  %v1145_v63 = vmul.f32 %v1423_v34, %v1423_v34  ;;  %v1110_v9 = vsel %vm783_vm4, %v1423_v34, 0.0 }
 0x19b   : > { %v1036_v61 = vpop.f32.mrf.mxu0 }
 0x19c   : > { %v1108_v48 = vsel %vm783_vm4, %v1036_v61, 0.0  ;;  %v1144_v7 = vmul.f32 %v1036_v61, %v1036_v61  ;;  %1201 = vst.msk [vmem:[%s2147_s30 + $0x10] sm:$0xff] %vm783_vm4, %v1036_v61  ;;  %v1163_v18 = vsel %vm783_vm4, %v1145_v63, 0.0 }
 0x19d   : > { %v1109_v8 = vadd.f32 %v1108_v48, %v1107_v37 }
 0x19e   : > { %v1161_v5 = vsel %vm783_vm4, %v1144_v7, 0.0 }
 0x19f   : > { %v1162_v16 = vadd.f32 %v1161_v5, %v1160_v24  ;;  %v1111_v17 = vadd.f32 %v1110_v9, %v1109_v8 }
 0x1a1   : > { %v1164_v19 = vadd.f32 %v1163_v18, %v1162_v16 }
 0x1b9   : > { %v1426_v26 = vpop.f32.mrf.mxu0 }
 0x1ba   : > { %1204 = vst.msk [vmem:[%s2147_s30 + $0x28] sm:$0xff] %vm783_vm4, %v1426_v26  ;;  %v1147_v29 = vmul.f32 %v1426_v26, %v1426_v26  ;;  %v1114_v49 = vsel %vm783_vm4, %v1426_v26, 0.0 }
 0x1bb   : > { %v1046_v28 = vpop.f32.mrf.mxu0 }
 0x1bc   : > { %v1112_v30 = vsel %vm783_vm4, %v1046_v28, 0.0  ;;  %v1146_v57 = vmul.f32 %v1046_v28, %v1046_v28  ;;  %1203 = vst.msk [vmem:[%s2147_s30 + $0x20] sm:$0xff] %vm783_vm4, %v1046_v28  ;;  %v1167_v36 = vsel %vm783_vm4, %v1147_v29, 0.0 }
 0x1bd   : > { %v1113_v55 = vadd.f32 %v1112_v30, %v1111_v17 }
 0x1be   : > { %v1165_v47 = vsel %vm783_vm4, %v1146_v57, 0.0 }
 0x1bf   : > { %v1166_v11 = vadd.f32 %v1165_v47, %v1164_v19  ;;  %v1115_v35 = vadd.f32 %v1114_v49, %v1113_v55 }
 0x1c1   : > { %v1168_v42 = vadd.f32 %v1167_v36, %v1166_v11 }
 0x1d8   : > { %v1429_v1 = vpop.f32.mrf.mxu0 }
 0x1d9   : > { %1206 = vst.msk [vmem:[%s2147_s30 + $0x38] sm:$0xff] %vm783_vm4, %v1429_v1  ;;  %v1149_v6 = vmul.f32 %v1429_v1, %v1429_v1  ;;  %v1118_v50 = vsel %vm783_vm4, %v1429_v1, 0.0 }
 0x1da   : > { %v1056_v25 = vpop.f32.mrf.mxu0 }
 0x1db   : > { %v1116_v23 = vsel %vm783_vm4, %v1056_v25, 0.0  ;;  %v1148_v58 = vmul.f32 %v1056_v25, %v1056_v25  ;;  %1205 = vst.msk [vmem:[%s2147_s30 + $0x30] sm:$0xff] %vm783_vm4, %v1056_v25  ;;  %v1171_v33 = vsel %vm783_vm4, %v1149_v6, 0.0 }
 0x1dc   : > { %v1117_v4 = vadd.f32 %v1116_v23, %v1115_v35 }
 0x1dd   : > { %v1169_v13 = vsel %vm783_vm4, %v1148_v58, 0.0 }
 0x1de   : > { %v1119_v21 = vadd.f32 %v1118_v50, %v1117_v4  ;;  %v1170_v31 = vadd.f32 %v1169_v13, %v1168_v42 }
 0x1e0   : > { %v1172_v44 = vadd.f32 %v1171_v33, %v1170_v31 }
 0x1f8   : > { %v1432_v3 = vpop.f32.mrf.mxu1 }
 0x1f9   : > { %1208 = vst.msk [vmem:[%s2147_s30 + $0x48] sm:$0xff] %vm783_vm4, %v1432_v3  ;;  %v1151_v39 = vmul.f32 %v1432_v3, %v1432_v3  ;;  %v1122_v52 = vsel %vm783_vm4, %v1432_v3, 0.0 }
 0x1fa   : > { %v1066_v10 = vpop.f32.mrf.mxu1 }
 0x1fb   : > { %v1120_v51 = vsel %vm783_vm4, %v1066_v10, 0.0  ;;  %v1150_v43 = vmul.f32 %v1066_v10, %v1066_v10  ;;  %1207 = vst.msk [vmem:[%s2147_s30 + $0x40] sm:$0xff] %vm783_vm4, %v1066_v10  ;;  %v1175_v41 = vsel %vm783_vm4, %v1151_v39, 0.0 }
 0x1fc   : > { %v1121_v20 = vadd.f32 %v1120_v51, %v1119_v21 }
 0x1fd   : > { %v1173_v53 = vsel %vm783_vm4, %v1150_v43, 0.0 }
 0x1fe   : > { %v1174_v37 = vadd.f32 %v1173_v53, %v1172_v44  ;;  %v1123_v54 = vadd.f32 %v1122_v52, %v1121_v20 }
 0x200   : > { %v1176_v56 = vadd.f32 %v1175_v41, %v1174_v37 }
 0x218   : > { %v1435_v2 = vpop.f32.mrf.mxu1 }
 0x219   : > { %1210 = vst.msk [vmem:[%s2147_s30 + $0x58] sm:$0xff] %vm783_vm4, %v1435_v2  ;;  %v1153_v60 = vmul.f32 %v1435_v2, %v1435_v2  ;;  %v1126_v46 = vsel %vm783_vm4, %v1435_v2, 0.0 }
 0x21a   : > { %v1076_v27 = vpop.f32.mrf.mxu1 }
 0x21b   : > { %1209 = vst.msk [vmem:[%s2147_s30 + $0x50] sm:$0xff] %vm783_vm4, %v1076_v27  ;;  %v1152_v32 = vmul.f32 %v1076_v27, %v1076_v27  ;;  %v1124_v12 = vsel %vm783_vm4, %v1076_v27, 0.0  ;;  %v1179_v40 = vsel %vm783_vm4, %v1153_v60, 0.0 }
 0x21c   : > { %v1125_v14 = vadd.f32 %v1124_v12, %v1123_v54 }
 0x21d   : > { %v1177_v45 = vsel %vm783_vm4, %v1152_v32, 0.0 }
 0x21e   : > { %v1178_v22 = vadd.f32 %v1177_v45, %v1176_v56  ;;  %v1127_v62 = vadd.f32 %v1126_v46, %v1125_v14 }
 0x220   : > { %v1180_v61 = vadd.f32 %v1179_v40, %v1178_v22 }
 0x238   : > { %v1438_v59 = vpop.f32.mrf.mxu1 }
 0x239   : > { %1212 = vst.msk [vmem:[%s2147_s30 + $0x68] sm:$0xff] %vm783_vm4, %v1438_v59  ;;  %v1155_v63 = vmul.f32 %v1438_v59, %v1438_v59  ;;  %v1130_v8 = vsel %vm783_vm4, %v1438_v59, 0.0 }
 0x23a   : > { %v1086_v24 = vpop.f32.mrf.mxu1 }
 0x23b   : > { %1211 = vst.msk [vmem:[%s2147_s30 + $0x60] sm:$0xff] %vm783_vm4, %v1086_v24  ;;  %v1154_v0 = vmul.f32 %v1086_v24, %v1086_v24  ;;  %v1128_v38 = vsel %vm783_vm4, %v1086_v24, 0.0  ;;  %v1183_v16 = vsel %vm783_vm4, %v1155_v63, 0.0 }
 0x23c   : > { %v1129_v34 = vadd.f32 %v1128_v38, %v1127_v62 }
 0x23d   : > { %v1181_v15 = vsel %vm783_vm4, %v1154_v0, 0.0 }
 0x23e   : > { %v1182_v48 = vadd.f32 %v1181_v15, %v1180_v61  ;;  %v1131_v5 = vadd.f32 %v1130_v8, %v1129_v34 }
 0x240   : > { %v1184_v28 = vadd.f32 %v1183_v16, %v1182_v48 }
 0x245   : > { %v1441_v7 = vpop.f32.mrf.mxu1 }
 0x246   : > { %1214 = vst.msk [vmem:[%s2147_s30 + $0x78] sm:$0xff] %vm783_vm4, %v1441_v7  ;;  %v1157_v17 = vmul.f32 %v1441_v7, %v1441_v7  ;;  %v1134_v29 = vsel %vm783_vm4, %v1441_v7, 0.0 }
 0x247   : > { %v1096_v9 = vpop.f32.mrf.mxu1 }
 0x248   : > { %v1132_v18 = vsel %vm783_vm4, %v1096_v9, 0.0  ;;  %v1156_v19 = vmul.f32 %v1096_v9, %v1096_v9  ;;  %1213 = vst.msk [vmem:[%s2147_s30 + $0x70] sm:$0xff] %vm783_vm4, %v1096_v9  ;;  %v1187_v49 = vsel %vm783_vm4, %v1157_v17, 0.0 }
 0x249   : > { %v1133_v26 = vadd.f32 %v1132_v18, %v1131_v5 }
 0x24a   : > { %v1185_v30 = vsel %vm783_vm4, %v1156_v19, 0.0 }
 0x24b   : > { %v1135_v57 = vadd.f32 %v1134_v29, %v1133_v26  ;;  %v1186_v55 = vadd.f32 %v1185_v30, %v1184_v28 }
 0x24d   : > { %v1136_v47 = vrot.slane %v1135_v57, 4  ;;  %v1188_v11 = vadd.f32 %v1187_v49, %v1186_v55 }
 0x24f   : > { %v1137_v35 = vadd.f32 %v1136_v47, %v1135_v57  ;;  %v1189_v36 = vrot.slane %v1188_v11, 4 }
 0x251   : > { %v1138_v42 = vrot.slane %v1137_v35, 2  ;;  %v1190_v1 = vadd.f32 %v1189_v36, %v1188_v11 }
 0x253   : > { %v1139_v25 = vadd.f32 %v1138_v42, %v1137_v35  ;;  %v1191_v6 = vrot.slane %v1190_v1, 2 }
 0x255   : > { %v1140_v23 = vrot.slane %v1139_v25, 1  ;;  %v1192_v58 = vadd.f32 %v1191_v6, %v1190_v1 }
 0x257   : > { %v1193_v4 = vrot.slane %v1192_v58, 1  ;;  %v1141_v50 = vadd.f32 %v1140_v23, %v1139_v25 }
 0x259   : > { %v1194_v13 = vadd.f32 %v1193_v4, %v1192_v58 }
 0x25b   : > { %v1196_v21 = vsel %vm1195_vm12, %v1141_v50, %v1194_v13 }
 0x25c   : > { %1198 = vst.msk [vmem:[%s216_s9] sm:$0x3] %vm1197_vm13, %v1196_v21 }
 0x25d PF: > { %s14_s16 = sadd.s32 1, %s1539_s16   ;;  %s2259_s12 = smov %s1531_s14 }
 0x25e   : > { %p11_p8 = scmp.ge.s32.totalorder %s14_s16, 6   ;;  %s2260_s13 = smov %s1535_s15 }
 0x25f   : > { %s2261_s14 = smov %s2264_s17  ;;  %s2262_s15 = smov %s2268_s18 }
 0x260   :  { %13 = sbr.rel (!%p11_p8) target bundleno = 3 (0x3), region = 71 }

// kernel: double_conv.5
= control target key start
LH: loop header
LB: loop body
LE: loop exit
PB: predicated region body
PF: predicated region fallthrough
CT: control target
= control target key end

     0   :  { %s303_s12 = smov 0   ;;  %s320_s0 = inlined_call_operand.vmem [shape: f32[32,128], index: 0, kind: input, shape index: {}]   ;;  %s321_s1 = inlined_call_operand.vmem [shape: f32[1,128], index: 1, kind: input, shape index: {}]   ;;  %s322_s2 = inlined_call_operand.vmem [shape: f32[1,128], index: 2, kind: input, shape index: {}]   ;;  %s323_s3 = inlined_call_operand.vmem [shape: f32[32,128], index: 3, kind: output, shape index: {}]  }
   0x1 LB: > { %s254_s13 = sadd.s32 4294967295, %s281_s12   ;;  %p258_p0 = scmp.ge.s32.totalorder %s281_s12, 1  ;;  %s281_s12 = sphi %s303_s12, %s13_s12  }
   0x2   : > { %p138_p1 = scmp.lt.s32.totalorder %s281_s12, 3 }
   0x4   : > { %p139_p2 = pnand %p258_p0, %p138_p1 }
   0x5   : > { %s259_s14 = sshll.u32 (!%p139_p2), %s254_s13, 1 }
   0x6   : > { %142 = sbr.rel (%p139_p2) target bundleno = 22 (0x16), region = 32  ;;  %p163_p3 = scmp.lt.s32.totalorder (!%p139_p2), %s259_s14, 3 }
   0xb   : > { %s325_s14 = smov (!%p163_p3, %s259_s14), 3  ;;  %v263_v0 = vld [vmem:[%s321_s1] ss:$0 sm:$0xff] }
   0xc   : > { %s260_s15 = sshll.u32 %s325_s14, 3  ;;  %v264_v3 = vld [vmem:[%s322_s2] ss:$0 sm:$0xff] }
   0xd   : > { %s166_s20 = scalar_lea.vmem %s320_s0, %s260_s15  ;;  %s172_s25 = scalar_lea.vmem %s323_s3, %s260_s15 }
   0xe   : > { %v174_v1 = vld [vmem:[%s166_s20] sm:$0xff]  ;;  %v175_v2 = vld [vmem:[%s166_s20 + $0x8] sm:$0xff] }
   0xf   : > { %v183_v4 = vmul.f32 %v263_v0, %v174_v1  ;;  %v184_v5 = vmul.f32 %v263_v0, %v175_v2 }
  0x11   : > { %v192_v6 = vadd.f32 %v264_v3, %v183_v4  ;;  %v193_v7 = vadd.f32 %v264_v3, %v184_v5 }
  0x13   : > { %v194_v8 = vmax.f32 %v192_v6, 0.0  ;;  %v195_v9 = vmax.f32 %v193_v7, 0.0 }
  0x15   : > { %196 = vst [vmem:[%s172_s25] sm:$0xff] %v194_v8  ;;  %197 = vst [vmem:[%s172_s25 + $0x8] sm:$0xff] %v195_v9 }
  0x16 PF: > { %s13_s12 = sadd.s32 1, %s281_s12  }
  0x17   : > { %p10_p4 = scmp.ge.s32.totalorder %s13_s12, 4  }
  0x19   :  { %12 = sbr.rel (!%p10_p4) target bundleno = 1 (0x1), region = 62 }

// kernel: double_conv.4
= control target key start
LH: loop header
LB: loop body
LE: loop exit
PB: predicated region body
PF: predicated region fallthrough
CT: control target
= control target key end

     0   :  { %s1960_s18 = smov 0   ;;  %s1962_s19 = smov 0   ;;  %s2912_s0 = inlined_call_operand.vmem [shape: f32[2,18,18,8], index: 0, kind: input, shape index: {}]   ;;  %s2913_s1 = inlined_call_operand.vmem [shape: f32[72,8], index: 1, kind: input, shape index: {}]   ;;  %s2914_s2 = inlined_call_operand.vmem [shape: f32[1,1,8], index: 2, kind: input, shape index: {}]   ;;  %s2915_s3 = inlined_call_operand.vmem [shape: f32[1,1,8], index: 3, kind: input, shape index: {}]   ;;  %s2916_s4 = inlined_call_operand.vmem [shape: f32[2,16,16,8], index: 4, kind: output, shape index: {0}]   ;;  %s2917_s5 = inlined_call_operand.vmem [shape: f32[2,2,2,8], index: 5, kind: output, shape index: {1}]  }
   0x1   :  { %s1964_s20 = smov 0   ;;  %s1966_s21 = smov 0  }
   0x2   :  { %s1968_s22 = smov 0  }
   0x3 LB: > { %s25_s23 = sadd.s32 1, %s1912_s20  ;;  %s28_s24 = sadd.s32 1, %s1916_s21  ;;  %s1920_s22 = sphi %s1968_s22, %s16_s22   ;;  %s1916_s21 = sphi %s1966_s21, %s2948_s21   ;;  %s1912_s20 = sphi %s1964_s20, %s2947_s20   ;;  %s1908_s19 = sphi %s1962_s19, %s2946_s19   ;;  %s1904_s18 = sphi %s1960_s18, %s2945_s18  }
   0x4   : > { %p26_p0 = scmp.ge.s32.totalorder %s25_s23, 2  ;;  %p1716_p1 = scmp.ge.s32.totalorder %s1920_s22, 1 }
   0x5   : > { %p206_p2 = scmp.lt.s32.totalorder %s1920_s22, 5 }
   0x6   : > { %s2950_s23 = smov (%p26_p0, %s25_s23), 0  ;;  %s2952_s24 = smov (!%p26_p0, %s28_s24), %s1916_s21 }
   0x7   : > { %p207_p3 = pnand %p1716_p1, %p206_p2  ;;  %p30_p4 = scmp.ge.s32.totalorder %s2952_s24, 2 }
   0x8   : > { %p247_p5 = scmp.lt.s32.totalorder (!%p207_p3), %s1908_s19, 1  ;;  %s1993_s25 = sshll.u32 (!%p207_p3), %s1904_s18, 3 }
   0x9   : > { %s2954_s24 = smov (%p30_p4, %s2952_s24), 0  ;;  %210 = sbr.rel (%p207_p3) target bundleno = 612 (0x264), region = 36 }
   0xa   : > { %s1725_s26 = smul.u32 (!%p207_p3), 192, %s1904_s18  ;;  %s1922_s11 = smov (!%p207_p3), 24  }
   0xb   : > { %s1923_s12 = smov (!%p207_p3), 16   ;;  %s1924_s13 = smov (!%p207_p3), 8  }
   0xc   : > { %s1925_s14 = smov (!%p207_p3), 32   ;;  %s1926_s15 = smov (!%p207_p3), 40  }
   0xd   : > { %s1927_s7 = smov (!%p207_p3), 48   ;;  %s1928_s28 = smov (!%p207_p3), 56  }
   0xe   : > { %v418_v0 = vlaneseq  ;;  %v1996_v1 = vstv %s1993_s25  ;;  %s2956_s19 = smov (!%p247_p5, %s1908_s19), 1  ;;  %v2011_v4 = vld [vmem:[%s2914_s2] ss:$0 sm:$0xff]  ;;  %vm2918_vm11 = vcmask 1045504   ;;  %vm632_vm12 = vcmask 1046528   ;;  %s1929_s10 = smov 64  }
   0xf   : > { %v409_v2 = vadd.s32 1, %v1996_v1  ;;  %s1831_s27 = smul.u32 432, %s2956_s19  ;;  %vm422_vm2 = vcmp.ge.s32.totalorder %v1996_v1, 1  ;;  %vm432_vm3 = vcmp.le.s32.totalorder %v1996_v1, 16  ;;  %v2023_v6 = vld [vmem:[%s2915_s3] ss:$0 sm:$0xff] }
  0x10   : > { %v2003_v3 = vshrl.u32 %v418_v0, 7  ;;  %vm2037_vm6 = vmand %vm422_vm2, %vm432_vm3  ;;  %v410_v54 = vadd.s32 2, %v1996_v1  ;;  %v1268_v7 = vld [vmem:[%s2913_s1 + $0x40] sm:$0xff]  ;;  %p255_p6 = scmp.lt.s32.totalorder %s1993_s25, 15  ;;  %p265_p7 = scmp.lt.s32.totalorder %s1904_s18, 1 }
  0x11   : > { %vm423_vm0 = vcmp.ge.s32.totalorder %v409_v2, 1  ;;  %vm433_vm1 = vcmp.le.s32.totalorder %v409_v2, 16  ;;  %s251_s30 = scalar_lea.vmem %s2912_s0, %s1831_s27  ;;  %1771 = vmatprep.subr.mxu0 %v1268_v7  ;;  %1813 = vmatprep.subr.mxu1 %v1268_v7 }
  0x12   : > { %v2014_v5 = vadd.s32 16, %v2003_v3  ;;  %s2018_s8 = scalar_lea.vmem %s251_s30, %s1725_s26  ;;  %vm2025_vm4 = vmand %vm423_vm0, %vm433_vm1  ;;  %vm452_vm5 = vcmp.ge.s32.totalorder %v2003_v3, 1  ;;  %vm424_vm14 = vcmp.ge.s32.totalorder %v410_v54, 1  ;;  %vm434_vm15 = vcmp.le.s32.totalorder %v410_v54, 16  ;;  %1772 = vmatpush3.msra.mxu0 %v1268_v7  ;;  %1822 = vmatpush3.msra.mxu1 %v1268_v7  ;;  %s2958_s25 = smov (!%p255_p6, %s1993_s25), 15 }
  0x13   : > { %v278_v8 = vld [vmem:[%s2018_s8 + $0x20] sm:$0xff]  ;;  %v277_v9 = vld [vmem:[%s2018_s8 + $0x18] sm:$0xff]  ;;  %v275_v13 = vld [vmem:[%s2018_s8 + $0x8] sm:$0xff]  ;;  %s2960_s18 = smov (!%p265_p7, %s1904_s18), 1 }
  0x14   : > { %v274_v10 = vld [vmem:[%s2018_s8] sm:$0xff]  ;;  %v315_v11 = vmul.f32 %v2011_v4, %v278_v8  ;;  %v314_v12 = vmul.f32 %v2011_v4, %v277_v9  ;;  %v276_v16 = vld [vmem:[%s2018_s8 + $0x10] sm:$0x3]  ;;  %vm487_vm7 = vcmp.le.s32.totalorder %v2014_v5, 16  ;;  %v312_v17 = vmul.f32 %v2011_v4, %v275_v13  ;;  %v279_v19 = vld [vmem:[%s2018_s8 + $0x28] sm:$0x3] }
  0x15   : > { %v311_v14 = vmul.f32 %v2011_v4, %v274_v10  ;;  %v313_v18 = vmul.f32 %v2011_v4, %v276_v16  ;;  %vm458_vm8 = vmand %vm2025_vm4, %vm452_vm5  ;;  %v316_v23 = vmul.f32 %v2011_v4, %v279_v19  ;;  %v280_v50 = vld [vmem:[%s2018_s8 + $0x30] sm:$0xff]  ;;  %v281_v52 = vld [vmem:[%s2018_s8 + $0x38] sm:$0xff] }
  0x16   : > { %v352_v20 = vadd.f32 %v2023_v6, %v315_v11  ;;  %v351_v21 = vadd.f32 %v2023_v6, %v314_v12  ;;  %v349_v24 = vadd.f32 %v2023_v6, %v312_v17  ;;  %vm455_vm9 = vmand %vm2037_vm6, %vm452_vm5  ;;  %v317_v53 = vmul.f32 %v2011_v4, %v280_v50  ;;  %v282_v2 = vld [vmem:[%s2018_s8 + $0x40] sm:$0x3]  ;;  %v1267_v12 = vld [vmem:[%s2913_s1 + $0x38] sm:$0xff] }
  0x17   : > { %v348_v22 = vadd.f32 %v2023_v6, %v311_v14  ;;  %v350_v25 = vadd.f32 %v2023_v6, %v313_v18  ;;  %vm490_vm10 = vmand %vm2037_vm6, %vm487_vm7  ;;  %v353_v31 = vadd.f32 %v2023_v6, %v316_v23  ;;  %v318_v59 = vmul.f32 %v2011_v4, %v281_v52  ;;  %v1266_v13 = vld [vmem:[%s2913_s1 + $0x30] sm:$0xff]  ;;  %1773 = vmatprep.subr.mxu0 %v1267_v12  ;;  %v1265_v18 = vld [vmem:[%s2913_s1 + $0x28] sm:$0xff] }
  0x18   : > { %v382_v26 = vmax.f32 %v352_v20, 0.0  ;;  %v381_v27 = vmax.f32 %v351_v21, 0.0  ;;  %v379_v29 = vmax.f32 %v349_v24, 0.0  ;;  %vm493_vm13 = vmand %vm2025_vm4, %vm487_vm7  ;;  %v354_v62 = vadd.f32 %v2023_v6, %v317_v53  ;;  %1814 = vmatprep.subr.mxu1 %v1267_v12  ;;  %1774 = vmatpush3.msra.mxu0 %v1267_v12  ;;  %v1263_v23 = vld [vmem:[%s2913_s1 + $0x18] sm:$0xff]  ;;  %v287_v7 = vld [vmem:[%s2018_s8 + $0x68] sm:$0xff] }
  0x19   : > { %v378_v28 = vmax.f32 %v348_v22, 0.0  ;;  %v380_v30 = vmax.f32 %v350_v25, 0.0  ;;  %v383_v43 = vmax.f32 %v353_v31, 0.0  ;;  %v355_v63 = vadd.f32 %v2023_v6, %v318_v59  ;;  %vm2113_vm0 = vmand %vm424_vm14, %vm434_vm15  ;;  %1823 = vmatpush3.msra.mxu1 %v1267_v12  ;;  %1775 = vmatprep.subr.mxu0 %v1266_v13  ;;  %v1264_v22 = vld [vmem:[%s2913_s1 + $0x20] sm:$0xff] }
  0x1a   : > { %v2067_v32 = vsel %vm2025_vm4, %v382_v26, 0.0  ;;  %v2069_v33 = vsel %vm458_vm8, %v381_v27, 0.0  ;;  %v2079_v35 = vsel %vm2037_vm6, %v379_v29, 0.0  ;;  %v384_v8 = vmax.f32 %v354_v62, 0.0  ;;  %vm461_vm1 = vmand %vm2113_vm0, %vm452_vm5  ;;  %1815 = vmatprep.subr.mxu1 %v1266_v13  ;;  %1776 = vmatpush3.msra.mxu0 %v1266_v13  ;;  %v1262_v26 = vld [vmem:[%s2913_s1 + $0x10] sm:$0xff]  ;;  %v1260_v31 = vld [vmem:[%s2913_s1] sm:$0xff] }
  0x1b   : > { %v2071_v34 = vsel %vm455_vm9, %v378_v28, 0.0  ;;  %814 = vrot.lane.b32.xlu1 %v2067_v32, %s1922_s11  ;;  %812 = vrot.lane.b32.xlu0 %v2069_v33, %s1922_s11  ;;  %v580_v38 = vsel %vm490_vm10, %v380_v30, 0.0  ;;  %v723_v39 = vrot.slane %v2079_v35, 2  ;;  %v634_v40 = vrot.slane %v2079_v35, 1  ;;  %vm496_vm2 = vmand %vm2113_vm0, %vm487_vm7  ;;  %v1261_v30 = vld [vmem:[%s2913_s1 + $0x8] sm:$0xff] }
  0x1c   : > { %v722_v36 = vrot.slane %v2071_v34, 2  ;;  %v633_v37 = vrot.slane %v2071_v34, 1  ;;  %v725_v41 = vrot.slane %v580_v38, 2  ;;  %v636_v42 = vrot.slane %v580_v38, 1  ;;  %1824 = vmatpush3.msra.mxu1 %v1266_v13  ;;  %1777 = vmatprep.subr.mxu0 %v1265_v18  ;;  %v283_v38 = vld [vmem:[%s2018_s8 + $0x48] sm:$0xff] }
  0x1d   : > { %v638_v48 = vrot.slane %v2069_v33, 1  ;;  %v639_v49 = vrot.slane %v2067_v32, 1  ;;  %v583_v51 = vsel %vm493_vm13, %v383_v43, 0.0  ;;  %v727_v56 = vrot.slane %v2069_v33, 2  ;;  %1816 = vmatprep.subr.mxu1 %v1265_v18  ;;  %1778 = vmatpush3.msra.mxu0 %v1265_v18 }
  0x1e   : > { %v724_v44 = vsel %vm2918_vm11, %v722_v36, %v723_v39  ;;  %v635_v45 = vsel %vm632_vm12, %v633_v37, %v634_v40  ;;  %v726_v46 = vsel %vm2918_vm11, %v723_v39, %v725_v41  ;;  %v637_v47 = vsel %vm632_vm12, %v634_v40, %v636_v42  ;;  %1825 = vmatpush3.msra.mxu1 %v1265_v18  ;;  %v284_v39 = vld [vmem:[%s2018_s8 + $0x50] sm:$0xff] }
  0x1f   : > { %762 = vrot.lane.b32.xlu1 %v724_v44, %s1923_s12  ;;  %673 = vrot.lane.b32.xlu0 %v635_v45, %s1924_s13  ;;  %v640_v55 = vsel %vm632_vm12, %v638_v48, %v639_v49  ;;  %v728_v57 = vrot.slane %v2067_v32, 2  ;;  %v641_v58 = vrot.slane %v583_v51, 1  ;;  %v730_v9 = vrot.slane %v583_v51, 2  ;;  %v285_v48 = vld [vmem:[%s2018_s8 + $0x58] sm:$0x3] }
  0x20   : > { %v385_v10 = vmax.f32 %v355_v63, 0.0  ;;  %v319_v11 = vmul.f32 %v2011_v4, %v282_v2  ;;  %v2136_v14 = vsel %vm461_vm1, %v384_v8, 0.0  ;;  %1779 = vmatprep.subr.mxu0 %v1264_v22  ;;  %1817 = vmatprep.subr.mxu1 %v1264_v22  ;;  %v411_v40 = vadd.s32 3, %v1996_v1  ;;  %v286_v2 = vld [vmem:[%s2018_s8 + $0x60] sm:$0xff]  ;;  %v288_v18 = vld [vmem:[%s2018_s8 + $0x70] sm:$0x3] }
  0x21   : > { %v729_v60 = vsel %vm2918_vm11, %v727_v56, %v728_v57  ;;  %v642_v61 = vsel %vm632_vm12, %v639_v49, %v641_v58  ;;  %v731_v15 = vsel %vm2918_vm11, %v728_v57, %v730_v9  ;;  %v643_v19 = vrot.slane %v2136_v14, 1  ;;  %1780 = vmatpush3.msra.mxu0 %v1264_v22  ;;  %1826 = vmatpush3.msra.mxu1 %v1264_v22 }
  0x22   : > { %v2141_v16 = vsel %vm2113_vm0, %v385_v10, 0.0  ;;  %v356_v17 = vadd.f32 %v2023_v6, %v319_v11  ;;  %1781 = vmatprep.subr.mxu0 %v1263_v23  ;;  %1818 = vmatprep.subr.mxu1 %v1263_v23  ;;  %v732_v27 = vrot.slane %v2136_v14, 2  ;;  %v320_v42 = vmul.f32 %v2011_v4, %v283_v38 }
  0x23   : > { %764 = vrot.lane.b32.xlu1 %v726_v46, %s1923_s12  ;;  %675 = vrot.lane.b32.xlu0 %v637_v47, %s1924_s13  ;;  %v644_v20 = vrot.slane %v2141_v16, 1  ;;  %v733_v28 = vrot.slane %v2141_v16, 2  ;;  %v321_v43 = vmul.f32 %v2011_v4, %v284_v39  ;;  %vm425_vm3 = vcmp.ge.s32.totalorder %v411_v40, 1  ;;  %v289_v39 = vld [vmem:[%s2018_s8 + $0x78] sm:$0xff] }
  0x24   : > { %v386_v21 = vmax.f32 %v356_v17, 0.0  ;;  %1782 = vmatpush3.msra.mxu0 %v1263_v23  ;;  %1827 = vmatpush3.msra.mxu1 %v1263_v23  ;;  %vm435_vm4 = vcmp.le.s32.totalorder %v411_v40, 16  ;;  %v357_v45 = vadd.f32 %v2023_v6, %v320_v42  ;;  %v322_v51 = vmul.f32 %v2011_v4, %v285_v48  ;;  %v290_v40 = vld [vmem:[%s2018_s8 + $0x80] sm:$0xff] }
  0x25   : > { %v645_v24 = vsel %vm632_vm12, %v643_v19, %v644_v20  ;;  %1783 = vmatprep.subr.mxu0 %v1262_v26  ;;  %1819 = vmatprep.subr.mxu1 %v1262_v26  ;;  %v734_v36 = vsel %vm2918_vm11, %v732_v27, %v733_v28  ;;  %v358_v46 = vadd.f32 %v2023_v6, %v321_v43  ;;  %vm2197_vm6 = vmand %vm425_vm3, %vm435_vm4  ;;  %v412_v8 = vadd.s32 4, %v1996_v1 }
  0x26   : > { %v586_v25 = vsel %vm496_vm2, %v386_v21, 0.0  ;;  %1784 = vmatpush3.msra.mxu0 %v1262_v26  ;;  %1828 = vmatpush3.msra.mxu1 %v1262_v26  ;;  %v387_v49 = vmax.f32 %v357_v45, 0.0  ;;  %vm464_vm8 = vmand %vm2197_vm6, %vm452_vm5  ;;  %v359_v54 = vadd.f32 %v2023_v6, %v322_v51  ;;  %v323_v10 = vmul.f32 %v2011_v4, %v286_v2 }
  0x27   : > { %677 = vrot.lane.b32.xlu1 %v640_v55, %s1924_s13  ;;  %866 = vrot.lane.b32.xlu0 %v640_v55, %s1925_s14  ;;  %v646_v29 = vrot.slane %v586_v25, 1  ;;  %v735_v41 = vrot.slane %v586_v25, 2  ;;  %v388_v50 = vmax.f32 %v358_v46, 0.0  ;;  %vm499_vm9 = vmand %vm2197_vm6, %vm487_vm7  ;;  %v324_v11 = vmul.f32 %v2011_v4, %v287_v7 }
  0x28   : > { %1785 = vmatprep.subr.mxu0 %v1261_v30  ;;  %1820 = vmatprep.subr.mxu1 %v1261_v30  ;;  %v2211_v52 = vsel %vm464_vm8, %v387_v49, 0.0  ;;  %v389_v57 = vmax.f32 %v359_v54, 0.0  ;;  %vm426_vm10 = vcmp.ge.s32.totalorder %v412_v8, 1  ;;  %vm436_vm13 = vcmp.le.s32.totalorder %v412_v8, 16  ;;  %v291_v49 = vld [vmem:[%s2018_s8 + $0x88] sm:$0x3] }
  0x29   : > { %v647_v37 = vsel %vm632_vm12, %v644_v20, %v646_v29  ;;  %1786 = vmatpush3.msra.mxu0 %v1261_v30  ;;  %1829 = vmatpush3.msra.mxu1 %v1261_v30  ;;  %v736_v44 = vsel %vm2918_vm11, %v733_v28, %v735_v41  ;;  %v2215_v53 = vsel %vm2197_vm6, %v388_v50, 0.0  ;;  %v648_v55 = vrot.slane %v2211_v52, 1  ;;  %vm2253_vm14 = vmand %vm426_vm10, %vm436_vm13 }
  0x2a   : > { %1787 = vmatprep.subr.mxu0 %v1260_v31  ;;  %1821 = vmatprep.subr.mxu1 %v1260_v31  ;;  %v649_v56 = vrot.slane %v2215_v53, 1  ;;  %v589_v59 = vsel %vm499_vm9, %v389_v57, 0.0  ;;  %v360_v13 = vadd.f32 %v2023_v6, %v323_v10  ;;  %vm467_vm15 = vmand %vm2253_vm14, %vm452_vm5  ;;  %v325_v21 = vmul.f32 %v2011_v4, %v288_v18 }
  0x2b   : > { %919 = vrot.lane.b32.xlu1 %v729_v60, %s1926_s15  ;;  %868 = vrot.lane.b32.xlu0 %v642_v61, %s1925_s14  ;;  %v651_v62 = vrot.slane %v589_v59, 1  ;;  %v740_v9 = vrot.slane %v589_v59, 2  ;;  %vm502_vm0 = vmand %vm2253_vm14, %vm487_vm7  ;;  %v413_v41 = vadd.s32 5, %v1996_v1  ;;  %v326_v43 = vmul.f32 %v2011_v4, %v289_v39 }
  0x2c   : > { %1788 = vmatpush3.msra.mxu0 %v1260_v31  ;;  %1830 = vmatpush3.msra.mxu1 %v1260_v31  ;;  %v650_v58 = vsel %vm632_vm12, %v648_v55, %v649_v56  ;;  %v390_v19 = vmax.f32 %v360_v13, 0.0  ;;  %vm1124_vm10 = vcmask 64512  }
  0x2d   : > { %v652_v0 = vsel %vm632_vm12, %v649_v56, %v651_v62  ;;  %vm427_vm1 = vcmp.ge.s32.totalorder %v413_v41, 1  ;;  %vm437_vm2 = vcmp.le.s32.totalorder %v413_v41, 16  ;;  %v363_v46 = vadd.f32 %v2023_v6, %v326_v43  ;;  %v294_v43 = vld [vmem:[%s2018_s8 + $0xa0] sm:$0x3] }
  0x2e   : > { %v2267_v22 = vsel %vm467_vm15, %v390_v19, 0.0  ;;  %vm2309_vm3 = vmand %vm427_vm1, %vm437_vm2  ;;  %v328_v56 = vmul.f32 %v2011_v4, %v291_v49  ;;  %v331_v49 = vmul.f32 %v2011_v4, %v294_v43  ;;  %vm1175_vm1 = vcmask 261120  }
  0x2f   : > { %766 = vrot.lane.b32.xlu1 %v729_v60, %s1923_s12  ;;  %679 = vrot.lane.b32.xlu0 %v642_v61, %s1924_s13  ;;  %v737_v60 = vrot.slane %v2211_v52, 2  ;;  %v738_v61 = vrot.slane %v2215_v53, 2  ;;  %v653_v25 = vrot.slane %v2267_v22, 1  ;;  %v742_v30 = vrot.slane %v2267_v22, 2  ;;  %vm470_vm4 = vmand %vm2309_vm3, %vm452_vm5 }
  0x30   : > { %v393_v50 = vmax.f32 %v363_v46, 0.0  ;;  %vm505_vm6 = vmand %vm2309_vm3, %vm487_vm7  ;;  %vm1192_vm2 = vcmask 326656  }
  0x31   : > { %v739_v63 = vsel %vm2918_vm11, %v737_v60, %v738_v61  ;;  %v741_v12 = vsel %vm2918_vm11, %v738_v61, %v740_v9  ;;  %v365_v61 = vadd.f32 %v2023_v6, %v328_v56 }
  0x32   : > { %v2327_v57 = vsel %vm470_vm4, %v393_v50, 0.0  ;;  %vm1226_vm4 = vcmask 457728  }
  0x33   : > { %969 = vrot.lane.b32.xlu1 %v2136_v14, %s1927_s7  ;;  %921 = vrot.lane.b32.xlu0 %v731_v15, %s1926_s15  ;;  %v658_v62 = vrot.slane %v2327_v57, 1  ;;  %v395_v7 = vmax.f32 %v365_v61, 0.0  ;;  %v368_v61 = vadd.f32 %v2023_v6, %v331_v49 }
  0x37   : > { %816 = vrot.lane.b32.xlu1 %v2136_v14, %s1922_s11  ;;  %768 = vrot.lane.b32.xlu0 %v731_v15, %s1923_s12  ;;  %v361_v15 = vadd.f32 %v2023_v6, %v324_v11  ;;  %v595_v11 = vsel %vm505_vm6, %v395_v7, 0.0  ;;  %vm1243_vm6 = vcmask 523264  }
  0x39   : > { %v391_v20 = vmax.f32 %v361_v15, 0.0  ;;  %v661_v15 = vrot.slane %v595_v11, 1 }
  0x3b   : > { %1023 = vrot.lane.b32.xlu1 %v645_v24, %s1928_s28  ;;  %971 = vrot.lane.b32.xlu0 %v2141_v16, %s1927_s7  ;;  %v2271_v23 = vsel %vm2253_vm14, %v391_v20, 0.0  ;;  %vm1141_vm14 = vcmask 130048  }
  0x3c   : > { %v654_v26 = vrot.slane %v2271_v23, 1  ;;  %v743_v31 = vrot.slane %v2271_v23, 2 }
  0x3e   : > { %v655_v28 = vsel %vm632_vm12, %v653_v25, %v654_v26  ;;  %v292_v25 = vld [vmem:[%s2018_s8 + $0x90] sm:$0xff] }
  0x3f   : > { %870 = vrot.lane.b32.xlu1 %v645_v24, %s1925_s14  ;;  %818 = vrot.lane.b32.xlu0 %v2141_v16, %s1922_s11 }
  0x43   : > { %1076 = vrot.lane.b32.xlu1 %v734_v36, %s1929_s10  ;;  %1025 = vrot.lane.b32.xlu0 %v647_v37, %s1928_s28 }
  0x47   : > { %872 = vrot.lane.b32.xlu1 %v647_v37, %s1925_s14  ;;  %681 = vrot.lane.b32.xlu0 %v645_v24, %s1924_s13  ;;  %v362_v24 = vadd.f32 %v2023_v6, %v325_v21 }
  0x49   : > { %v392_v27 = vmax.f32 %v362_v24, 0.0 }
  0x4b   : > { %1078 = vrot.lane.b32.xlu1 %v736_v44, %s1929_s10  ;;  %923 = vrot.lane.b32.xlu0 %v734_v36, %s1926_s15  ;;  %v592_v29 = vsel %vm502_vm0, %v392_v27, 0.0  ;;  %v414_v27 = vadd.s32 6, %v1996_v1  ;;  %vm1158_vm0 = vcmask 195584  }
  0x4c   : > { %v745_v42 = vrot.slane %v592_v29, 2 }
  0x4d   : > { %vm428_vm8 = vcmp.ge.s32.totalorder %v414_v27, 1  ;;  %vm438_vm9 = vcmp.le.s32.totalorder %v414_v27, 16 }
  0x4e   : > { %v746_v45 = vsel %vm2918_vm11, %v743_v31, %v745_v42  ;;  %vm2389_vm13 = vmand %vm428_vm8, %vm438_vm9  ;;  %vm1269_vm8 = vcmask 588800  }
  0x4f   : > { %770 = vrot.lane.b32.xlu1 %v734_v36, %s1923_s12  ;;  %683 = vrot.lane.b32.xlu0 %v647_v37, %s1924_s13  ;;  %v656_v36 = vrot.slane %v592_v29, 1  ;;  %v744_v37 = vsel %vm2918_vm11, %v742_v30, %v743_v31  ;;  %v329_v29 = vmul.f32 %v2011_v4, %v292_v25  ;;  %vm473_vm15 = vmand %vm2389_vm13, %vm452_vm5 }
  0x50   : > { %vm508_vm9 = vmand %vm2389_vm13, %vm487_vm7 }
  0x51   : > { %v657_v38 = vsel %vm632_vm12, %v654_v26, %v656_v36  ;;  %v293_v26 = vld [vmem:[%s2018_s8 + $0x98] sm:$0xff] }
  0x52   : > { %v330_v36 = vmul.f32 %v2011_v4, %v293_v26 }
  0x53   : > { %973 = vrot.lane.b32.xlu1 %v2211_v52, %s1927_s7  ;;  %925 = vrot.lane.b32.xlu0 %v736_v44, %s1926_s15 }
  0x54   : > { %v367_v41 = vadd.f32 %v2023_v6, %v330_v36 }
  0x56   : > { %v397_v48 = vmax.f32 %v367_v41, 0.0 }
  0x57   : > { %820 = vrot.lane.b32.xlu1 %v2211_v52, %s1922_s11  ;;  %772 = vrot.lane.b32.xlu0 %v736_v44, %s1923_s12  ;;  %v327_v44 = vmul.f32 %v2011_v4, %v290_v40 }
  0x59   : > { %v364_v47 = vadd.f32 %v2023_v6, %v327_v44 }
  0x5b   : > { %1027 = vrot.lane.b32.xlu1 %v650_v58, %s1928_s28  ;;  %975 = vrot.lane.b32.xlu0 %v2215_v53, %s1927_s7  ;;  %v394_v55 = vmax.f32 %v364_v47, 0.0 }
  0x5d   : > { %v2333_v60 = vsel %vm2309_vm3, %v394_v55, 0.0  ;;  %vm1209_vm3 = vcmask 392192  }
  0x5e   : > { %v748_v13 = vrot.slane %v2333_v60, 2 }
  0x5f   : > { %874 = vrot.lane.b32.xlu1 %v650_v58, %s1925_s14  ;;  %822 = vrot.lane.b32.xlu0 %v2215_v53, %s1922_s11 }
  0x63   : > { %1080 = vrot.lane.b32.xlu1 %v739_v63, %s1929_s10  ;;  %1029 = vrot.lane.b32.xlu0 %v652_v0, %s1928_s28 }
  0x67   : > { %876 = vrot.lane.b32.xlu1 %v652_v0, %s1925_s14  ;;  %685 = vrot.lane.b32.xlu0 %v650_v58, %s1924_s13 }
  0x6b   : > { %1082 = vrot.lane.b32.xlu1 %v741_v12, %s1929_s10  ;;  %927 = vrot.lane.b32.xlu0 %v739_v63, %s1926_s15 }
  0x6f   : > { %774 = vrot.lane.b32.xlu1 %v739_v63, %s1923_s12  ;;  %687 = vrot.lane.b32.xlu0 %v652_v0, %s1924_s13  ;;  %v659_v63 = vrot.slane %v2333_v60, 1 }
  0x71   : > { %v660_v8 = vsel %vm632_vm12, %v658_v62, %v659_v63  ;;  %v662_v20 = vsel %vm632_vm12, %v659_v63, %v661_v15 }
  0x73   : > { %977 = vrot.lane.b32.xlu1 %v2267_v22, %s1927_s7  ;;  %929 = vrot.lane.b32.xlu0 %v741_v12, %s1926_s15 }
  0x77   : > { %824 = vrot.lane.b32.xlu1 %v2267_v22, %s1922_s11  ;;  %776 = vrot.lane.b32.xlu0 %v741_v12, %s1923_s12  ;;  %v747_v12 = vrot.slane %v2327_v57, 2 }
  0x79   : > { %v749_v19 = vsel %vm2918_vm11, %v747_v12, %v748_v13 }
  0x7b   : > { %1031 = vrot.lane.b32.xlu1 %v655_v28, %s1928_s28  ;;  %979 = vrot.lane.b32.xlu0 %v2271_v23, %s1927_s7 }
  0x7f   : > { %878 = vrot.lane.b32.xlu1 %v655_v28, %s1925_s14  ;;  %826 = vrot.lane.b32.xlu0 %v2271_v23, %s1922_s11 }
  0x83   : > { %1084 = vrot.lane.b32.xlu1 %v744_v37, %s1929_s10  ;;  %1033 = vrot.lane.b32.xlu0 %v657_v38, %s1928_s28 }
  0x87   : > { %880 = vrot.lane.b32.xlu1 %v657_v38, %s1925_s14  ;;  %689 = vrot.lane.b32.xlu0 %v655_v28, %s1924_s13  ;;  %v750_v28 = vrot.slane %v595_v11, 2 }
  0x8b   : > { %1086 = vrot.lane.b32.xlu1 %v746_v45, %s1929_s10  ;;  %931 = vrot.lane.b32.xlu0 %v744_v37, %s1926_s15 }
  0x8d   : > { %v2316_v51 = vpop.permute.xlu1 %814  ;;  %v2318_v54 = vpop.permute.xlu0 %812 }
  0x8f   : > { %778 = vrot.lane.b32.xlu1 %v744_v37, %s1923_s12  ;;  %691 = vrot.lane.b32.xlu0 %v657_v38, %s1924_s13  ;;  %v751_v37 = vsel %vm2918_vm11, %v748_v13, %v750_v28  ;;  %v366_v38 = vadd.f32 %v2023_v6, %v329_v29 }
  0x91   : > { %v2329_v58 = vpop.permute.xlu1 %762  ;;  %v674_v59 = vpop.permute.xlu0 %673 }
  0x92   : > { %v1125_v44 = vsel %vm1124_vm10, %v2071_v34, %v674_v59 }
  0x93   : > { %981 = vrot.lane.b32.xlu1 %v2327_v57, %s1927_s7  ;;  %933 = vrot.lane.b32.xlu0 %v746_v45, %s1926_s15  ;;  %v1142_v50 = vsel %vm1141_vm14, %v1125_v44, %v2329_v58  ;;  %v2417_v58 = vsel %vm2389_vm13, %v397_v48, 0.0  ;;  %v295_v44 = vld [vmem:[%s2018_s8 + $0xa8] sm:$0xff] }
  0x94   : > { %v1159_v55 = vsel %vm1158_vm0, %v1142_v50, %v2318_v54  ;;  %v664_v11 = vrot.slane %v2417_v58, 1  ;;  %v753_v29 = vrot.slane %v2417_v58, 2  ;;  %v332_v48 = vmul.f32 %v2011_v4, %v295_v44 }
  0x95   : > { %v2341_v0 = vpop.permute.xlu1 %764  ;;  %v2343_v2 = vpop.permute.xlu0 %675 }
  0x96   : > { %v1126_v63 = vsel %vm1124_vm10, %v2079_v35, %v2343_v2  ;;  %v398_v35 = vmax.f32 %v368_v61, 0.0 }
  0x97   : > { %828 = vrot.lane.b32.xlu1 %v2327_v57, %s1922_s11  ;;  %780 = vrot.lane.b32.xlu0 %v746_v45, %s1923_s12  ;;  %v396_v45 = vmax.f32 %v366_v38, 0.0  ;;  %v1143_v2 = vsel %vm1141_vm14, %v1126_v63, %v2341_v0 }
  0x98   : > { %v598_v25 = vsel %vm508_vm9, %v398_v35, 0.0 }
  0x99   : > { %v2353_v9 = vpop.permute.xlu1 %677  ;;  %v867_v10 = vpop.permute.xlu0 %866  ;;  %v2407_v34 = vsel %vm473_vm15, %v396_v45, 0.0  ;;  %v296_v45 = vld [vmem:[%s2018_s8 + $0xb0] sm:$0xff] }
  0x9a   : > { %v1176_v62 = vsel %vm1175_vm1, %v1159_v55, %v867_v10  ;;  %v333_v55 = vmul.f32 %v2011_v4, %v296_v45 }
  0x9b   : > { %1035 = vrot.lane.b32.xlu1 %v660_v8, %s1928_s28  ;;  %983 = vrot.lane.b32.xlu0 %v2333_v60, %s1927_s7 }
  0x9d   : > { %v920_v17 = vpop.permute.xlu1 %919  ;;  %v2360_v18 = vpop.permute.xlu0 %868 }
  0x9e   : > { %v1193_v54 = vsel %vm1192_vm2, %v1176_v62, %v920_v17  ;;  %v369_v62 = vadd.f32 %v2023_v6, %v332_v48 }
  0x9f   : > { %882 = vrot.lane.b32.xlu1 %v660_v8, %s1925_s14  ;;  %830 = vrot.lane.b32.xlu0 %v2333_v60, %s1922_s11 }
  0xa1   : > { %v2367_v21 = vpop.permute.xlu1 %766  ;;  %v2369_v24 = vpop.permute.xlu0 %679 }
  0xa3   : > { %1088 = vrot.lane.b32.xlu1 %v749_v19, %s1929_s10  ;;  %1037 = vrot.lane.b32.xlu0 %v662_v20, %s1928_s28 }
  0xa5   : > { %v970_v30 = vpop.permute.xlu1 %969  ;;  %v2377_v31 = vpop.permute.xlu0 %921 }
  0xa6   : > { %v1210_v7 = vsel %vm1209_vm3, %v1193_v54, %v970_v30  ;;  %v666_v30 = vrot.slane %v598_v25, 1 }
  0xa7   : > { %884 = vrot.lane.b32.xlu1 %v662_v20, %s1925_s14  ;;  %693 = vrot.lane.b32.xlu0 %v660_v8, %s1924_s13  ;;  %v663_v8 = vrot.slane %v2407_v34, 1 }
  0xa8   : > { %v667_v41 = vsel %vm632_vm12, %v664_v11, %v666_v30 }
  0xa9   : > { %v2384_v39 = vpop.permute.xlu1 %816  ;;  %v2386_v40 = vpop.permute.xlu0 %768  ;;  %v665_v17 = vsel %vm632_vm12, %v663_v8, %v664_v11  ;;  %v297_v11 = vld [vmem:[%s2018_s8 + $0xb8] sm:$0x3] }
  0xab   : > { %1090 = vrot.lane.b32.xlu1 %v751_v37, %s1929_s10  ;;  %935 = vrot.lane.b32.xlu0 %v749_v19, %s1926_s15 }
  0xad   : > { %v1024_v46 = vpop.permute.xlu1 %1023  ;;  %v972_v47 = vpop.permute.xlu0 %971 }
  0xae   : > { %v1227_v10 = vsel %vm1226_vm4, %v1210_v7, %v1024_v46  ;;  %v415_v46 = vadd.s32 7, %v1996_v1  ;;  %v370_v7 = vadd.f32 %v2023_v6, %v333_v55 }
  0xaf   : > { %782 = vrot.lane.b32.xlu1 %v749_v19, %s1923_s12  ;;  %695 = vrot.lane.b32.xlu0 %v662_v20, %s1924_s13  ;;  %v1160_v19 = vsel %vm1158_vm0, %v1143_v2, %v2316_v51  ;;  %v752_v51 = vrot.slane %v2407_v34, 2  ;;  %v334_v2 = vmul.f32 %v2011_v4, %v297_v11 }
  0xb0   : > { %v1177_v26 = vsel %vm1175_vm1, %v1160_v19, %v2360_v18  ;;  %vm429_vm13 = vcmp.ge.s32.totalorder %v415_v46, 1  ;;  %vm439_vm15 = vcmp.le.s32.totalorder %v415_v46, 16  ;;  %v400_v35 = vmax.f32 %v370_v7, 0.0 }
  0xb1   : > { %v2411_v56 = vpop.permute.xlu1 %870  ;;  %v2413_v59 = vpop.permute.xlu0 %818  ;;  %v1194_v27 = vsel %vm1192_vm2, %v1177_v26, %v2377_v31  ;;  %v754_v38 = vsel %vm2918_vm11, %v752_v51, %v753_v29  ;;  %vm2488_vm9 = vmand %vm429_vm13, %vm439_vm15  ;;  %vm2935_vm13 = vcmask 1045504  }
  0xb2   : > { %v1211_v28 = vsel %vm1209_vm3, %v1194_v27, %v972_v47  ;;  %v755_v47 = vrot.slane %v598_v25, 2 }
  0xb3   : > { %985 = vrot.lane.b32.xlu1 %v2407_v34, %s1927_s7  ;;  %937 = vrot.lane.b32.xlu0 %v751_v37, %s1926_s15 }
  0xb4   : > { %v756_v61 = vsel %vm2918_vm11, %v753_v29, %v755_v47  ;;  %vm476_vm11 = vmand %vm2488_vm9, %vm452_vm5 }
  0xb5   : > { %v1077_v12 = vpop.permute.xlu1 %1076  ;;  %v1026_v13 = vpop.permute.xlu0 %1025 }
  0xb6   : > { %v1244_v15 = vsel %vm1243_vm6, %v1227_v10, %v1077_v12  ;;  %v1228_v36 = vsel %vm1226_vm4, %v1211_v28, %v1026_v13  ;;  %v399_v10 = vmax.f32 %v369_v62, 0.0  ;;  %v2517_v28 = vsel %vm2488_vm9, %v400_v35, 0.0 }
  0xb7   : > { %832 = vrot.lane.b32.xlu1 %v2407_v34, %s1922_s11  ;;  %784 = vrot.lane.b32.xlu0 %v751_v37, %s1923_s12  ;;  %v669_v29 = vrot.slane %v2517_v28, 1  ;;  %v758_v48 = vrot.slane %v2517_v28, 2 }
  0xb8   : > { %1789 = vmatprep.mubr.msk.f32.mxu0 %vm1269_vm8, %v1244_v15  ;;  %v1127_v15 = vsel %vm1124_vm10, %v2069_v33, %v2353_v9  ;;  %v2507_v19 = vsel %vm476_vm11, %v399_v10, 0.0  ;;  %v371_v33 = vadd.f32 %v2023_v6, %v334_v2  ;;  %vm511_vm11 = vmand %vm2488_vm9, %vm487_vm7  ;;  %v298_v10 = vld [vmem:[%s2018_s8 + $0xc0] sm:$0xff] }
  0xb9   : > { %v2446_v0 = vpop.permute.xlu1 %872  ;;  %v2448_v20 = vpop.permute.xlu0 %681  ;;  %v668_v51 = vrot.slane %v2507_v19, 1  ;;  %v335_v2 = vmul.f32 %v2011_v4, %v298_v10 }
  0xbb   : > { %1039 = vrot.lane.b32.xlu1 %v665_v17, %s1928_s28  ;;  %987 = vrot.lane.b32.xlu0 %v2417_v58, %s1927_s7 }
  0xbd   : > { %v1079_v18 = vpop.permute.xlu1 %1078  ;;  %v924_v37 = vpop.permute.xlu0 %923 }
  0xbe   : > { %v1245_v31 = vsel %vm1243_vm6, %v1228_v36, %v1079_v18 }
  0xbf   : > { %886 = vrot.lane.b32.xlu1 %v665_v17, %s1925_s14  ;;  %834 = vrot.lane.b32.xlu0 %v2417_v58, %s1922_s11 }
  0xc0   : > { %1790 = vmatmul.mubr.msk.f32.vlgmr.msra.gmra.mxu0 %vm1269_vm8, %v1245_v31  ;;  %v401_v31 = vmax.f32 %v371_v33, 0.0 }
  0xc1   : > { %v2468_v42 = vpop.permute.xlu1 %770  ;;  %v2470_v43 = vpop.permute.xlu0 %683 }
  0xc3   : > { %1092 = vrot.lane.b32.xlu1 %v754_v38, %s1929_s10  ;;  %1041 = vrot.lane.b32.xlu0 %v667_v41, %s1928_s28 }
  0xc5   : > { %v974_v49 = vpop.permute.xlu1 %973  ;;  %v926_v50 = vpop.permute.xlu0 %925 }
  0xc7   : > { %888 = vrot.lane.b32.xlu1 %v667_v41, %s1925_s14  ;;  %697 = vrot.lane.b32.xlu0 %v665_v17, %s1924_s13  ;;  %v1144_v17 = vsel %vm1141_vm14, %v1127_v15, %v2367_v21 }
  0xc8   : > { %v1161_v25 = vsel %vm1158_vm0, %v1144_v17, %v2384_v39 }
  0xc9   : > { %v2483_v63 = vpop.permute.xlu1 %820  ;;  %v2485_v54 = vpop.permute.xlu0 %772  ;;  %v1178_v9 = vsel %vm1175_vm1, %v1161_v25, %v2411_v56 }
  0xca   : > { %v1195_v21 = vsel %vm1192_vm2, %v1178_v9, %v924_v37  ;;  %v1128_v37 = vsel %vm1124_vm10, %v2067_v32, %v2369_v24  ;;  %v601_v32 = vsel %vm511_vm11, %v401_v31, 0.0  ;;  %vm2936_vm11 = vmmov %vm2935_vm13  ;;  %v372_v9 = vadd.f32 %v2023_v6, %v335_v2  ;;  %v301_v2 = vld [vmem:[%s2018_s8 + $0xd8] sm:$0xff] }
  0xcb   : > { %1094 = vrot.lane.b32.xlu1 %v756_v61, %s1929_s10  ;;  %939 = vrot.lane.b32.xlu0 %v754_v38, %s1926_s15  ;;  %v1212_v39 = vsel %vm1209_vm3, %v1195_v21, %v974_v49  ;;  %v671_v49 = vrot.slane %v601_v32, 1  ;;  %v760_v35 = vrot.slane %v601_v32, 2 }
  0xcd   : > { %v1028_v12 = vpop.permute.xlu1 %1027  ;;  %v976_v13 = vpop.permute.xlu0 %975  ;;  %v672_v7 = vsel %vm632_vm12, %v669_v29, %v671_v49  ;;  %v761_v33 = vsel %vm2936_vm11, %v758_v48, %v760_v35 }
  0xce   : > { %v1229_v30 = vsel %vm1226_vm4, %v1212_v39, %v1028_v12  ;;  %v299_v12 = vld [vmem:[%s2018_s8 + $0xc8] sm:$0xff] }
  0xcf   : > { %786 = vrot.lane.b32.xlu1 %v754_v38, %s1923_s12  ;;  %699 = vrot.lane.b32.xlu0 %v667_v41, %s1924_s13  ;;  %v1145_v38 = vsel %vm1141_vm14, %v1128_v37, %v2386_v40  ;;  %v670_v41 = vsel %vm632_vm12, %v668_v51, %v669_v29  ;;  %v336_v25 = vmul.f32 %v2011_v4, %v299_v12  ;;  %v300_v4 = vld [vmem:[%s2018_s8 + $0xd0] sm:$0x3] }
  0xd0   : > { %v1162_v44 = vsel %vm1158_vm0, %v1145_v38, %v2413_v59  ;;  %v757_v59 = vrot.slane %v2507_v19, 2  ;;  %v1129_v37 = vsel %vm1124_vm10, %v2136_v14, %v2448_v20  ;;  %v1881_v14 = vld [vmem:[%s2915_s3] ss:$0 sm:$0xff] }
  0xd1   : > { %v2511_v26 = vpop.permute.xlu1 %874  ;;  %v2513_v27 = vpop.permute.xlu0 %822  ;;  %v1179_v24 = vsel %vm1175_vm1, %v1162_v44, %v2446_v0  ;;  %v373_v51 = vadd.f32 %v2023_v6, %v336_v25  ;;  %v1880_v6 = vld [vmem:[%s2914_s2] ss:$0 sm:$0xff]  ;;  %v1146_v38 = vsel %vm1141_vm14, %v1129_v37, %v2468_v42 }
  0xd2   : > { %v1196_v47 = vsel %vm1192_vm2, %v1179_v24, %v926_v50  ;;  %v759_v62 = vsel %vm2935_vm13, %v757_v59, %v758_v48  ;;  %v1163_v44 = vsel %vm1158_vm0, %v1146_v38, %v2483_v63 }
  0xd3   : > { %989 = vrot.lane.b32.xlu1 %v2507_v19, %s1927_s7  ;;  %941 = vrot.lane.b32.xlu0 %v756_v61, %s1926_s15  ;;  %v1213_v40 = vsel %vm1209_vm3, %v1196_v47, %v976_v13  ;;  %v416_v13 = vadd.s32 8, %v1996_v1  ;;  %v403_v31 = vmax.f32 %v373_v51, 0.0  ;;  %v1180_v42 = vsel %vm1175_vm1, %v1163_v44, %v2511_v26 }
  0xd5   : > { %v1081_v36 = vpop.permute.xlu1 %1080  ;;  %v1030_v18 = vpop.permute.xlu0 %1029  ;;  %vm430_vm15 = vcmp.ge.s32.totalorder %v416_v13, 1  ;;  %vm440_vm9 = vcmp.le.s32.totalorder %v416_v13, 16 }
  0xd6   : > { %v1246_v56 = vsel %vm1243_vm6, %v1229_v30, %v1081_v36  ;;  %v1230_v55 = vsel %vm1226_vm4, %v1213_v40, %v1030_v18  ;;  %vm2588_vm13 = vmand %vm430_vm15, %vm440_vm9  ;;  %v402_v30 = vmax.f32 %v372_v9, 0.0 }
  0xd7   : > { %836 = vrot.lane.b32.xlu1 %v2507_v19, %s1922_s11  ;;  %788 = vrot.lane.b32.xlu0 %v756_v61, %s1923_s12  ;;  %vm479_vm11 = vmand %vm2588_vm13, %vm452_vm5  ;;  %v2617_v47 = vsel %vm2588_vm13, %v403_v31, 0.0 }
  0xd8   : > { %1792 = vmatprep.mubr.msk.f32.mxu0 %vm1269_vm8, %v1246_v56  ;;  %v337_v56 = vmul.f32 %v1880_v6, %v300_v4  ;;  %v862_v48 = vrot.slane %v2617_v47, 1  ;;  %vm514_vm15 = vmand %vm2588_vm13, %vm487_vm7  ;;  %v915_v9 = vrot.slane %v2617_v47, 2 }
  0xd9   : > { %v2547_v45 = vpop.permute.xlu1 %876  ;;  %v2549_v46 = vpop.permute.xlu0 %685 }
  0xda   : > { %v374_v20 = vadd.f32 %v1881_v14, %v337_v56 }
  0xdb   : > { %1043 = vrot.lane.b32.xlu1 %v670_v41, %s1928_s28  ;;  %991 = vrot.lane.b32.xlu0 %v2517_v28, %s1927_s7 }
  0xdd   : > { %v1083_v61 = vpop.permute.xlu1 %1082  ;;  %v928_v0 = vpop.permute.xlu0 %927 }
  0xde   : > { %v1247_v50 = vsel %vm1243_vm6, %v1230_v55, %v1083_v61  ;;  %v1197_v40 = vsel %vm1192_vm2, %v1180_v42, %v928_v0  ;;  %v1130_v0 = vsel %vm1124_vm10, %v2141_v16, %v2470_v43  ;;  %v302_v43 = vld [vmem:[%s2018_s8 + $0xe0] sm:$0xff] }
  0xdf   : > { %890 = vrot.lane.b32.xlu1 %v670_v41, %s1925_s14  ;;  %838 = vrot.lane.b32.xlu0 %v2517_v28, %s1922_s11 }
  0xe0   : > { %1793 = vmatmul.mubr.msk.f32.gmra.mxu0 %vm1269_vm8, %v1247_v50  ;;  %v404_v50 = vmax.f32 %v374_v20, 0.0 }
  0xe1   : > { %v2568_v8 = vpop.permute.xlu1 %774  ;;  %v2570_v11 = vpop.permute.xlu0 %687 }
  0xe2   : > { %v604_v35 = vsel %vm514_vm15, %v404_v50, 0.0 }
  0xe3   : > { %1096 = vrot.lane.b32.xlu1 %v759_v62, %s1929_s10  ;;  %1045 = vrot.lane.b32.xlu0 %v672_v7, %s1928_s28  ;;  %v864_v51 = vrot.slane %v604_v35, 1 }
  0xe5   : > { %v978_v15 = vpop.permute.xlu1 %977  ;;  %v930_v17 = vpop.permute.xlu0 %929 }
  0xe6   : > { %v1214_v63 = vsel %vm1209_vm3, %v1197_v40, %v978_v15  ;;  %v303_v15 = vld [vmem:[%s2018_s8 + $0xe8] sm:$0x3]  ;;  %s1719_s8 = sshll.u32 %s2958_s25, 1 }
  0xe7   : > { %892 = vrot.lane.b32.xlu1 %v672_v7, %s1925_s14  ;;  %701 = vrot.lane.b32.xlu0 %v670_v41, %s1924_s13  ;;  %v602_v41 = vsel %vm479_vm11, %v402_v30, 0.0  ;;  %v339_v30 = vmul.f32 %v1880_v6, %v302_v43  ;;  %vm2939_vm11 = vcmask 1045504  }
  0xe8   : > { %v861_v59 = vrot.slane %v602_v41, 1 }
  0xe9   : > { %v2583_v21 = vpop.permute.xlu1 %824  ;;  %v2585_v39 = vpop.permute.xlu0 %776 }
  0xeb   : > { %1098 = vrot.lane.b32.xlu1 %v761_v33, %s1929_s10  ;;  %943 = vrot.lane.b32.xlu0 %v759_v62, %s1926_s15 }
  0xed   : > { %v1032_v36 = vpop.permute.xlu1 %1031  ;;  %v980_v18 = vpop.permute.xlu0 %979 }
  0xee   : > { %v1231_v49 = vsel %vm1226_vm4, %v1214_v63, %v1032_v36  ;;  %v338_v36 = vmul.f32 %v1880_v6, %v301_v2 }
  0xef   : > { %790 = vrot.lane.b32.xlu1 %v759_v62, %s1923_s12  ;;  %703 = vrot.lane.b32.xlu0 %v672_v7, %s1924_s13  ;;  %v1147_v62 = vsel %vm1141_vm14, %v1130_v0, %v2485_v54  ;;  %v863_v7 = vsel %vm632_vm12, %v861_v59, %v862_v48 }
  0xf0   : > { %v1164_v10 = vsel %vm1158_vm0, %v1147_v62, %v2513_v27  ;;  %v417_v27 = vadd.s32 9, %v1996_v1  ;;  %v375_v38 = vadd.f32 %v1881_v14, %v338_v36 }
  0xf1   : > { %v2611_v32 = vpop.permute.xlu1 %878  ;;  %v2613_v24 = vpop.permute.xlu0 %826  ;;  %v1181_v16 = vsel %vm1175_vm1, %v1164_v10, %v2547_v45 }
  0xf2   : > { %v1198_v54 = vsel %vm1192_vm2, %v1181_v16, %v930_v17  ;;  %v340_v17 = vmul.f32 %v1880_v6, %v303_v15  ;;  %vm431_vm9 = vcmp.ge.s32.totalorder %v417_v27, 1  ;;  %vm441_vm13 = vcmp.le.s32.totalorder %v417_v27, 16 }
  0xf3   : > { %993 = vrot.lane.b32.xlu1 %v602_v41, %s1927_s7  ;;  %945 = vrot.lane.b32.xlu0 %v761_v33, %s1926_s15  ;;  %v1215_v25 = vsel %vm1209_vm3, %v1198_v54, %v980_v18  ;;  %v865_v18 = vsel %vm632_vm12, %v862_v48, %v864_v51  ;;  %v376_v6 = vadd.f32 %v1881_v14, %v339_v30  ;;  %vm2674_vm15 = vmand %vm431_vm9, %vm441_vm13  ;;  %v405_v63 = vmax.f32 %v375_v38, 0.0 }
  0xf4   : > { %vm482_vm9 = vmand %vm2674_vm15, %vm452_vm5  ;;  %vm2942_vm13 = vcmask 1045504  }
  0xf5   : > { %v1085_v55 = vpop.permute.xlu1 %1084  ;;  %v1034_v61 = vpop.permute.xlu0 %1033  ;;  %v406_v40 = vmax.f32 %v376_v6, 0.0  ;;  %vm2943_vm5 = vmmov %vm2942_vm13 }
  0xf6   : > { %v1248_v26 = vsel %vm1243_vm6, %v1231_v49, %v1085_v55  ;;  %v1232_v45 = vsel %vm1226_vm4, %v1215_v25, %v1034_v61  ;;  %v605_v55 = vsel %vm482_vm9, %v405_v63, 0.0 }
  0xf7   : > { %840 = vrot.lane.b32.xlu1 %v602_v41, %s1922_s11  ;;  %792 = vrot.lane.b32.xlu0 %v761_v33, %s1923_s12  ;;  %v914_v33 = vrot.slane %v602_v41, 2  ;;  %v377_v41 = vadd.f32 %v1881_v14, %v340_v17  ;;  %v606_v5 = vsel %vm2674_vm15, %v406_v40, 0.0  ;;  %v1018_v50 = vrot.slane %v605_v55, 1 }
  0xf8   : > { %1795 = vmatprep.mubr.msk.f32.mxu0 %vm1269_vm8, %v1248_v26  ;;  %v1019_v3 = vrot.slane %v606_v5, 1  ;;  %v1072_v10 = vrot.slane %v606_v5, 2 }
  0xf9   : > { %v2646_v12 = vpop.permute.xlu1 %880  ;;  %v2648_v13 = vpop.permute.xlu0 %689  ;;  %v916_v1 = vsel %vm2939_vm11, %v914_v33, %v915_v9  ;;  %vm517_vm11 = vmand %vm2674_vm15, %vm487_vm7  ;;  %v407_v59 = vmax.f32 %v377_v41, 0.0 }
  0xfa   : > { %v1020_v2 = vsel %vm632_vm12, %v1018_v50, %v1019_v3  ;;  %vm2944_vm7 = vmmov %vm2943_vm5 }
  0xfb   : > { %1047 = vrot.lane.b32.xlu1 %v863_v7, %s1928_s28  ;;  %995 = vrot.lane.b32.xlu0 %v2617_v47, %s1927_s7  ;;  %v607_v61 = vsel %vm517_vm11, %v407_v59, 0.0 }
  0xfc   : > { %v1021_v26 = vrot.slane %v607_v61, 1  ;;  %v1074_v15 = vrot.slane %v607_v61, 2 }
  0xfd   : > { %v1087_v29 = vpop.permute.xlu1 %1086  ;;  %v932_v4 = vpop.permute.xlu0 %931 }
  0xfe   : > { %v1249_v31 = vsel %vm1243_vm6, %v1232_v45, %v1087_v29  ;;  %v1022_v43 = vsel %vm632_vm12, %v1019_v3, %v1021_v26  ;;  %v1075_v33 = vsel %vm2943_vm5, %v1072_v10, %v1074_v15  ;;  %vm1553_vm12 = vcmask 1040384  }
  0xff   : > { %894 = vrot.lane.b32.xlu1 %v863_v7, %s1925_s14  ;;  %842 = vrot.lane.b32.xlu0 %v2617_v47, %s1922_s11  ;;  %v917_v47 = vrot.slane %v604_v35, 2  ;;  %v1131_v7 = vsel %vm1124_vm10, %v2211_v52, %v2549_v46  ;;  %v1071_v35 = vrot.slane %v605_v55, 2  ;;  %s1720_s11 = sshll.u32 %s2956_s19, 5 }
 0x100   : > { %1796 = vmatmul.mubr.msk.f32.gmra.mxu0 %vm1269_vm8, %v1249_v31  ;;  %v1148_v16 = vsel %vm1141_vm14, %v1131_v7, %v2568_v8  ;;  %s259_s12 = sadd.s32 %s1720_s11, %s1719_s8 }
 0x101   : > { %v2670_v56 = vpop.permute.xlu1 %778  ;;  %v2672_v37 = vpop.permute.xlu0 %691  ;;  %v918_v14 = vsel %vm2942_vm13, %v915_v9, %v917_v47  ;;  %v1165_v54 = vsel %vm1158_vm0, %v1148_v16, %v2583_v21  ;;  %v1073_v9 = vsel %vm2944_vm7, %v1071_v35, %v1072_v10  ;;  %s1721_s25 = sshll.u32 %s259_s12, 3 }
 0x102   : > { %v1182_v52 = vsel %vm1175_vm1, %v1165_v54, %v2611_v32  ;;  %v1132_v32 = vsel %vm1124_vm10, %v2215_v53, %v2570_v11 }
 0x103   : > { %1100 = vrot.lane.b32.xlu1 %v916_v1, %s1929_s10  ;;  %1049 = vrot.lane.b32.xlu0 %v865_v18, %s1928_s28  ;;  %v1199_v46 = vsel %vm1192_vm2, %v1182_v52, %v932_v4  ;;  %v1149_v4 = vsel %vm1141_vm14, %v1132_v32, %v2585_v39 }
 0x104   : > { %v1166_v30 = vsel %vm1158_vm0, %v1149_v4, %v2613_v24 }
 0x105   : > { %v982_v20 = vpop.permute.xlu1 %981  ;;  %v934_v42 = vpop.permute.xlu0 %933  ;;  %v1183_v31 = vsel %vm1175_vm1, %v1166_v30, %v2646_v12 }
 0x106   : > { %v1216_v8 = vsel %vm1209_vm3, %v1199_v46, %v982_v20 }
 0x107   : > { %947 = vrot.lane.b32.xlu1 %v916_v1, %s1926_s15  ;;  %896 = vrot.lane.b32.xlu0 %v865_v18, %s1925_s14  ;;  %v1200_v1 = vsel %vm1192_vm2, %v1183_v31, %v934_v42  ;;  %v1133_v42 = vsel %vm1124_vm10, %v2267_v22, %v2648_v13  ;;  %v1134_v22 = vsel %vm1124_vm10, %v2271_v23, %v2672_v37 }
 0x108   : > { %v1150_v63 = vsel %vm1141_vm14, %v1133_v42, %v2670_v56 }
 0x109   : > { %v829_v48 = vpop.permute.xlu1 %828  ;;  %v2691_v49 = vpop.permute.xlu0 %780 }
 0x10a   : > { %v1167_v59 = vsel %vm1158_vm0, %v1150_v63, %v829_v48  ;;  %v1151_v13 = vsel %vm1141_vm14, %v1134_v22, %v2691_v49 }
 0x10b   : > { %949 = vrot.lane.b32.xlu1 %v918_v14, %s1926_s15  ;;  %1102 = vrot.lane.b32.xlu0 %v918_v14, %s1929_s10  ;;  %s2803_s15 = scalar_lea.vmem %s2916_s4, %s1721_s25 }
 0x10d   : > { %v1036_v0 = vpop.permute.xlu1 %1035  ;;  %v984_v62 = vpop.permute.xlu0 %983 }
 0x10e   : > { %v1233_v51 = vsel %vm1226_vm4, %v1216_v8, %v1036_v0  ;;  %v1217_v53 = vsel %vm1209_vm3, %v1200_v1, %v984_v62 }
 0x10f   : > { %999 = vrot.lane.b32.xlu1 %v606_v5, %s1927_s7  ;;  %997 = vrot.lane.b32.xlu0 %v605_v55, %s1927_s7  ;;  %s1722_s7 = sshll.u32 %s2956_s19, 1 }
 0x111   : > { %v883_v27 = vpop.permute.xlu1 %882  ;;  %v831_v25 = vpop.permute.xlu0 %830 }
 0x112   : > { %v1184_v55 = vsel %vm1175_vm1, %v1167_v59, %v883_v27  ;;  %v1168_v56 = vsel %vm1158_vm0, %v1151_v13, %v831_v25 }
 0x113   : > { %1053 = vrot.lane.b32.xlu1 %v1022_v43, %s1928_s28  ;;  %1051 = vrot.lane.b32.xlu0 %v1020_v2, %s1928_s28  ;;  %s268_s28 = sadd.s32 %s1722_s7, %s2960_s18 }
 0x114   : > { %s1723_s29 = sshll.u32 %s268_s28, 1 }
 0x115   : > { %v1089_v21 = vpop.permute.xlu1 %1088  ;;  %v1038_v45 = vpop.permute.xlu0 %1037  ;;  %s270_s9 = scalar_lea.vmem %s2917_s5, %s1723_s29 }
 0x116   : > { %v1250_v29 = vsel %vm1243_vm6, %v1233_v51, %v1089_v21  ;;  %v1234_v11 = vsel %vm1226_vm4, %v1217_v53, %v1038_v45 }
 0x117   : > { %1106 = vrot.lane.b32.xlu1 %v1075_v33, %s1929_s10  ;;  %1104 = vrot.lane.b32.xlu0 %v1073_v9, %s1929_s10 }
 0x118   : > { %1798 = vmatprep.mubr.msk.f32.mxu0 %vm1269_vm8, %v1250_v29 }
 0x119   : > { %v885_v36 = vpop.permute.xlu1 %884  ;;  %v694_v17 = vpop.permute.xlu0 %693 }
 0x11a   : > { %v1185_v10 = vsel %vm1175_vm1, %v1168_v56, %v885_v36  ;;  %v1135_v33 = vsel %vm1124_vm10, %v2327_v57, %v694_v17 }
 0x11d   : > { %v1091_v18 = vpop.permute.xlu1 %1090  ;;  %v936_v6 = vpop.permute.xlu0 %935 }
 0x11e   : > { %v1251_v39 = vsel %vm1243_vm6, %v1234_v11, %v1091_v18  ;;  %v1201_v61 = vsel %vm1192_vm2, %v1184_v55, %v936_v6 }
 0x11f   : > { %1799 = vmatmul.mubr.msk.f32.gmra.mxu0 %vm1269_vm8, %v1251_v39 }
 0x121   : > { %v783_v38 = vpop.permute.xlu1 %782  ;;  %v696_v41 = vpop.permute.xlu0 %695 }
 0x122   : > { %v1152_v9 = vsel %vm1141_vm14, %v1135_v33, %v783_v38  ;;  %v1136_v57 = vsel %vm1124_vm10, %v2333_v60, %v696_v41 }
 0x125   : > { %v986_v24 = vpop.permute.xlu1 %985  ;;  %v938_v44 = vpop.permute.xlu0 %937 }
 0x126   : > { %v1218_v3 = vsel %vm1209_vm3, %v1201_v61, %v986_v24  ;;  %v1202_v35 = vsel %vm1192_vm2, %v1185_v10, %v938_v44 }
 0x129   : > { %v833_v47 = vpop.permute.xlu1 %832  ;;  %v785_v20 = vpop.permute.xlu0 %784 }
 0x12a   : > { %v1169_v51 = vsel %vm1158_vm0, %v1152_v9, %v833_v47  ;;  %v1153_v17 = vsel %vm1141_vm14, %v1136_v57, %v785_v20 }
 0x12d   : > { %v1040_v40 = vpop.permute.xlu1 %1039  ;;  %v988_v12 = vpop.permute.xlu0 %987 }
 0x12e   : > { %v1235_v50 = vsel %vm1226_vm4, %v1218_v3, %v1040_v40  ;;  %v1219_v16 = vsel %vm1209_vm3, %v1202_v35, %v988_v12 }
 0x131   : > { %v887_v14 = vpop.permute.xlu1 %886  ;;  %v835_v5 = vpop.permute.xlu0 %834 }
 0x132   : > { %v1186_v29 = vsel %vm1175_vm1, %v1169_v51, %v887_v14  ;;  %v1170_v53 = vsel %vm1158_vm0, %v1153_v17, %v835_v5 }
 0x135   : > { %v1093_v26 = vpop.permute.xlu1 %1092  ;;  %v1042_v0 = vpop.permute.xlu0 %1041 }
 0x136   : > { %v1252_v62 = vsel %vm1243_vm6, %v1235_v50, %v1093_v26  ;;  %v1236_v43 = vsel %vm1226_vm4, %v1219_v16, %v1042_v0 }
 0x137   : > { %1801 = vmatprep.mubr.msk.f32.mxu1 %vm1269_vm8, %v1252_v62 }
 0x139   : > { %v889_v48 = vpop.permute.xlu1 %888  ;;  %v698_v7 = vpop.permute.xlu0 %697 }
 0x13a   : > { %v1187_v6 = vsel %vm1175_vm1, %v1170_v53, %v889_v48  ;;  %v1137_v5 = vsel %vm1124_vm10, %v2407_v34, %v698_v7 }
 0x13d   : > { %v1095_v2 = vpop.permute.xlu1 %1094  ;;  %v940_v15 = vpop.permute.xlu0 %939 }
 0x13e   : > { %v1253_v23 = vsel %vm1243_vm6, %v1236_v43, %v1095_v2  ;;  %v1203_v32 = vsel %vm1192_vm2, %v1186_v29, %v940_v15 }
 0x13f   : > { %1802 = vmatmul.mubr.msk.f32.vlgmr.msra.gmra.mxu1 %vm1269_vm8, %v1253_v23 }
 0x141   : > { %v787_v37 = vpop.permute.xlu1 %786  ;;  %v700_v49 = vpop.permute.xlu0 %699 }
 0x142   : > { %v1154_v55 = vsel %vm1141_vm14, %v1137_v5, %v787_v37  ;;  %v1138_v48 = vsel %vm1124_vm10, %v2417_v58, %v700_v49 }
 0x145   : > { %v990_v54 = vpop.permute.xlu1 %989  ;;  %v942_v27 = vpop.permute.xlu0 %941 }
 0x146   : > { %v1220_v4 = vsel %vm1209_vm3, %v1203_v32, %v990_v54  ;;  %v1204_v39 = vsel %vm1192_vm2, %v1187_v6, %v942_v27 }
 0x149   : > { %v837_v25 = vpop.permute.xlu1 %836  ;;  %v789_v52 = vpop.permute.xlu0 %788 }
 0x14a   : > { %v1171_v61 = vsel %vm1158_vm0, %v1154_v55, %v837_v25  ;;  %v1155_v7 = vsel %vm1141_vm14, %v1138_v48, %v789_v52 }
 0x14d   : > { %v1044_v46 = vpop.permute.xlu1 %1043  ;;  %v992_v8 = vpop.permute.xlu0 %991 }
 0x14e   : > { %v1237_v30 = vsel %vm1226_vm4, %v1220_v4, %v1044_v46  ;;  %v1221_v38 = vsel %vm1209_vm3, %v1204_v39, %v992_v8 }
 0x151   : > { %v891_v21 = vpop.permute.xlu1 %890  ;;  %v839_v45 = vpop.permute.xlu0 %838 }
 0x152   : > { %v1188_v26 = vsel %vm1175_vm1, %v1171_v61, %v891_v21  ;;  %v1172_v10 = vsel %vm1158_vm0, %v1155_v7, %v839_v45 }
 0x155   : > { %v1097_v36 = vpop.permute.xlu1 %1096  ;;  %v1046_v31 = vpop.permute.xlu0 %1045 }
 0x156   : > { %v1254_v1 = vsel %vm1243_vm6, %v1237_v30, %v1097_v36  ;;  %v1238_v24 = vsel %vm1226_vm4, %v1221_v38, %v1046_v31 }
 0x157   : > { %1804 = vmatprep.mubr.msk.f32.mxu1 %vm1269_vm8, %v1254_v1 }
 0x159   : > { %v893_v11 = vpop.permute.xlu1 %892  ;;  %v702_v18 = vpop.permute.xlu0 %701 }
 0x15a   : > { %v1189_v43 = vsel %vm1175_vm1, %v1172_v10, %v893_v11  ;;  %v1139_v46 = vsel %vm1124_vm10, %v2507_v19, %v702_v18 }
 0x15d   : > { %v1099_v44 = vpop.permute.xlu1 %1098  ;;  %v944_v60 = vpop.permute.xlu0 %943 }
 0x15e   : > { %v1255_v41 = vsel %vm1243_vm6, %v1238_v24, %v1099_v44  ;;  %v1205_v0 = vsel %vm1192_vm2, %v1188_v26, %v944_v60 }
 0x15f   : > { %1805 = vmatmul.mubr.msk.f32.gmra.mxu1 %vm1269_vm8, %v1255_v41 }
 0x161   : > { %v791_v47 = vpop.permute.xlu1 %790  ;;  %v704_v20 = vpop.permute.xlu0 %703 }
 0x162   : > { %v1140_v33 = vsel %vm1124_vm10, %v2517_v28, %v704_v20  ;;  %v1156_v45 = vsel %vm1141_vm14, %v1139_v46, %v791_v47 }
 0x165   : > { %v994_v40 = vpop.permute.xlu1 %993  ;;  %v946_v12 = vpop.permute.xlu0 %945 }
 0x166   : > { %v1222_v62 = vsel %vm1209_vm3, %v1205_v0, %v994_v40  ;;  %v1206_v2 = vsel %vm1192_vm2, %v1189_v43, %v946_v12 }
 0x169   : > { %v841_v42 = vpop.permute.xlu1 %840  ;;  %v793_v63 = vpop.permute.xlu0 %792 }
 0x16a   : > { %v1157_v29 = vsel %vm1141_vm14, %v1140_v33, %v793_v63  ;;  %v1173_v4 = vsel %vm1158_vm0, %v1156_v45, %v841_v42 }
 0x16d   : > { %v1048_v59 = vpop.permute.xlu1 %1047  ;;  %v996_v14 = vpop.permute.xlu0 %995 }
 0x16e   : > { %v1239_v22 = vsel %vm1226_vm4, %v1222_v62, %v1048_v59  ;;  %v1223_v15 = vsel %vm1209_vm3, %v1206_v2, %v996_v14 }
 0x171   : > { %v895_v3 = vpop.permute.xlu1 %894  ;;  %v843_v50 = vpop.permute.xlu0 %842 }
 0x172   : > { %v1174_v19 = vsel %vm1158_vm0, %v1157_v29, %v843_v50  ;;  %v1190_v1 = vsel %vm1175_vm1, %v1173_v4, %v895_v3 }
 0x175   : > { %v1101_v13 = vpop.permute.xlu1 %1100  ;;  %v1050_v56 = vpop.permute.xlu0 %1049 }
 0x176   : > { %v1256_v34 = vsel %vm1243_vm6, %v1239_v22, %v1101_v13  ;;  %v1240_v23 = vsel %vm1226_vm4, %v1223_v15, %v1050_v56 }
 0x177   : > { %1807 = vmatprep.mubr.msk.f32.mxu1 %vm1269_vm8, %v1256_v34 }
 0x179   : > { %v948_v35 = vpop.permute.xlu1 %947  ;;  %v897_v16 = vpop.permute.xlu0 %896 }
 0x17a   : > { %v1191_v57 = vsel %vm1175_vm1, %v1174_v19, %v897_v16  ;;  %v1207_v53 = vsel %vm1192_vm2, %v1190_v1, %v948_v35 }
 0x17d   : > { %v950_v37 = vpop.permute.xlu1 %949  ;;  %v1103_v58 = vpop.permute.xlu0 %1102 }
 0x17e   : > { %v1257_v49 = vsel %vm1243_vm6, %v1240_v23, %v1103_v58  ;;  %v1208_v11 = vsel %vm1192_vm2, %v1191_v57, %v950_v37 }
 0x17f   : > { %1808 = vmatmul.mubr.msk.f32.gmra.mxu1 %vm1269_vm8, %v1257_v49 }
 0x180   : > { %v1791_v54 = vpop.f32.mrf.mxu0 }
 0x181   : > { %v1501_v27 = vmul.f32 %v1791_v54, %v1791_v54  ;;  %1558 = vst.msk [vmem:[%s2803_s15 + $0x8] sm:$0xff] %vm1124_vm10, %v1791_v54  ;;  %v1000_v25 = vpop.permute.xlu1 %999  ;;  %v998_v52 = vpop.permute.xlu0 %997  ;;  %v1464_v9 = vsel %vm1124_vm10, %v1791_v54, 0.0 }
 0x182   : > { %v1384_v8 = vpop.f32.mrf.mxu0  ;;  %v1225_v18 = vsel %vm1209_vm3, %v1208_v11, %v1000_v25  ;;  %v1224_v6 = vsel %vm1209_vm3, %v1207_v53, %v998_v52 }
 0x183   : > { %v1463_v51 = vsel %vm1124_vm10, %v1384_v8, 0.0  ;;  %v1500_v21 = vmul.f32 %v1384_v8, %v1384_v8  ;;  %1557 = vst.msk [vmem:[%s2803_s15] sm:$0xff] %vm1124_vm10, %v1384_v8  ;;  %v1517_v30 = vsel %vm1124_vm10, %v1501_v27, 0.0 }
 0x184   : > { %v1465_v32 = vadd.f32 %v1464_v9, %v1463_v51 }
 0x185   : > { %v1516_v28 = vsel %vm1124_vm10, %v1500_v21, 0.0  ;;  %v1054_v36 = vpop.permute.xlu1 %1053  ;;  %v1052_v31 = vpop.permute.xlu0 %1051 }
 0x186   : > { %v1518_v17 = vadd.f32 %v1517_v30, %v1516_v28  ;;  %v1242_v39 = vsel %vm1226_vm4, %v1225_v18, %v1054_v36  ;;  %v1241_v38 = vsel %vm1226_vm4, %v1224_v6, %v1052_v31 }
 0x189   : > { %v1107_v24 = vpop.permute.xlu1 %1106  ;;  %v1105_v44 = vpop.permute.xlu0 %1104 }
 0x18a   : > { %v1259_v60 = vsel %vm1243_vm6, %v1242_v39, %v1107_v24  ;;  %v1258_v41 = vsel %vm1243_vm6, %v1241_v38, %v1105_v44 }
 0x18b   : > { %1810 = vmatprep.mubr.msk.f32.mxu1 %vm1269_vm8, %v1258_v41 }
 0x18c   : > { %1811 = vmatmul.mubr.msk.f32.gmra.mxu1 %vm1269_vm8, %v1259_v60 }
 0x1a0   : > { %v1794_v47 = vpop.f32.mrf.mxu0 }
 0x1a1   : > { %1560 = vst.msk [vmem:[%s2803_s15 + $0x18] sm:$0xff] %vm1124_vm10, %v1794_v47  ;;  %v1503_v40 = vmul.f32 %v1794_v47, %v1794_v47  ;;  %v1468_v59 = vsel %vm1124_vm10, %v1794_v47, 0.0 }
 0x1a2   : > { %v1394_v20 = vpop.f32.mrf.mxu0 }
 0x1a3   : > { %v1466_v12 = vsel %vm1124_vm10, %v1394_v20, 0.0  ;;  %v1502_v42 = vmul.f32 %v1394_v20, %v1394_v20  ;;  %1559 = vst.msk [vmem:[%s2803_s15 + $0x10] sm:$0xff] %vm1124_vm10, %v1394_v20  ;;  %v1521_v61 = vsel %vm1124_vm10, %v1503_v40, 0.0 }
 0x1a4   : > { %v1467_v63 = vadd.f32 %v1466_v12, %v1465_v32 }
 0x1a5   : > { %v1519_v14 = vsel %vm1124_vm10, %v1502_v42, 0.0 }
 0x1a6   : > { %v1520_v5 = vadd.f32 %v1519_v14, %v1518_v17  ;;  %v1469_v55 = vadd.f32 %v1468_v59, %v1467_v63 }
 0x1a8   : > { %v1522_v3 = vadd.f32 %v1521_v61, %v1520_v5 }
 0x1c0   : > { %v1797_v50 = vpop.f32.mrf.mxu0 }
 0x1c1   : > { %1562 = vst.msk [vmem:[%s2803_s15 + $0x28] sm:$0xff] %vm1124_vm10, %v1797_v50  ;;  %v1505_v0 = vmul.f32 %v1797_v50, %v1797_v50  ;;  %v1472_v56 = vsel %vm1124_vm10, %v1797_v50, 0.0 }
 0x1c2   : > { %v1404_v26 = vpop.f32.mrf.mxu0 }
 0x1c3   : > { %v1470_v62 = vsel %vm1124_vm10, %v1404_v26, 0.0  ;;  %v1504_v22 = vmul.f32 %v1404_v26, %v1404_v26  ;;  %1561 = vst.msk [vmem:[%s2803_s15 + $0x20] sm:$0xff] %vm1124_vm10, %v1404_v26  ;;  %v1525_v10 = vsel %vm1124_vm10, %v1505_v0, 0.0 }
 0x1c4   : > { %v1471_v13 = vadd.f32 %v1470_v62, %v1469_v55 }
 0x1c5   : > { %v1523_v34 = vsel %vm1124_vm10, %v1504_v22, 0.0 }
 0x1c6   : > { %v1524_v48 = vadd.f32 %v1523_v34, %v1522_v3  ;;  %v1473_v7 = vadd.f32 %v1472_v56, %v1471_v13 }
 0x1c8   : > { %v1526_v35 = vadd.f32 %v1525_v10, %v1524_v48 }
 0x1df   : > { %v1800_v16 = vpop.f32.mrf.mxu0 }
 0x1e0   : > { %1564 = vst.msk [vmem:[%s2803_s15 + $0x38] sm:$0xff] %vm1124_vm10, %v1800_v16  ;;  %v1507_v2 = vmul.f32 %v1800_v16, %v1800_v16  ;;  %v1476_v58 = vsel %vm1124_vm10, %v1800_v16, 0.0 }
 0x1e1   : > { %v1414_v43 = vpop.f32.mrf.mxu0 }
 0x1e2   : > { %v1474_v15 = vsel %vm1124_vm10, %v1414_v43, 0.0  ;;  %v1506_v23 = vmul.f32 %v1414_v43, %v1414_v43  ;;  %1563 = vst.msk [vmem:[%s2803_s15 + $0x30] sm:$0xff] %vm1124_vm10, %v1414_v43  ;;  %v1529_v25 = vsel %vm1124_vm10, %v1507_v2, 0.0 }
 0x1e3   : > { %v1475_v37 = vadd.f32 %v1474_v15, %v1473_v7 }
 0x1e4   : > { %v1527_v49 = vsel %vm1124_vm10, %v1506_v23, 0.0 }
 0x1e5   : > { %v1477_v54 = vadd.f32 %v1476_v58, %v1475_v37  ;;  %v1528_v27 = vadd.f32 %v1527_v49, %v1526_v35 }
 0x1e7   : > { %v1530_v52 = vadd.f32 %v1529_v25, %v1528_v27 }
 0x1ff   : > { %v1803_v46 = vpop.f32.mrf.mxu1 }
 0x200   : > { %1566 = vst.msk [vmem:[%s2803_s15 + $0x48] sm:$0xff] %vm1124_vm10, %v1803_v46  ;;  %v1509_v33 = vmul.f32 %v1803_v46, %v1803_v46  ;;  %v1480_v45 = vsel %vm1124_vm10, %v1803_v46, 0.0 }
 0x201   : > { %v1424_v8 = vpop.f32.mrf.mxu1 }
 0x202   : > { %v1478_v9 = vsel %vm1124_vm10, %v1424_v8, 0.0  ;;  %v1508_v51 = vmul.f32 %v1424_v8, %v1424_v8  ;;  %1565 = vst.msk [vmem:[%s2803_s15 + $0x40] sm:$0xff] %vm1124_vm10, %v1424_v8  ;;  %v1533_v19 = vsel %vm1124_vm10, %v1509_v33, 0.0 }
 0x203   : > { %v1479_v21 = vadd.f32 %v1478_v9, %v1477_v54 }
 0x204   : > { %v1531_v29 = vsel %vm1124_vm10, %v1508_v51, 0.0 }
 0x205   : > { %v1532_v32 = vadd.f32 %v1531_v29, %v1530_v52  ;;  %v1481_v4 = vadd.f32 %v1480_v45, %v1479_v21 }
 0x207   : > { %v1534_v30 = vadd.f32 %v1533_v19, %v1532_v32 }
 0x21f   : > { %v1806_v28 = vpop.f32.mrf.mxu1 }
 0x220   : > { %1568 = vst.msk [vmem:[%s2803_s15 + $0x58] sm:$0xff] %vm1124_vm10, %v1806_v28  ;;  %v1511_v18 = vmul.f32 %v1806_v28, %v1806_v28  ;;  %v1484_v38 = vsel %vm1124_vm10, %v1806_v28, 0.0 }
 0x221   : > { %v1434_v36 = vpop.f32.mrf.mxu1 }
 0x222   : > { %1567 = vst.msk [vmem:[%s2803_s15 + $0x50] sm:$0xff] %vm1124_vm10, %v1434_v36  ;;  %v1510_v31 = vmul.f32 %v1434_v36, %v1434_v36  ;;  %v1482_v57 = vsel %vm1124_vm10, %v1434_v36, 0.0  ;;  %v1537_v60 = vsel %vm1124_vm10, %v1511_v18, 0.0 }
 0x223   : > { %v1483_v11 = vadd.f32 %v1482_v57, %v1481_v4 }
 0x224   : > { %v1535_v53 = vsel %vm1124_vm10, %v1510_v31, 0.0 }
 0x225   : > { %v1536_v39 = vadd.f32 %v1535_v53, %v1534_v30  ;;  %v1485_v44 = vadd.f32 %v1484_v38, %v1483_v11 }
 0x227   : > { %v1538_v20 = vadd.f32 %v1537_v60, %v1536_v39 }
 0x23f   : > { %v1809_v1 = vpop.f32.mrf.mxu1 }
 0x240   : > { %1570 = vst.msk [vmem:[%s2803_s15 + $0x68] sm:$0xff] %vm1124_vm10, %v1809_v1  ;;  %v1513_v40 = vmul.f32 %v1809_v1, %v1809_v1  ;;  %v1488_v63 = vsel %vm1124_vm10, %v1809_v1, 0.0 }
 0x241   : > { %v1444_v17 = vpop.f32.mrf.mxu1 }
 0x242   : > { %1569 = vst.msk [vmem:[%s2803_s15 + $0x60] sm:$0xff] %vm1124_vm10, %v1444_v17  ;;  %v1512_v6 = vmul.f32 %v1444_v17, %v1444_v17  ;;  %v1486_v24 = vsel %vm1124_vm10, %v1444_v17, 0.0  ;;  %v1541_v5 = vsel %vm1124_vm10, %v1513_v40, 0.0 }
 0x243   : > { %v1487_v47 = vadd.f32 %v1486_v24, %v1485_v44 }
 0x244   : > { %v1539_v41 = vsel %vm1124_vm10, %v1512_v6, 0.0 }
 0x245   : > { %v1540_v12 = vadd.f32 %v1539_v41, %v1538_v20  ;;  %v1489_v14 = vadd.f32 %v1488_v63, %v1487_v47 }
 0x247   : > { %v1542_v26 = vadd.f32 %v1541_v5, %v1540_v12 }
 0x24c   : > { %v1812_v42 = vpop.f32.mrf.mxu1 }
 0x24d   : > { %1572 = vst.msk [vmem:[%s2803_s15 + $0x78] sm:$0xff] %vm1124_vm10, %v1812_v42  ;;  %v1515_v55 = vmul.f32 %v1812_v42, %v1812_v42  ;;  %v1492_v0 = vsel %vm1124_vm10, %v1812_v42, 0.0 }
 0x24e   : > { %v1454_v59 = vpop.f32.mrf.mxu1 }
 0x24f   : > { %v1490_v61 = vsel %vm1124_vm10, %v1454_v59, 0.0  ;;  %v1514_v3 = vmul.f32 %v1454_v59, %v1454_v59  ;;  %1571 = vst.msk [vmem:[%s2803_s15 + $0x70] sm:$0xff] %vm1124_vm10, %v1454_v59  ;;  %v1545_v56 = vsel %vm1124_vm10, %v1515_v55, 0.0 }
 0x250   : > { %v1491_v50 = vadd.f32 %v1490_v61, %v1489_v14 }
 0x251   : > { %v1543_v62 = vsel %vm1124_vm10, %v1514_v3, 0.0  ;;  %vm1555_vm10 = vcmask 58368  }
 0x252   : > { %v1493_v22 = vadd.f32 %v1492_v0, %v1491_v50  ;;  %v1544_v13 = vadd.f32 %v1543_v62, %v1542_v26 }
 0x254   : > { %v1494_v34 = vrot.slane %v1493_v22, 4  ;;  %v1546_v48 = vadd.f32 %v1545_v56, %v1544_v13 }
 0x256   : > { %v1495_v7 = vadd.f32 %v1494_v34, %v1493_v22  ;;  %v1547_v10 = vrot.slane %v1546_v48, 4 }
 0x258   : > { %v1496_v35 = vrot.slane %v1495_v7, 2  ;;  %v1548_v16 = vadd.f32 %v1547_v10, %v1546_v48 }
 0x25a   : > { %v1497_v43 = vadd.f32 %v1496_v35, %v1495_v7  ;;  %v1549_v2 = vrot.slane %v1548_v16, 2 }
 0x25c   : > { %v1498_v15 = vrot.slane %v1497_v43, 1  ;;  %v1550_v23 = vadd.f32 %v1549_v2, %v1548_v16 }
 0x25e   : > { %v1551_v37 = vrot.slane %v1550_v23, 1  ;;  %v1499_v58 = vadd.f32 %v1498_v15, %v1497_v43 }
 0x260   : > { %v1552_v49 = vadd.f32 %v1551_v37, %v1550_v23 }
 0x262   : > { %v1554_v54 = vsel %vm1553_vm12, %v1499_v58, %v1552_v49 }
 0x263   : > { %1556 = vst.msk [vmem:[%s270_s9] sm:$0x3] %vm1555_vm10, %v1554_v54 }
 0x264 PF: > { %s16_s22 = sadd.s32 1, %s1920_s22   ;;  %s2945_s18 = smov %s1912_s20 }
 0x265   : > { %p13_p8 = scmp.ge.s32.totalorder %s16_s22, 6   ;;  %s2946_s19 = smov %s1916_s21 }
 0x266   : > { %s2947_s20 = smov %s2950_s23  ;;  %s2948_s21 = smov %s2954_s24 }
 0x267   :  { %15 = sbr.rel (!%p13_p8) target bundleno = 3 (0x3), region = 79 }

</bundles_post_ra>
